<compile_context>
chip_gen: v5e
topology: v5e:2x2
jax: 0.10.0
libtpu: 0.0.40
codegen_flags: <defaults>
</compile_context>

<pallas_src>
import jax
import jax.numpy as jnp
from jax.experimental import pallas as pl
from jax.experimental.pallas import tpu as pltpu


# ----------------------------- Pallas kernel --------------------------------

def _make_rule_parser_kernel(n_row, n_col, block_b):
    def kernel(x_row_ref, x_col_ref,
               w1r_ref, b1r_ref, w2r_ref, b2r_ref, wfr_ref,
               w1c_ref, b1c_ref, w2c_ref, b2c_ref, wfc_ref,
               bcomb_ref, wc2_ref, bc2_ref, wc3_ref, bc3_ref,
               out_ref):
        f32 = jnp.float32
        bf16 = jnp.bfloat16

        def enc_path(x_ref, n_lines, w1, b1, w2, b2, wf):
            # x_ref: (n_lines*block_b, K) bf16 -- ONE matmul per layer at M = n_lines*block_b
            # (wrapper already merged the row/col axis into the batch tile, zero-copy).
            x = x_ref[...]
            h = jnp.dot(x, w1, preferred_element_type=f32) + b1          # (M, 512) f32
            h = jnp.maximum(h, 0.0).astype(bf16)
            h = jnp.dot(h, w2, preferred_element_type=f32) + b2          # (M, 512) f32
            h = jnp.maximum(h, 0.0).astype(bf16)
            y = jnp.dot(h, wf, preferred_element_type=f32)               # (M, 64)  f32
            # mean over rows/cols: 1/n_lines is folded into wf -> just sum the groups.
            # block_b is a multiple of 16, so every slice is sublane-aligned.
            acc = y[0:block_b, :]
            for r in range(1, n_lines):
                acc = acc + y[r * block_b:(r + 1) * block_b, :]
            return acc                                                    # (block_b, 64) f32

        # Weights loaded once per grid step; constant index_maps keep them VMEM-resident.
        row_c = enc_path(x_row_ref, n_row, w1r_ref[...], b1r_ref[...],
                         w2r_ref[...], b2r_ref[...], wfr_ref[...])
        col_c = enc_path(x_col_ref, n_col, w1c_ref[...], b1c_ref[...],
                         w2c_ref[...], b2c_ref[...], wfc_ref[...])

        # rule_comb: layer-1 bias already folded into bcomb (b3r@wc1_row + b3c@wc1_col + bc1).
        h = jnp.maximum(row_c + col_c + bcomb_ref[...], 0.0).astype(bf16)
        h = jnp.maximum(jnp.dot(h, wc2_ref[...], preferred_element_type=f32)
                        + bc2_ref[...], 0.0).astype(bf16)
        out_ref[...] = jnp.dot(h, wc3_ref[...], preferred_element_type=f32) + bc3_ref[...]

    return kernel


# ------------------------------ JAX wrapper ----------------------------------

def rule_parser_forward(params, x, mask=None, block_b=None):
    """x: (B, N, D) float32, mask: optional (N,) or (n_row, n_col) float32 in {0,1}."""
    n_row = params["num_row"]
    n_col = params["num_col"]
    b, n, d = x.shape
    assert n == n_row * n_col

    x4 = x.reshape(b, n_row, n_col, d)
    if mask is not None:
        m = mask.reshape(1, n_row, n_col, 1).astype(x4.dtype)
        init_mat = jnp.broadcast_to(params["init_val"][None], x4.shape)
        x4 = x4 * (1.0 - m) + init_mat * m

    bf16 = jnp.bfloat16
    f32 = jnp.float32
    k_row = n_col * d
    k_col = n_row * d

    # ---- batch tile: multiple of 16 (bf16 sublane tiling), M = n_lines*block_b ~ 256 ----
    if block_b is None:
        b16 = ((b + 15) // 16) * 16
        n_min = max(1, min(n_row, n_col))
        tgt = ((-(-256 // n_min) + 15) // 16) * 16          # ceil(256 / n_lines), mult of 16
        block_b = min(b16, tgt)
        # prefer >= 2 grid steps when the batch allows (v7x megacore: both TCs busy)
        if b16 // block_b < 2 and b16 >= 32:
            block_b = max(16, ((b16 // 2) // 16) * 16)
    assert block_b > 0 and block_b % 16 == 0, "block_b must be a positive multiple of 16"

    b_pad = ((b + block_b - 1) // block_b) * block_b
    grid_b = b_pad // block_b

    # Row path: (B, n_row, K_row); Col path: (B, n_col, K_col) -- matches PyTorch reshapes.
    x_row = x4.reshape(b, n_row, k_row)
    x_col = jnp.transpose(x4, (0, 2, 1, 3)).reshape(b, n_col, k_col)
    if b_pad != b:
        pad = b_pad - b
        x_row = jnp.concatenate([x_row, jnp.zeros((pad, n_row, k_row), x_row.dtype)], 0)
        x_col = jnp.concatenate([x_col, jnp.zeros((pad, n_col, k_col), x_col.dtype)], 0)

    # Per batch-tile contiguous (n_lines*block_b, K) slab so the kernel does one big-M matmul:
    #   flat row  t*(n_lines*block_b) + r*block_b + j  ==  sample (t*block_b + j), line r.
    x_row = (x_row.reshape(grid_b, block_b, n_row, k_row)
                  .transpose(0, 2, 1, 3)
                  .reshape(grid_b * n_row * block_b, k_row).astype(bf16))
    x_col = (x_col.reshape(grid_b, block_b, n_col, k_col)
                  .transpose(0, 2, 1, 3)
                  .reshape(grid_b * n_col * block_b, k_col).astype(bf16))

    num_rule = params["wc3"].shape[1]
    np_pad = max(128, ((num_rule + 127) // 128) * 128)       # lane-dense output slab

    # Algebraic fusion (exact in real arithmetic), with the 1/n mean folded into the weights:
    #   mean(h2 @ w3 + b3) @ wc1 == sum(h2) @ (w3 @ wc1 / n) + b3 @ wc1
    wfr = ((params["w3r"] @ params["wc1_row"]) * (1.0 / n_row)).astype(bf16)   # (512, 64)
    wfc = ((params["w3c"] @ params["wc1_col"]) * (1.0 / n_col)).astype(bf16)   # (512, 64)
    bcomb = (params["b3r"] @ params["wc1_row"]
             + params["b3c"] @ params["wc1_col"] + params["bc1"]).astype(f32)  # (1, 64)

    # Pad final layer to 128 output lanes so the store is lane-dense (unmasked vst).
    wc3p = jnp.zeros((params["wc3"].shape[0], np_pad), f32).at[:, :num_rule].set(
        params["wc3"]).astype(bf16)
    bc3p = jnp.zeros((1, np_pad), f32).at[:, :num_rule].set(params["bc3"])

    weights = (
        params["w1r"].astype(bf16), params["b1r"].astype(f32),
        params["w2r"].astype(bf16), params["b2r"].astype(f32), wfr,
        params["w1c"].astype(bf16), params["b1c"].astype(f32),
        params["w2c"].astype(bf16), params["b2c"].astype(f32), wfc,
        bcomb, params["wc2"].astype(bf16), params["bc2"].astype(f32), wc3p, bc3p,
    )

    def w_spec(a):
        nd = a.ndim
        # Constant index_map -> weight block stays VMEM-resident across grid steps.
        return pl.BlockSpec(a.shape, lambda i, _nd=nd: (0,) * _nd)

    in_specs = (
        [pl.BlockSpec((n_row * block_b, k_row), lambda i: (i, 0)),
         pl.BlockSpec((n_col * block_b, k_col), lambda i: (i, 0))]
        + [w_spec(a) for a in weights]
    )
    out_spec = pl.BlockSpec((block_b, np_pad), lambda i: (i, 0))

    kernel = _make_rule_parser_kernel(n_row, n_col, block_b)
    out_padded = pl.pallas_call(
        kernel,
        out_shape=jax.ShapeDtypeStruct((b_pad, np_pad), f32),
        grid=(grid_b,),
        in_specs=in_specs,
        out_specs=out_spec,
        compiler_params=pltpu.CompilerParams(
            dimension_semantics=("parallel",),        # batch tiles shard across v7x TCs
            vmem_limit_bytes=32 * 1024 * 1024,        # safe on v5e/v6e/v7x (tiles are small)
        ),
    )(x_row, x_col, *weights)

    return out_padded[:b, :num_rule]


# -------------------------- deterministic params ------------------------------

def make_params(key, num_row, num_col, concept_size, num_rule, hidden_dim):
    in_row = concept_size * num_col
    in_col = concept_size * num_row

    def linear(key, fan_in, fan_out):
        kw, kb = jax.random.split(key)
        bound = 1.0 / jnp.sqrt(fan_in)
        w = jax.random.uniform(kw, (fan_in, fan_out), jnp.float32, -bound, bound)
        bvec = jax.random.uniform(kb, (1, fan_out), jnp.float32, -bound, bound)
        return w, bvec

    keys = jax.random.split(key, 9)
    w1r, b1r = linear(keys[0], in_row, 512)
    w2r, b2r = linear(keys[1], 512, 512)
    w3r, b3r = linear(keys[2], 512, hidden_dim)
    w1c, b1c = linear(keys[3], in_col, 512)
    w2c, b2c = linear(keys[4], 512, 512)
    w3c, b3c = linear(keys[5], 512, hidden_dim)
    wc1, bc1 = linear(keys[6], hidden_dim * 2, 64)
    wc2, bc2 = linear(keys[7], 64, 64)
    wc3, bc3 = linear(keys[8], 64, num_rule)

    return {
        "num_row": num_row, "num_col": num_col,
        "init_val": jnp.zeros((num_row, num_col, concept_size), jnp.float32),
        "w1r": w1r, "b1r": b1r, "w2r": w2r, "b2r": b2r, "w3r": w3r, "b3r": b3r,
        "w1c": w1c, "b1c": b1c, "w2c": w2c, "b2c": b2c, "w3c": w3c, "b3c": b3c,
        "wc1_row": wc1[:hidden_dim, :], "wc1_col": wc1[hidden_dim:, :], "bc1": bc1,
        "wc2": wc2, "bc2": bc2, "wc3": wc3, "bc3": bc3,
    }


# ------------------------------ pure-JAX reference ----------------------------

def reference_forward(params, x, mask=None):
    n_row, n_col = params["num_row"], params["num_col"]
    b, n, d = x.shape
    x4 = x.reshape(b, n_row, n_col, d)
    if mask is not None:
        m = mask.reshape(1, n_row, n_col, 1).astype(x4.dtype)
        x4 = x4 * (1.0 - m) + params["init_val"][None] * m

    def mlp3(h, w1, b1, w2, b2, w3, b3):
        h = jax.nn.relu(h @ w1 + b1)
        h = jax.nn.relu(h @ w2 + b2)
        return h @ w3 + b3

    row_repr = mlp3(x4.reshape(b, n_row, -1),
                    params["w1r"], params["b1r"], params["w2r"], params["b2r"],
                    params["w3r"], params["b3r"]).mean(1)
    col_repr = mlp3(jnp.transpose(x4, (0, 2, 1, 3)).reshape(b, n_col, -1),
                    params["w1c"], params["b1c"], params["w2c"], params["b2c"],
                    params["w3c"], params["b3c"]).mean(1)
    h = jax.nn.relu(row_repr @ params["wc1_row"] + col_repr @ params["wc1_col"]
                    + params["bc1"])
    h = jax.nn.relu(h @ params["wc2"] + params["bc2"])
    return h @ params["wc3"] + params["bc3"]


# ------------------------------------ main ------------------------------------

if __name__ == "__main__":
    B = 2
    NUM_ROW, NUM_COL = 3, 3
    NUM_NODE = NUM_ROW * NUM_COL
    CONCEPT = 16
    HIDDEN = 32
    NUM_RULE = 8

    key = jax.random.PRNGKey(0)
    k_param, k_x = jax.random.split(key)

    params = make_params(k_param, NUM_ROW, NUM_COL, CONCEPT, NUM_RULE, HIDDEN)
    x = jax.random.normal(k_x, (B, NUM_NODE, CONCEPT), jnp.float32)

    # mask the last cell of the grid (exercises init_matrix / init_val path)
    mask = jnp.zeros((NUM_ROW, NUM_COL), jnp.float32).at[-1, -1].set(1.0)

    out = rule_parser_forward(params, x, mask=mask)
    out = jax.block_until_ready(out)

    ref = reference_forward(params, x, mask=mask)
    assert out.shape == (B, NUM_RULE)
    # bf16 weights/activations (f32 accumulation) -> compare against f32 reference
    # with a relaxed tolerance.
    assert jnp.allclose(out, ref, rtol=5e-2, atol=5e-2), "mismatch vs reference"

    print("KERNEL_OK")
</pallas_src>

<mosaic_0001>
module attributes {stable_mosaic.version = 11 : i64} {
  func.func @kernel(%arg0: i32, %arg1: memref<48x48xbf16, #tpu.memory_space<vmem>>, %arg2: memref<48x48xbf16, #tpu.memory_space<vmem>>, %arg3: memref<48x512xbf16, #tpu.memory_space<vmem>>, %arg4: memref<1x512xf32, #tpu.memory_space<vmem>>, %arg5: memref<512x512xbf16, #tpu.memory_space<vmem>>, %arg6: memref<1x512xf32, #tpu.memory_space<vmem>>, %arg7: memref<512x64xbf16, #tpu.memory_space<vmem>>, %arg8: memref<48x512xbf16, #tpu.memory_space<vmem>>, %arg9: memref<1x512xf32, #tpu.memory_space<vmem>>, %arg10: memref<512x512xbf16, #tpu.memory_space<vmem>>, %arg11: memref<1x512xf32, #tpu.memory_space<vmem>>, %arg12: memref<512x64xbf16, #tpu.memory_space<vmem>>, %arg13: memref<1x64xf32, #tpu.memory_space<vmem>>, %arg14: memref<64x64xbf16, #tpu.memory_space<vmem>>, %arg15: memref<1x64xf32, #tpu.memory_space<vmem>>, %arg16: memref<64x128xbf16, #tpu.memory_space<vmem>>, %arg17: memref<1x128xf32, #tpu.memory_space<vmem>>, %arg18: memref<16x128xf32, #tpu.memory_space<vmem>>) attributes {dimension_semantics = [#tpu.dimension_semantics<parallel>], iteration_bounds = array<i64: 1>, scalar_prefetch = 0 : i64, scratch_operands = 0 : i64, tpu.core_type = #tpu.core_type<tc>, window_params = [{transform_indices = @transform_0, window_bounds = array<i64: 48, 48>}, {transform_indices = @transform_1, window_bounds = array<i64: 48, 48>}, {pipeline_mode = #tpu.pipeline_mode<synchronous>, transform_indices = @transform_2, window_bounds = array<i64: 48, 512>}, {pipeline_mode = #tpu.pipeline_mode<synchronous>, transform_indices = @transform_3, window_bounds = array<i64: 1, 512>}, {pipeline_mode = #tpu.pipeline_mode<synchronous>, transform_indices = @transform_4, window_bounds = array<i64: 512, 512>}, {pipeline_mode = #tpu.pipeline_mode<synchronous>, transform_indices = @transform_5, window_bounds = array<i64: 1, 512>}, {pipeline_mode = #tpu.pipeline_mode<synchronous>, transform_indices = @transform_6, window_bounds = array<i64: 512, 64>}, {pipeline_mode = #tpu.pipeline_mode<synchronous>, transform_indices = @transform_7, window_bounds = array<i64: 48, 512>}, {pipeline_mode = #tpu.pipeline_mode<synchronous>, transform_indices = @transform_8, window_bounds = array<i64: 1, 512>}, {pipeline_mode = #tpu.pipeline_mode<synchronous>, transform_indices = @transform_9, window_bounds = array<i64: 512, 512>}, {pipeline_mode = #tpu.pipeline_mode<synchronous>, transform_indices = @transform_10, window_bounds = array<i64: 1, 512>}, {pipeline_mode = #tpu.pipeline_mode<synchronous>, transform_indices = @transform_11, window_bounds = array<i64: 512, 64>}, {pipeline_mode = #tpu.pipeline_mode<synchronous>, transform_indices = @transform_12, window_bounds = array<i64: 1, 64>}, {pipeline_mode = #tpu.pipeline_mode<synchronous>, transform_indices = @transform_13, window_bounds = array<i64: 64, 64>}, {pipeline_mode = #tpu.pipeline_mode<synchronous>, transform_indices = @transform_14, window_bounds = array<i64: 1, 64>}, {pipeline_mode = #tpu.pipeline_mode<synchronous>, transform_indices = @transform_15, window_bounds = array<i64: 64, 128>}, {pipeline_mode = #tpu.pipeline_mode<synchronous>, transform_indices = @transform_16, window_bounds = array<i64: 1, 128>}, {transform_indices = @transform_17, window_bounds = array<i64: 16, 128>}]} {
    %c0 = arith.constant 0 : index
    %c0_0 = arith.constant 0 : index
    %0 = vector.load %arg3[%c0, %c0_0] : memref<48x512xbf16, #tpu.memory_space<vmem>>, vector<48x512xbf16>
    %c0_1 = arith.constant 0 : index
    %c0_2 = arith.constant 0 : index
    %1 = vector.load %arg4[%c0_1, %c0_2] : memref<1x512xf32, #tpu.memory_space<vmem>>, vector<1x512xf32>
    %c0_3 = arith.constant 0 : index
    %c0_4 = arith.constant 0 : index
    %2 = vector.load %arg5[%c0_3, %c0_4] : memref<512x512xbf16, #tpu.memory_space<vmem>>, vector<512x512xbf16>
    %c0_5 = arith.constant 0 : index
    %c0_6 = arith.constant 0 : index
    %3 = vector.load %arg6[%c0_5, %c0_6] : memref<1x512xf32, #tpu.memory_space<vmem>>, vector<1x512xf32>
    %c0_7 = arith.constant 0 : index
    %c0_8 = arith.constant 0 : index
    %4 = vector.load %arg7[%c0_7, %c0_8] : memref<512x64xbf16, #tpu.memory_space<vmem>>, vector<512x64xbf16>
    %c0_9 = arith.constant 0 : index
    %c0_10 = arith.constant 0 : index
    %5 = vector.load %arg1[%c0_9, %c0_10] : memref<48x48xbf16, #tpu.memory_space<vmem>>, vector<48x48xbf16>
    %cst = arith.constant dense<0.000000e+00> : vector<48x512xf32>
    %6 = tpu.matmul %5, %0, %cst {dimension_numbers = #tpu.dot_dimension_numbers<[1], [0], [0], [1], [0, 0, 1, 1], [], []>} : vector<48x48xbf16>, vector<48x512xbf16>, vector<48x512xf32> -> vector<48x512xf32>
    %7 = vector.broadcast %1 : vector<1x512xf32> to vector<48x512xf32>
    %8 = arith.addf %6, %7 : vector<48x512xf32>
    %cst_11 = arith.constant 0.000000e+00 : f32
    %9 = vector.broadcast %cst_11 : f32 to vector<48x512xf32>
    %10 = arith.maximumf %8, %9 : vector<48x512xf32>
    %11 = arith.truncf %10 : vector<48x512xf32> to vector<48x512xbf16>
    %cst_12 = arith.constant dense<0.000000e+00> : vector<48x512xf32>
    %12 = tpu.matmul %11, %2, %cst_12 {dimension_numbers = #tpu.dot_dimension_numbers<[1], [0], [0], [1], [0, 0, 1, 1], [], []>} : vector<48x512xbf16>, vector<512x512xbf16>, vector<48x512xf32> -> vector<48x512xf32>
    %13 = vector.broadcast %3 : vector<1x512xf32> to vector<48x512xf32>
    %14 = arith.addf %12, %13 : vector<48x512xf32>
    %cst_13 = arith.constant 0.000000e+00 : f32
    %15 = vector.broadcast %cst_13 : f32 to vector<48x512xf32>
    %16 = arith.maximumf %14, %15 : vector<48x512xf32>
    %17 = arith.truncf %16 : vector<48x512xf32> to vector<48x512xbf16>
    %cst_14 = arith.constant dense<0.000000e+00> : vector<48x64xf32>
    %18 = tpu.matmul %17, %4, %cst_14 {dimension_numbers = #tpu.dot_dimension_numbers<[1], [0], [0], [1], [0, 0, 1, 1], [], []>} : vector<48x512xbf16>, vector<512x64xbf16>, vector<48x64xf32> -> vector<48x64xf32>
    %19 = vector.extract_strided_slice %18 {offsets = [0, 0], sizes = [16, 64], strides = [1, 1]} : vector<48x64xf32> to vector<16x64xf32>
    %20 = vector.extract_strided_slice %18 {offsets = [16, 0], sizes = [16, 64], strides = [1, 1]} : vector<48x64xf32> to vector<16x64xf32>
    %21 = arith.addf %19, %20 : vector<16x64xf32>
    %22 = vector.extract_strided_slice %18 {offsets = [32, 0], sizes = [16, 64], strides = [1, 1]} : vector<48x64xf32> to vector<16x64xf32>
    %23 = arith.addf %21, %22 : vector<16x64xf32>
    %c0_15 = arith.constant 0 : index
    %c0_16 = arith.constant 0 : index
    %24 = vector.load %arg8[%c0_15, %c0_16] : memref<48x512xbf16, #tpu.memory_space<vmem>>, vector<48x512xbf16>
    %c0_17 = arith.constant 0 : index
    %c0_18 = arith.constant 0 : index
    %25 = vector.load %arg9[%c0_17, %c0_18] : memref<1x512xf32, #tpu.memory_space<vmem>>, vector<1x512xf32>
    %c0_19 = arith.constant 0 : index
    %c0_20 = arith.constant 0 : index
    %26 = vector.load %arg10[%c0_19, %c0_20] : memref<512x512xbf16, #tpu.memory_space<vmem>>, vector<512x512xbf16>
    %c0_21 = arith.constant 0 : index
    %c0_22 = arith.constant 0 : index
    %27 = vector.load %arg11[%c0_21, %c0_22] : memref<1x512xf32, #tpu.memory_space<vmem>>, vector<1x512xf32>
    %c0_23 = arith.constant 0 : index
    %c0_24 = arith.constant 0 : index
    %28 = vector.load %arg12[%c0_23, %c0_24] : memref<512x64xbf16, #tpu.memory_space<vmem>>, vector<512x64xbf16>
    %c0_25 = arith.constant 0 : index
    %c0_26 = arith.constant 0 : index
    %29 = vector.load %arg2[%c0_25, %c0_26] : memref<48x48xbf16, #tpu.memory_space<vmem>>, vector<48x48xbf16>
    %cst_27 = arith.constant dense<0.000000e+00> : vector<48x512xf32>
    %30 = tpu.matmul %29, %24, %cst_27 {dimension_numbers = #tpu.dot_dimension_numbers<[1], [0], [0], [1], [0, 0, 1, 1], [], []>} : vector<48x48xbf16>, vector<48x512xbf16>, vector<48x512xf32> -> vector<48x512xf32>
    %31 = vector.broadcast %25 : vector<1x512xf32> to vector<48x512xf32>
    %32 = arith.addf %30, %31 : vector<48x512xf32>
    %cst_28 = arith.constant 0.000000e+00 : f32
    %33 = vector.broadcast %cst_28 : f32 to vector<48x512xf32>
    %34 = arith.maximumf %32, %33 : vector<48x512xf32>
    %35 = arith.truncf %34 : vector<48x512xf32> to vector<48x512xbf16>
    %cst_29 = arith.constant dense<0.000000e+00> : vector<48x512xf32>
    %36 = tpu.matmul %35, %26, %cst_29 {dimension_numbers = #tpu.dot_dimension_numbers<[1], [0], [0], [1], [0, 0, 1, 1], [], []>} : vector<48x512xbf16>, vector<512x512xbf16>, vector<48x512xf32> -> vector<48x512xf32>
    %37 = vector.broadcast %27 : vector<1x512xf32> to vector<48x512xf32>
    %38 = arith.addf %36, %37 : vector<48x512xf32>
    %cst_30 = arith.constant 0.000000e+00 : f32
    %39 = vector.broadcast %cst_30 : f32 to vector<48x512xf32>
    %40 = arith.maximumf %38, %39 : vector<48x512xf32>
    %41 = arith.truncf %40 : vector<48x512xf32> to vector<48x512xbf16>
    %cst_31 = arith.constant dense<0.000000e+00> : vector<48x64xf32>
    %42 = tpu.matmul %41, %28, %cst_31 {dimension_numbers = #tpu.dot_dimension_numbers<[1], [0], [0], [1], [0, 0, 1, 1], [], []>} : vector<48x512xbf16>, vector<512x64xbf16>, vector<48x64xf32> -> vector<48x64xf32>
    %43 = vector.extract_strided_slice %42 {offsets = [0, 0], sizes = [16, 64], strides = [1, 1]} : vector<48x64xf32> to vector<16x64xf32>
    %44 = vector.extract_strided_slice %42 {offsets = [16, 0], sizes = [16, 64], strides = [1, 1]} : vector<48x64xf32> to vector<16x64xf32>
    %45 = arith.addf %43, %44 : vector<16x64xf32>
    %46 = vector.extract_strided_slice %42 {offsets = [32, 0], sizes = [16, 64], strides = [1, 1]} : vector<48x64xf32> to vector<16x64xf32>
    %47 = arith.addf %45, %46 : vector<16x64xf32>
    %48 = arith.addf %23, %47 : vector<16x64xf32>
    %c0_32 = arith.constant 0 : index
    %c0_33 = arith.constant 0 : index
    %49 = vector.load %arg13[%c0_32, %c0_33] : memref<1x64xf32, #tpu.memory_space<vmem>>, vector<1x64xf32>
    %50 = vector.broadcast %49 : vector<1x64xf32> to vector<16x64xf32>
    %51 = arith.addf %48, %50 : vector<16x64xf32>
    %cst_34 = arith.constant 0.000000e+00 : f32
    %52 = vector.broadcast %cst_34 : f32 to vector<16x64xf32>
    %53 = arith.maximumf %51, %52 : vector<16x64xf32>
    %54 = arith.truncf %53 : vector<16x64xf32> to vector<16x64xbf16>
    %c0_35 = arith.constant 0 : index
    %c0_36 = arith.constant 0 : index
    %55 = vector.load %arg14[%c0_35, %c0_36] : memref<64x64xbf16, #tpu.memory_space<vmem>>, vector<64x64xbf16>
    %cst_37 = arith.constant dense<0.000000e+00> : vector<16x64xf32>
    %56 = tpu.matmul %54, %55, %cst_37 {dimension_numbers = #tpu.dot_dimension_numbers<[1], [0], [0], [1], [0, 0, 1, 1], [], []>} : vector<16x64xbf16>, vector<64x64xbf16>, vector<16x64xf32> -> vector<16x64xf32>
    %c0_38 = arith.constant 0 : index
    %c0_39 = arith.constant 0 : index
    %57 = vector.load %arg15[%c0_38, %c0_39] : memref<1x64xf32, #tpu.memory_space<vmem>>, vector<1x64xf32>
    %58 = vector.broadcast %57 : vector<1x64xf32> to vector<16x64xf32>
    %59 = arith.addf %56, %58 : vector<16x64xf32>
    %cst_40 = arith.constant 0.000000e+00 : f32
    %60 = vector.broadcast %cst_40 : f32 to vector<16x64xf32>
    %61 = arith.maximumf %59, %60 : vector<16x64xf32>
    %62 = arith.truncf %61 : vector<16x64xf32> to vector<16x64xbf16>
    %c0_41 = arith.constant 0 : index
    %c0_42 = arith.constant 0 : index
    %63 = vector.load %arg16[%c0_41, %c0_42] : memref<64x128xbf16, #tpu.memory_space<vmem>>, vector<64x128xbf16>
    %cst_43 = arith.constant dense<0.000000e+00> : vector<16x128xf32>
    %64 = tpu.matmul %62, %63, %cst_43 {dimension_numbers = #tpu.dot_dimension_numbers<[1], [0], [0], [1], [0, 0, 1, 1], [], []>} : vector<16x64xbf16>, vector<64x128xbf16>, vector<16x128xf32> -> vector<16x128xf32>
    %c0_44 = arith.constant 0 : index
    %c0_45 = arith.constant 0 : index
    %65 = vector.load %arg17[%c0_44, %c0_45] : memref<1x128xf32, #tpu.memory_space<vmem>>, vector<1x128xf32>
    %66 = vector.broadcast %65 : vector<1x128xf32> to vector<16x128xf32>
    %67 = arith.addf %64, %66 : vector<16x128xf32>
    %c0_46 = arith.constant 0 : index
    %c0_47 = arith.constant 0 : index
    %68 = vector.load %arg18[%c0_46, %c0_47] : memref<16x128xf32, #tpu.memory_space<vmem>>, vector<16x128xf32>
    tpu.vector_store %arg18[%c0_46, %c0_47], %67 {strides = array<i32>} : memref<16x128xf32, #tpu.memory_space<vmem>>, vector<16x128xf32>,
    return
  }
  func.func @transform_0(%arg0: i32) -> (i32, i32) {
    %c0_i32 = arith.constant 0 : i32
    %c0_i32_0 = arith.constant 0 : i32
    return %arg0, %c0_i32 : i32, i32
  }
  func.func @transform_1(%arg0: i32) -> (i32, i32) {
    %c0_i32 = arith.constant 0 : i32
    %c0_i32_0 = arith.constant 0 : i32
    return %arg0, %c0_i32 : i32, i32
  }
  func.func @transform_2(%arg0: i32) -> (i32, i32) {
    %c0_i32 = arith.constant 0 : i32
    %c0_i32_0 = arith.constant 0 : i32
    %c0_i32_1 = arith.constant 0 : i32
    return %c0_i32, %c0_i32_0 : i32, i32
  }
  func.func @transform_3(%arg0: i32) -> (i32, i32) {
    %c0_i32 = arith.constant 0 : i32
    %c0_i32_0 = arith.constant 0 : i32
    %c0_i32_1 = arith.constant 0 : i32
    return %c0_i32, %c0_i32_0 : i32, i32
  }
  func.func @transform_4(%arg0: i32) -> (i32, i32) {
    %c0_i32 = arith.constant 0 : i32
    %c0_i32_0 = arith.constant 0 : i32
    %c0_i32_1 = arith.constant 0 : i32
    return %c0_i32, %c0_i32_0 : i32, i32
  }
  func.func @transform_5(%arg0: i32) -> (i32, i32) {
    %c0_i32 = arith.constant 0 : i32
    %c0_i32_0 = arith.constant 0 : i32
    %c0_i32_1 = arith.constant 0 : i32
    return %c0_i32, %c0_i32_0 : i32, i32
  }
  func.func @transform_6(%arg0: i32) -> (i32, i32) {
    %c0_i32 = arith.constant 0 : i32
    %c0_i32_0 = arith.constant 0 : i32
    %c0_i32_1 = arith.constant 0 : i32
    return %c0_i32, %c0_i32_0 : i32, i32
  }
  func.func @transform_7(%arg0: i32) -> (i32, i32) {
    %c0_i32 = arith.constant 0 : i32
    %c0_i32_0 = arith.constant 0 : i32
    %c0_i32_1 = arith.constant 0 : i32
    return %c0_i32, %c0_i32_0 : i32, i32
  }
  func.func @transform_8(%arg0: i32) -> (i32, i32) {
    %c0_i32 = arith.constant 0 : i32
    %c0_i32_0 = arith.constant 0 : i32
    %c0_i32_1 = arith.constant 0 : i32
    return %c0_i32, %c0_i32_0 : i32, i32
  }
  func.func @transform_9(%arg0: i32) -> (i32, i32) {
    %c0_i32 = arith.constant 0 : i32
    %c0_i32_0 = arith.constant 0 : i32
    %c0_i32_1 = arith.constant 0 : i32
    return %c0_i32, %c0_i32_0 : i32, i32
  }
  func.func @transform_10(%arg0: i32) -> (i32, i32) {
    %c0_i32 = arith.constant 0 : i32
    %c0_i32_0 = arith.constant 0 : i32
    %c0_i32_1 = arith.constant 0 : i32
    return %c0_i32, %c0_i32_0 : i32, i32
  }
  func.func @transform_11(%arg0: i32) -> (i32, i32) {
    %c0_i32 = arith.constant 0 : i32
    %c0_i32_0 = arith.constant 0 : i32
    %c0_i32_1 = arith.constant 0 : i32
    return %c0_i32, %c0_i32_0 : i32, i32
  }
  func.func @transform_12(%arg0: i32) -> (i32, i32) {
    %c0_i32 = arith.constant 0 : i32
    %c0_i32_0 = arith.constant 0 : i32
    %c0_i32_1 = arith.constant 0 : i32
    return %c0_i32, %c0_i32_0 : i32, i32
  }
  func.func @transform_13(%arg0: i32) -> (i32, i32) {
    %c0_i32 = arith.constant 0 : i32
    %c0_i32_0 = arith.constant 0 : i32
    %c0_i32_1 = arith.constant 0 : i32
    return %c0_i32, %c0_i32_0 : i32, i32
  }
  func.func @transform_14(%arg0: i32) -> (i32, i32) {
    %c0_i32 = arith.constant 0 : i32
    %c0_i32_0 = arith.constant 0 : i32
    %c0_i32_1 = arith.constant 0 : i32
    return %c0_i32, %c0_i32_0 : i32, i32
  }
  func.func @transform_15(%arg0: i32) -> (i32, i32) {
    %c0_i32 = arith.constant 0 : i32
    %c0_i32_0 = arith.constant 0 : i32
    %c0_i32_1 = arith.constant 0 : i32
    return %c0_i32, %c0_i32_0 : i32, i32
  }
  func.func @transform_16(%arg0: i32) -> (i32, i32) {
    %c0_i32 = arith.constant 0 : i32
    %c0_i32_0 = arith.constant 0 : i32
    %c0_i32_1 = arith.constant 0 : i32
    return %c0_i32, %c0_i32_0 : i32, i32
  }
  func.func @transform_17(%arg0: i32) -> (i32, i32) {
    %c0_i32 = arith.constant 0 : i32
    %c0_i32_0 = arith.constant 0 : i32
    return %arg0, %c0_i32 : i32, i32
  }
}

</mosaic_0001>

<bundles_post_ra>
// kernel: tpu_custom_call.1
= control target key start
LH: loop header
LB: loop body
LE: loop exit
PB: predicated region body
PF: predicated region fallthrough
CT: control target
= control target key end

     0   :  { %s6691_s0 = inlined_call_operand.vmem [shape: bf16[48,48], index: 0, kind: input, shape index: {}]   ;;  %s6692_s1 = inlined_call_operand.vmem [shape: bf16[48,48], index: 1, kind: input, shape index: {}]   ;;  %s6693_s2 = inlined_call_operand.vmem [shape: bf16[48,512], index: 2, kind: input, shape index: {}]   ;;  %s6694_s3 = inlined_call_operand.vmem [shape: f32[1,512], index: 3, kind: input, shape index: {}]   ;;  %s6695_s4 = inlined_call_operand.hbm [shape: bf16[512,512], index: 4, kind: input, shape index: {}]   ;;  %s6696_s5 = inlined_call_operand.vmem [shape: f32[1,512], index: 5, kind: input, shape index: {}]   ;;  %s6697_s6 = inlined_call_operand.vmem [shape: bf16[512,64], index: 6, kind: input, shape index: {}]   ;;  %s6698_s7 = inlined_call_operand.vmem [shape: bf16[48,512], index: 7, kind: input, shape index: {}]   ;;  %s6699_s8 = inlined_call_operand.vmem [shape: f32[1,512], index: 8, kind: input, shape index: {}]   ;;  %s6700_s9 = inlined_call_operand.hbm [shape: bf16[512,512], index: 9, kind: input, shape index: {}]   ;;  %s6701_s10 = inlined_call_operand.vmem [shape: f32[1,512], index: 10, kind: input, shape index: {}]   ;;  %s6702_s11 = inlined_call_operand.vmem [shape: bf16[512,64], index: 11, kind: input, shape index: {}]   ;;  %s6703_s12 = inlined_call_operand.vmem [shape: f32[1,64], index: 12, kind: input, shape index: {}]   ;;  %s6704_s13 = inlined_call_operand.vmem [shape: bf16[64,64], index: 13, kind: input, shape index: {}]   ;;  %s6705_s14 = inlined_call_operand.vmem [shape: f32[1,64], index: 14, kind: input, shape index: {}]   ;;  %s6706_s15 = inlined_call_operand.vmem [shape: bf16[64,128], index: 15, kind: input, shape index: {}]   ;;  %s6707_s16 = inlined_call_operand.vmem [shape: f32[1,128], index: 16, kind: input, shape index: {}]   ;;  %s6708_s17 = inlined_call_operand.hbm [shape: f32[16,128], index: 17, kind: output, shape index: {}]  }
   0x1   :  { %6711 = sst [smem:[#allocation11_spill]] %s6691_s0 }
   0x2   :  { %6712 = sst [smem:[#allocation12_spill]] %s6692_s1 }
   0x3   :  { %22 = vsyncpa [#allocation3], 0 }
   0x4   :  { %23 = vsyncpa [#allocation6], 0 }
   0x5   :  { %24 = vsyncpa [#allocation4], 0  ;;  %s37_s26 = sshll.u32 %s6695_s4, 4  ;;  %s5734_s27 = smov [#allocation2]   ;;  %s38_s26 = int_to_ptr.hbm [resolvable:$true] %s37_s26 }
   0x6   :  { %s39_s28 = sshll.u32 %s5734_s27, 4  ;;  %s58_s30 = sshll.u32 %s6700_s9, 4  ;;  %s40_s28 = int_to_ptr.vmem [resolvable:$true] %s39_s28  ;;  %s59_s30 = int_to_ptr.hbm [resolvable:$true] %s58_s30 }
   0x7   :  { %s5735_s18 = smov 256   ;;  %s5736_s19 = smov 16  }
   0x8   :  { %45 = dma.hbm_to_vmem [thread:$0]  %s38_s26, 16384, %s40_s28, [#allocation3], %s5735_s18, %s5735_s18, %s5736_s19  }
   0x9   :  { %s5737_s1 = smov [#allocation5]  }
   0xa   :  { %s60_s20 = sshll.u32 %s5737_s1, 4  ;;  %s61_s20 = int_to_ptr.vmem [resolvable:$true] %s60_s20 }
   0xb   :  { %66 = dma.hbm_to_vmem [thread:$0]  %s59_s30, 16384, %s61_s20, [#allocation6], %s5735_s18, %s5735_s18, %s5736_s19  }
   0xc   :  { %5728 = dma.done.wait [#allocation3], 16384  }
   0xd   :  { %5729 = vsyncadd [#allocation3], 4294950912 }
   0xe   :  { %5730 = dma.done.wait [#allocation6], 16384  }
   0xf   :  { %5731 = vsyncadd [#allocation6], 4294950912  ;;  %v3876_v0 = vld [vmem:[%s6693_s2 + $0x40] sm:$0xf]  ;;  %v5298_v1 = vld [vmem:[%s6693_s2 + $0x4c] sm:$0xf0] }
  0x10   :  { %v5296_v2 = vld [vmem:[%s6693_s2 + $0x44] sm:$0xf]  ;;  %v3877_v3 = vor.u32 %v5298_v1, %v3876_v0  ;;  %v3878_v4 = vld [vmem:[%s6693_s2 + $0x50] sm:$0xf0]  ;;  %v3884_v5 = vld [vmem:[%s6693_s2 + $0x48] sm:$0xf] }
  0x11   :  { %v5299_v6 = vld [vmem:[%s6693_s2 + $0x54] sm:$0xf0]  ;;  %v3881_v7 = vor.u32 %v5296_v2, %v3878_v4  ;;  %v5297_v9 = vld [vmem:[%s6693_s2 + $0x4c] sm:$0xf]  ;;  %v3886_v10 = vld [vmem:[%s6693_s2 + $0x58] sm:$0xf0] }
  0x12   :  { %v3885_v8 = vor.u32 %v5299_v6, %v3884_v5  ;;  %v3860_v11 = vld [vmem:[%s6693_s2 + $0x20] sm:$0xf]  ;;  %401 = vmatpush.bf16.msra.mxu0 %v3877_v3  ;;  %v3889_v12 = vor.u32 %v5297_v9, %v3886_v10  ;;  %v5294_v13 = vld [vmem:[%s6693_s2 + $0x2c] sm:$0xf0]  ;;  %v5292_v14 = vld [vmem:[%s6693_s2 + $0x24] sm:$0xf] }
  0x13   :  { %v3862_v15 = vld [vmem:[%s6693_s2 + $0x30] sm:$0xf0]  ;;  %425 = vmatpush.bf16.msra.mxu1 %v3881_v7  ;;  %v3861_v16 = vor.u32 %v5294_v13, %v3860_v11  ;;  %v3868_v18 = vld [vmem:[%s6693_s2 + $0x28] sm:$0xf]  ;;  %v5295_v19 = vld [vmem:[%s6693_s2 + $0x34] sm:$0xf0] }
  0x14   :  { %449 = vmatpush.bf16.msra.mxu2 %v3885_v8  ;;  %v3865_v17 = vor.u32 %v5292_v14, %v3862_v15  ;;  %v5293_v20 = vld [vmem:[%s6693_s2 + $0x2c] sm:$0xf]  ;;  %473 = vmatpush.bf16.msra.mxu3 %v3889_v12  ;;  %v3869_v21 = vor.u32 %v5295_v19, %v3868_v18  ;;  %v3870_v22 = vld [vmem:[%s6693_s2 + $0x38] sm:$0xf0]  ;;  %v3844_v23 = vld [vmem:[%s6693_s2] sm:$0xf] }
  0x15   :  { %v5290_v24 = vld [vmem:[%s6693_s2 + $0xc] sm:$0xf0]  ;;  %v3873_v25 = vor.u32 %v5293_v20, %v3870_v22  ;;  %v5288_v26 = vld [vmem:[%s6693_s2 + $0x4] sm:$0xf]  ;;  %v3846_v27 = vld [vmem:[%s6693_s2 + $0x10] sm:$0xf0] }
  0x16   :  { %v3852_v28 = vld [vmem:[%s6693_s2 + $0x8] sm:$0xf]  ;;  %402 = vmatpush.bf16.msra.mxu0 %v3861_v16  ;;  %v3845_v29 = vor.u32 %v5290_v24, %v3844_v23  ;;  %v5291_v30 = vld [vmem:[%s6693_s2 + $0x14] sm:$0xf0]  ;;  %v5289_v31 = vld [vmem:[%s6693_s2 + $0xc] sm:$0xf]  ;;  %v3849_v33 = vor.u32 %v5288_v26, %v3846_v27 }
  0x17   :  { %v3854_v32 = vld [vmem:[%s6693_s2 + $0x18] sm:$0xf0]  ;;  %426 = vmatpush.bf16.msra.mxu1 %v3865_v17  ;;  %v3853_v34 = vor.u32 %v5291_v30, %v3852_v28  ;;  %s6713_s20 = sld [smem:[#allocation11_spill]]  ;;  %vm386_vm0 = vcmask 392192   ;;  %v4272_v37 = vld [vmem:[#allocation2 + $0x2e0] sm:$0xf] }
  0x18   :  { %450 = vmatpush.bf16.msra.mxu2 %v3869_v21  ;;  %474 = vmatpush.bf16.msra.mxu3 %v3873_v25  ;;  %v3857_v35 = vor.u32 %v5289_v31, %v3854_v32  ;;  %v5394_v38 = vld [vmem:[#allocation2 + $0x2ec] sm:$0xf0]  ;;  %v4016_v39 = vld [vmem:[#allocation2 + $0xe0] sm:$0xf]  ;;  %s6714_s26 = sld [smem:[#allocation12_spill]]  ;;  %vm3734_vm1 = vcmask 523264  }
  0x19   :  { %v4273_v40 = vor.u32 %v5394_v38, %v4272_v37  ;;  %v5330_v41 = vld [vmem:[#allocation2 + $0xec] sm:$0xf0]  ;;  %v4400_v42 = vld [vmem:[#allocation2 + $0x3e0] sm:$0xf]  ;;  %s5739_s21 = smov 128   ;;  %s5740_s22 = smov 8  }
  0x1a   :  { %403 = vmatpush.bf16.msra.mxu0 %v3845_v29  ;;  %v5426_v43 = vld [vmem:[#allocation2 + $0x3ec] sm:$0xf0]  ;;  %v4017_v44 = vor.u32 %v5330_v41, %v4016_v39  ;;  %v4144_v46 = vld [vmem:[#allocation2 + $0x1e0] sm:$0xf] }
  0x1b   :  { %427 = vmatpush.bf16.msra.mxu1 %v3849_v33  ;;  %v4401_v45 = vor.u32 %v5426_v43, %v4400_v42  ;;  %v5362_v47 = vld [vmem:[#allocation2 + $0x1ec] sm:$0xf0]  ;;  %v4256_v48 = vld [vmem:[#allocation2 + $0x2c0] sm:$0xf] }
  0x1c   :  { %451 = vmatpush.bf16.msra.mxu2 %v3853_v34  ;;  %475 = vmatpush.bf16.msra.mxu3 %v3857_v35  ;;  %v4145_v49 = vor.u32 %v5362_v47, %v4144_v46  ;;  %v5390_v50 = vld [vmem:[#allocation2 + $0x2cc] sm:$0xf0]  ;;  %v4000_v51 = vld [vmem:[#allocation2 + $0xc0] sm:$0xf] }
  0x1d   :  { %v5460_v36 = vld [vmem:[%s6713_s20] sm:$0xff]  ;;  %v5326_v52 = vld [vmem:[#allocation2 + $0xcc] sm:$0xf0]  ;;  %v4257_v53 = vor.u32 %v5390_v50, %v4256_v48  ;;  %v5461_v6 = vld [vmem:[%s6713_s20 + $0x8] sm:$0xff] }
  0x1e   :  { %3890 = vmatmul.msk.bf16.vlgmr.msra.gmra.mxu0 %vm386_vm0, %v5460_v36  ;;  %3893 = vmatmul.msk.bf16.vlgmr.msra.gmra.mxu1 %vm386_vm0, %v5460_v36  ;;  %v4001_v54 = vor.u32 %v5326_v52, %v4000_v51  ;;  %v4384_v55 = vld [vmem:[#allocation2 + $0x3c0] sm:$0xf]  ;;  %v5422_v56 = vld [vmem:[#allocation2 + $0x3cc] sm:$0xf0] }
  0x1f   :  { %3896 = vmatmul.msk.bf16.vlgmr.msra.gmra.mxu2 %vm386_vm0, %v5460_v36  ;;  %3899 = vmatmul.msk.bf16.vlgmr.msra.gmra.mxu3 %vm386_vm0, %v5460_v36  ;;  %v4128_v57 = vld [vmem:[#allocation2 + $0x1c0] sm:$0xf]  ;;  %v4385_v58 = vor.u32 %v5422_v56, %v4384_v55  ;;  %v5358_v59 = vld [vmem:[#allocation2 + $0x1cc] sm:$0xf0] }
  0x20   :  { %1225 = vmatpush.bf16.msrb.mxu2 %v4273_v40  ;;  %1177 = vmatpush.bf16.msrb.mxu0 %v4017_v44  ;;  %v4240_v60 = vld [vmem:[#allocation2 + $0x2a0] sm:$0xf]  ;;  %v5386_v61 = vld [vmem:[#allocation2 + $0x2ac] sm:$0xf0]  ;;  %v4129_v62 = vor.u32 %v5358_v59, %v4128_v57 }
  0x21   :  { %1249 = vmatpush.bf16.msrb.mxu3 %v4401_v45  ;;  %1201 = vmatpush.bf16.msrb.mxu1 %v4145_v49  ;;  %v3984_v63 = vld [vmem:[#allocation2 + $0xa0] sm:$0xf]  ;;  %v5322_v0 = vld [vmem:[#allocation2 + $0xac] sm:$0xf0]  ;;  %v4241_v2 = vor.u32 %v5386_v61, %v4240_v60 }
  0x22   :  { %v4368_v1 = vld [vmem:[#allocation2 + $0x3a0] sm:$0xf]  ;;  %v5418_v3 = vld [vmem:[#allocation2 + $0x3ac] sm:$0xf0]  ;;  %v3985_v7 = vor.u32 %v5322_v0, %v3984_v63 }
  0x23   :  { %v4112_v4 = vld [vmem:[#allocation2 + $0x1a0] sm:$0xf]  ;;  %v5354_v5 = vld [vmem:[#allocation2 + $0x1ac] sm:$0xf0]  ;;  %v4369_v8 = vor.u32 %v5418_v3, %v4368_v1 }
  0x24   :  { %1226 = vmatpush.bf16.msrb.mxu2 %v4257_v53  ;;  %1178 = vmatpush.bf16.msrb.mxu0 %v4001_v54  ;;  %v4113_v9 = vor.u32 %v5354_v5, %v4112_v4  ;;  %v4224_v10 = vld [vmem:[#allocation2 + $0x280] sm:$0xf]  ;;  %v5382_v11 = vld [vmem:[#allocation2 + $0x28c] sm:$0xf0] }
  0x25   :  { %1250 = vmatpush.bf16.msrb.mxu3 %v4385_v58  ;;  %1202 = vmatpush.bf16.msrb.mxu1 %v4129_v62  ;;  %v3968_v12 = vld [vmem:[#allocation2 + $0x80] sm:$0xf]  ;;  %v5318_v13 = vld [vmem:[#allocation2 + $0x8c] sm:$0xf0]  ;;  %v4225_v18 = vor.u32 %v5382_v11, %v4224_v10  ;;  %v5328_v10 = vld [vmem:[#allocation2 + $0xe4] sm:$0xf] }
  0x26   :  { %v4352_v14 = vld [vmem:[#allocation2 + $0x380] sm:$0xf]  ;;  %v5414_v15 = vld [vmem:[#allocation2 + $0x38c] sm:$0xf0]  ;;  %v3969_v19 = vor.u32 %v5318_v13, %v3968_v12  ;;  %v4018_v11 = vld [vmem:[#allocation2 + $0xf0] sm:$0xf0] }
  0x27   :  { %v4096_v16 = vld [vmem:[#allocation2 + $0x180] sm:$0xf]  ;;  %v5350_v17 = vld [vmem:[#allocation2 + $0x18c] sm:$0xf0]  ;;  %v4353_v20 = vor.u32 %v5414_v15, %v4352_v14  ;;  %v5424_v12 = vld [vmem:[#allocation2 + $0x3e4] sm:$0xf]  ;;  %v4021_v13 = vor.u32 %v5328_v10, %v4018_v11 }
  0x28   :  { %1227 = vmatpush.bf16.msrb.mxu2 %v4241_v2  ;;  %1179 = vmatpush.bf16.msrb.mxu0 %v3985_v7  ;;  %v4208_v21 = vld [vmem:[#allocation2 + $0x260] sm:$0xf]  ;;  %v5378_v22 = vld [vmem:[#allocation2 + $0x26c] sm:$0xf0]  ;;  %v4097_v24 = vor.u32 %v5350_v17, %v4096_v16  ;;  %v5392_v7 = vld [vmem:[#allocation2 + $0x2e4] sm:$0xf] }
  0x29   :  { %1251 = vmatpush.bf16.msrb.mxu3 %v4369_v8  ;;  %1203 = vmatpush.bf16.msrb.mxu1 %v4113_v9  ;;  %v3952_v23 = vld [vmem:[#allocation2 + $0x60] sm:$0xf]  ;;  %v5314_v25 = vld [vmem:[#allocation2 + $0x6c] sm:$0xf0]  ;;  %v4209_v28 = vor.u32 %v5378_v22, %v4208_v21  ;;  %v4274_v8 = vld [vmem:[#allocation2 + $0x2f0] sm:$0xf0] }
  0x2a   :  { %v4336_v26 = vld [vmem:[#allocation2 + $0x360] sm:$0xf]  ;;  %v5410_v27 = vld [vmem:[#allocation2 + $0x36c] sm:$0xf0]  ;;  %v3953_v29 = vor.u32 %v5314_v25, %v3952_v23  ;;  %v4277_v9 = vor.u32 %v5392_v7, %v4274_v8  ;;  %v4402_v14 = vld [vmem:[#allocation2 + $0x3f0] sm:$0xf0] }
  0x2b   :  { %v4337_v30 = vor.u32 %v5410_v27, %v4336_v26  ;;  %v5462_v31 = vld [vmem:[%s6713_s20 + $0x10] sm:$0xff]  ;;  %v4080_v32 = vld [vmem:[#allocation2 + $0x160] sm:$0xf]  ;;  %v4405_v15 = vor.u32 %v5424_v12, %v4402_v14  ;;  %v5360_v16 = vld [vmem:[#allocation2 + $0x1e4] sm:$0xf] }
  0x2c   :  { %1228 = vmatpush.bf16.msrb.mxu2 %v4225_v18  ;;  %1180 = vmatpush.bf16.msrb.mxu0 %v3969_v19  ;;  %v5346_v33 = vld [vmem:[#allocation2 + $0x16c] sm:$0xf0]  ;;  %v3936_v35 = vld [vmem:[#allocation2 + $0x40] sm:$0xf]  ;;  %v4146_v17 = vld [vmem:[#allocation2 + $0x1f0] sm:$0xf0] }
  0x2d   :  { %1252 = vmatpush.bf16.msrb.mxu3 %v4353_v20  ;;  %1204 = vmatpush.bf16.msrb.mxu1 %v4097_v24  ;;  %v4081_v34 = vor.u32 %v5346_v33, %v4080_v32  ;;  %v5310_v36 = vld [vmem:[#allocation2 + $0x4c] sm:$0xf0]  ;;  %v4192_v37 = vld [vmem:[#allocation2 + $0x240] sm:$0xf]  ;;  %v5388_v18 = vld [vmem:[#allocation2 + $0x2c4] sm:$0xf]  ;;  %v4149_v19 = vor.u32 %v5360_v16, %v4146_v17 }
  0x2e   :  { %3891 = vmatmul.msk.bf16.gmra.mxu0 %vm386_vm0, %v5461_v6  ;;  %3894 = vmatmul.msk.bf16.gmra.mxu1 %vm386_vm0, %v5461_v6  ;;  %v5374_v38 = vld [vmem:[#allocation2 + $0x24c] sm:$0xf0]  ;;  %v3937_v39 = vor.u32 %v5310_v36, %v3936_v35  ;;  %v4064_v40 = vld [vmem:[#allocation2 + $0x140] sm:$0xf]  ;;  %v4258_v20 = vld [vmem:[#allocation2 + $0x2d0] sm:$0xf0] }
  0x2f   :  { %3897 = vmatmul.msk.bf16.gmra.mxu2 %vm386_vm0, %v5461_v6  ;;  %3900 = vmatmul.msk.bf16.gmra.mxu3 %vm386_vm0, %v5461_v6  ;;  %v4193_v41 = vor.u32 %v5374_v38, %v4192_v37  ;;  %v5342_v42 = vld [vmem:[#allocation2 + $0x14c] sm:$0xf0]  ;;  %v4320_v43 = vld [vmem:[#allocation2 + $0x340] sm:$0xf]  ;;  %v5324_v21 = vld [vmem:[#allocation2 + $0xc4] sm:$0xf]  ;;  %v4261_v25 = vor.u32 %v5388_v18, %v4258_v20 }
  0x30   :  { %1229 = vmatpush.bf16.msrb.mxu2 %v4209_v28  ;;  %1181 = vmatpush.bf16.msrb.mxu0 %v3953_v29  ;;  %v5406_v44 = vld [vmem:[#allocation2 + $0x34c] sm:$0xf0]  ;;  %v4065_v45 = vor.u32 %v5342_v42, %v4064_v40  ;;  %v3920_v47 = vld [vmem:[#allocation2 + $0x20] sm:$0xf]  ;;  %v4002_v22 = vld [vmem:[#allocation2 + $0xd0] sm:$0xf0] }
  0x31   :  { %1253 = vmatpush.bf16.msrb.mxu3 %v4337_v30  ;;  %1205 = vmatpush.bf16.msrb.mxu1 %v4081_v34  ;;  %v4321_v46 = vor.u32 %v5406_v44, %v4320_v43  ;;  %v5306_v48 = vld [vmem:[#allocation2 + $0x2c] sm:$0xf0]  ;;  %v4048_v49 = vld [vmem:[#allocation2 + $0x120] sm:$0xf]  ;;  %v4005_v26 = vor.u32 %v5324_v21, %v4002_v22  ;;  %v5420_v27 = vld [vmem:[#allocation2 + $0x3c4] sm:$0xf] }
  0x32   :  { %v3921_v50 = vor.u32 %v5306_v48, %v3920_v47  ;;  %v5338_v51 = vld [vmem:[#allocation2 + $0x12c] sm:$0xf0]  ;;  %v3904_v53 = vld [vmem:[#allocation2] sm:$0xf]  ;;  %v4386_v28 = vld [vmem:[#allocation2 + $0x3d0] sm:$0xf0] }
  0x33   :  { %v4049_v52 = vor.u32 %v5338_v51, %v4048_v49  ;;  %v5302_v54 = vld [vmem:[#allocation2 + $0xc] sm:$0xf0]  ;;  %v4032_v55 = vld [vmem:[#allocation2 + $0x100] sm:$0xf]  ;;  %v5356_v33 = vld [vmem:[#allocation2 + $0x1c4] sm:$0xf] }
  0x34   :  { %1182 = vmatpush.bf16.msrb.mxu0 %v3937_v39  ;;  %1230 = vmatpush.bf16.msrb.mxu2 %v4193_v41  ;;  %v3905_v56 = vor.u32 %v5302_v54, %v3904_v53  ;;  %v5334_v57 = vld [vmem:[#allocation2 + $0x10c] sm:$0xf0]  ;;  %v4176_v58 = vld [vmem:[#allocation2 + $0x220] sm:$0xf]  ;;  %v4130_v34 = vld [vmem:[#allocation2 + $0x1d0] sm:$0xf0] }
  0x35   :  { %1206 = vmatpush.bf16.msrb.mxu1 %v4065_v45  ;;  %1254 = vmatpush.bf16.msrb.mxu3 %v4321_v46  ;;  %v5370_v59 = vld [vmem:[#allocation2 + $0x22c] sm:$0xf0]  ;;  %v4304_v60 = vld [vmem:[#allocation2 + $0x320] sm:$0xf]  ;;  %v4033_v61 = vor.u32 %v5334_v57, %v4032_v55  ;;  %v4133_v35 = vor.u32 %v5356_v33, %v4130_v34  ;;  %v5384_v37 = vld [vmem:[#allocation2 + $0x2a4] sm:$0xf] }
  0x36   :  { %v4177_v62 = vor.u32 %v5370_v59, %v4176_v58  ;;  %v5402_v63 = vld [vmem:[#allocation2 + $0x32c] sm:$0xf0]  ;;  %v4160_v1 = vld [vmem:[#allocation2 + $0x200] sm:$0xf]  ;;  %v4242_v38 = vld [vmem:[#allocation2 + $0x2b0] sm:$0xf0] }
  0x37   :  { %v4305_v0 = vor.u32 %v5402_v63, %v4304_v60  ;;  %v5366_v2 = vld [vmem:[#allocation2 + $0x20c] sm:$0xf0]  ;;  %v4288_v3 = vld [vmem:[#allocation2 + $0x300] sm:$0xf]  ;;  %v5320_v39 = vld [vmem:[#allocation2 + $0xa4] sm:$0xf]  ;;  %v4245_v41 = vor.u32 %v5384_v37, %v4242_v38 }
  0x38   :  { %1183 = vmatpush.bf16.msrb.mxu0 %v3921_v50  ;;  %1231 = vmatpush.bf16.msrb.mxu2 %v4177_v62  ;;  %v4161_v4 = vor.u32 %v5366_v2, %v4160_v1  ;;  %v5398_v5 = vld [vmem:[#allocation2 + $0x30c] sm:$0xf0]  ;;  %v102_v23 = vld [vmem:[%s6694_s3] sm:$0xf]  ;;  %v3986_v42 = vld [vmem:[#allocation2 + $0xb0] sm:$0xf0] }
  0x39   :  { %1207 = vmatpush.bf16.msrb.mxu1 %v4049_v52  ;;  %1255 = vmatpush.bf16.msrb.mxu3 %v4305_v0  ;;  %v4289_v6 = vor.u32 %v5398_v5, %v4288_v3  ;;  %v5933_v29 = vperm.slane %v102_v23, 0  ;;  %v5935_v32 = vperm.slane %v102_v23, 1  ;;  %v5416_v43 = vld [vmem:[#allocation2 + $0x3a4] sm:$0xf]  ;;  %v4370_v44 = vld [vmem:[#allocation2 + $0x3b0] sm:$0xf0]  ;;  %v3989_v46 = vor.u32 %v5320_v39, %v3986_v42 }
  0x3a   :  { %v4373_v47 = vor.u32 %v5416_v43, %v4370_v44  ;;  %v5352_v48 = vld [vmem:[#allocation2 + $0x1a4] sm:$0xf]  ;;  %v4114_v49 = vld [vmem:[#allocation2 + $0x1b0] sm:$0xf0]  ;;  %v5940_v57 = vperm.slane %v102_v23, 2  ;;  %v5943_v59 = vperm.slane %v102_v23, 3 }
  0x3b   :  { %v4117_v52 = vor.u32 %v5352_v48, %v4114_v49  ;;  %v4226_v62 = vld [vmem:[#allocation2 + $0x290] sm:$0xf0]  ;;  %v5316_v1 = vld [vmem:[#allocation2 + $0x84] sm:$0xf] }
  0x3c   :  { %1184 = vmatpush.bf16.msrb.mxu0 %v3905_v56  ;;  %1232 = vmatpush.bf16.msrb.mxu2 %v4161_v4  ;;  %v3970_v2 = vld [vmem:[#allocation2 + $0x90] sm:$0xf0]  ;;  %v5348_v5 = vld [vmem:[#allocation2 + $0x184] sm:$0xf] }
  0x3d   :  { %1208 = vmatpush.bf16.msrb.mxu1 %v4033_v61  ;;  %1256 = vmatpush.bf16.msrb.mxu3 %v4289_v6  ;;  %v5380_v61 = vld [vmem:[#allocation2 + $0x284] sm:$0xf]  ;;  %v3973_v4 = vor.u32 %v5316_v1, %v3970_v2  ;;  %v4098_v6 = vld [vmem:[#allocation2 + $0x190] sm:$0xf0] }
  0x3e   :  { %3892 = vmatmul.msk.bf16.gmra.mxu0 %vm386_vm0, %v5462_v31  ;;  %3895 = vmatmul.msk.bf16.gmra.mxu1 %vm386_vm0, %v5462_v31  ;;  %v4229_v0 = vor.u32 %v5380_v61, %v4226_v62  ;;  %v4354_v10 = vld [vmem:[#allocation2 + $0x390] sm:$0xf0]  ;;  %v4101_v11 = vor.u32 %v5348_v5, %v4098_v6  ;;  %v5376_v12 = vld [vmem:[#allocation2 + $0x264] sm:$0xf] }
  0x3f   :  { %3898 = vmatmul.msk.bf16.gmra.mxu2 %vm386_vm0, %v5462_v31  ;;  %3901 = vmatmul.msk.bf16.gmra.mxu3 %vm386_vm0, %v5462_v31  ;;  %v4389_v31 = vor.u32 %v5420_v27, %v4386_v28  ;;  %v4210_v16 = vld [vmem:[#allocation2 + $0x270] sm:$0xf0]  ;;  %v5312_v17 = vld [vmem:[#allocation2 + $0x64] sm:$0xf] }
  0x40   :  { %1321 = vmatpush.bf16.msra.mxu2 %v4277_v9  ;;  %1273 = vmatpush.bf16.msra.mxu0 %v4021_v13  ;;  %v5412_v9 = vld [vmem:[#allocation2 + $0x384] sm:$0xf]  ;;  %v3954_v18 = vld [vmem:[#allocation2 + $0x70] sm:$0xf0]  ;;  %v4213_v22 = vor.u32 %v5376_v12, %v4210_v16 }
  0x41   :  { %1345 = vmatpush.bf16.msra.mxu3 %v4405_v15  ;;  %1297 = vmatpush.bf16.msra.mxu1 %v4149_v19  ;;  %v4357_v15 = vor.u32 %v5412_v9, %v4354_v10  ;;  %v3957_v23 = vor.u32 %v5312_v17, %v3954_v18  ;;  %v3938_v37 = vld [vmem:[#allocation2 + $0x50] sm:$0xf0]  ;;  %v5408_v43 = vld [vmem:[#allocation2 + $0x364] sm:$0xf] }
  0x42   :  { %v4338_v44 = vld [vmem:[#allocation2 + $0x370] sm:$0xf0]  ;;  %v5336_v62 = vld [vmem:[#allocation2 + $0x124] sm:$0xf] }
  0x43   :  { %v4341_v49 = vor.u32 %v5408_v43, %v4338_v44  ;;  %v3922_v61 = vld [vmem:[#allocation2 + $0x30] sm:$0xf0]  ;;  %v5400_v6 = vld [vmem:[#allocation2 + $0x324] sm:$0xf] }
  0x44   :  { %1322 = vmatpush.bf16.msra.mxu2 %v4261_v25  ;;  %1274 = vmatpush.bf16.msra.mxu0 %v4005_v26  ;;  %v4082_v25 = vld [vmem:[#allocation2 + $0x170] sm:$0xf0]  ;;  %v5332_v16 = vld [vmem:[#allocation2 + $0x104] sm:$0xf] }
  0x45   :  { %1346 = vmatpush.bf16.msra.mxu3 %v4389_v31  ;;  %1298 = vmatpush.bf16.msra.mxu1 %v4133_v35  ;;  %v4178_v5 = vld [vmem:[#allocation2 + $0x230] sm:$0xf0] }
  0x46   :  { %v4306_v12 = vld [vmem:[#allocation2 + $0x330] sm:$0xf0] }
  0x47   :  { %v4309_v18 = vor.u32 %v5400_v6, %v4306_v12  ;;  %v4264_v6 = vld [vmem:[#allocation2 + $0x2c8] sm:$0xf] }
  0x48   :  { %1323 = vmatpush.bf16.msra.mxu2 %v4245_v41  ;;  %1275 = vmatpush.bf16.msra.mxu0 %v3989_v46  ;;  %v4066_v41 = vld [vmem:[#allocation2 + $0x150] sm:$0xf0]  ;;  %v4008_v12 = vld [vmem:[#allocation2 + $0xc8] sm:$0xf] }
  0x49   :  { %1347 = vmatpush.bf16.msra.mxu3 %v4373_v47  ;;  %1299 = vmatpush.bf16.msra.mxu1 %v4117_v52 }
  0x4c   :  { %1324 = vmatpush.bf16.msra.mxu2 %v4229_v0  ;;  %1276 = vmatpush.bf16.msra.mxu0 %v3973_v4  ;;  %v5368_v4 = vld [vmem:[#allocation2 + $0x224] sm:$0xf] }
  0x4d   :  { %1348 = vmatpush.bf16.msra.mxu3 %v4357_v15  ;;  %1300 = vmatpush.bf16.msra.mxu1 %v4101_v11  ;;  %v4181_v11 = vor.u32 %v5368_v4, %v4178_v5  ;;  %v3906_v15 = vld [vmem:[#allocation2 + $0x10] sm:$0xf0]  ;;  %v4152_v4 = vld [vmem:[#allocation2 + $0x1e8] sm:$0xf]  ;;  %v5363_v5 = vld [vmem:[#allocation2 + $0x1f4] sm:$0xf0] }
  0x50   :  { %1325 = vmatpush.bf16.msra.mxu2 %v4213_v22  ;;  %1277 = vmatpush.bf16.msra.mxu0 %v3957_v23 }
  0x51   :  { %1349 = vmatpush.bf16.msra.mxu3 %v4341_v49 }
  0x9b   :  { %v405_v24 = vpop.f32.mrf.mxu0  ;;  %v429_v30 = vpop.f32.mrf.mxu1 }
  0x9c   :  { %v406_v36 = vadd.f32 %v405_v24, %v5933_v29  ;;  %v430_v40 = vadd.f32 %v429_v30, %v5935_v32  ;;  %v5344_v24 = vld [vmem:[#allocation2 + $0x164] sm:$0xf] }
  0x9d   :  { %v4085_v28 = vor.u32 %v5344_v24, %v4082_v25 }
  0x9e   :  { %v492_v53 = vmax.f32 %v406_v36, 0.0  ;;  %v493_v56 = vmax.f32 %v430_v40, 0.0  ;;  %v5308_v36 = vld [vmem:[#allocation2 + $0x44] sm:$0xf] }
  0x9f   :  { %v3941_v39 = vor.u32 %v5308_v36, %v3938_v37  ;;  %v5340_v40 = vld [vmem:[#allocation2 + $0x144] sm:$0xf]  ;;  %1301 = vmatpush.bf16.msra.mxu1 %v4085_v28 }
  0xa0   :  { %v4069_v46 = vor.u32 %v5340_v40, %v4066_v41 }
  0xa1   :  { %1278 = vmatpush.bf16.msra.mxu0 %v3941_v39  ;;  %v4290_v39 = vld [vmem:[#allocation2 + $0x310] sm:$0xf0] }
  0xa2   :  { %v453_v45 = vpop.f32.mrf.mxu2  ;;  %v477_v50 = vpop.f32.mrf.mxu3 }
  0xa3   :  { %v407_v51 = vpop.f32.mrf.mxu0  ;;  %v431_v55 = vpop.f32.mrf.mxu1  ;;  %v454_v7 = vadd.f32 %v453_v45, %v5940_v57  ;;  %v478_v13 = vadd.f32 %v477_v50, %v5943_v59  ;;  %v5372_v45 = vld [vmem:[#allocation2 + $0x244] sm:$0xf]  ;;  %v4194_v50 = vld [vmem:[#allocation2 + $0x250] sm:$0xf0]  ;;  %1302 = vmatpush.bf16.msra.mxu1 %v4069_v46 }
  0xa4   :  { %v408_v54 = vadd.f32 %v407_v51, %v5933_v29  ;;  %v432_v58 = vadd.f32 %v431_v55, %v5935_v32  ;;  %v4197_v52 = vor.u32 %v5372_v45, %v4194_v50  ;;  %v5304_v55 = vld [vmem:[#allocation2 + $0x24] sm:$0xf] }
  0xa5   :  { %v494_v30 = vmax.f32 %v454_v7, 0.0  ;;  %v495_v34 = vmax.f32 %v478_v13, 0.0  ;;  %v3925_v2 = vor.u32 %v5304_v55, %v3922_v61  ;;  %v5300_v13 = vld [vmem:[#allocation2 + $0x4] sm:$0xf]  ;;  %v4408_v61 = vld [vmem:[#allocation2 + $0x3e8] sm:$0xf] }
  0xa6   :  { %v496_v60 = vmax.f32 %v408_v54, 0.0  ;;  %v497_v63 = vmax.f32 %v432_v58, 0.0  ;;  %v4322_v54 = vld [vmem:[#allocation2 + $0x350] sm:$0xf0]  ;;  %1326 = vmatpush.bf16.msra.mxu2 %v4197_v52  ;;  %v4280_v52 = vld [vmem:[#allocation2 + $0x2e8] sm:$0xf] }
  0xa7   :  { %1279 = vmatpush.bf16.msra.mxu0 %v3925_v2 }
  0xa8   :  { %v5945_v3 = vpack.c.bf16 %v496_v60, %v492_v53  ;;  %v5948_v8 = vpack.c.bf16 %v497_v63, %v493_v56  ;;  %v5404_v53 = vld [vmem:[#allocation2 + $0x344] sm:$0xf]  ;;  %v4050_v63 = vld [vmem:[#allocation2 + $0x130] sm:$0xf0] }
  0xa9   :  { %v4325_v60 = vor.u32 %v5404_v53, %v4322_v54  ;;  %v4053_v10 = vor.u32 %v5336_v62, %v4050_v63  ;;  %v5395_v53 = vld [vmem:[#allocation2 + $0x2f4] sm:$0xf0]  ;;  %v4024_v54 = vld [vmem:[#allocation2 + $0xe8] sm:$0xf] }
  0xaa   :  { %v455_v14 = vpop.f32.mrf.mxu2  ;;  %1185 = vmatmul.bf16.vlgmr.msrb.gmra.mxu0 %v5945_v3  ;;  %v479_v20 = vpop.f32.mrf.mxu3  ;;  %1209 = vmatmul.bf16.vlgmr.msrb.gmra.mxu1 %v5948_v8  ;;  %v5427_v62 = vld [vmem:[#allocation2 + $0x3f4] sm:$0xf0] }
  0xab   :  { %v456_v19 = vadd.f32 %v455_v14, %v5940_v57  ;;  %v410_v21 = vpop.f32.mrf.mxu0  ;;  %v480_v26 = vadd.f32 %v479_v20, %v5943_v59  ;;  %v434_v27 = vpop.f32.mrf.mxu1  ;;  %1350 = vmatpush.bf16.msra.mxu3 %v4325_v60  ;;  %1303 = vmatpush.bf16.msra.mxu1 %v4053_v10  ;;  %v5331_v60 = vld [vmem:[#allocation2 + $0xf4] sm:$0xf0]  ;;  %v4409_v2 = vor.u32 %v5427_v62, %v4408_v61  ;;  %v4360_v62 = vld [vmem:[#allocation2 + $0x388] sm:$0xf] }
  0xac   :  { %v411_v33 = vadd.f32 %v410_v21, %v5933_v29  ;;  %v435_v48 = vadd.f32 %v434_v27, %v5935_v32  ;;  %1327 = vmatpush.bf16.msra.mxu2 %v4181_v11  ;;  %v3909_v21 = vor.u32 %v5300_v13, %v3906_v15  ;;  %v4153_v10 = vor.u32 %v5363_v5, %v4152_v4  ;;  %v5391_v11 = vld [vmem:[#allocation2 + $0x2d4] sm:$0xf0]  ;;  %v4216_v4 = vld [vmem:[#allocation2 + $0x268] sm:$0xf] }
  0xad   :  { %v498_v31 = vmax.f32 %v456_v19, 0.0  ;;  %v499_v35 = vmax.f32 %v480_v26, 0.0  ;;  %v4034_v19 = vld [vmem:[#allocation2 + $0x110] sm:$0xf0]  ;;  %v5327_v15 = vld [vmem:[#allocation2 + $0xd4] sm:$0xf0] }
  0xae   :  { %v500_v47 = vmax.f32 %v411_v33, 0.0  ;;  %v501_v7 = vmax.f32 %v435_v48, 0.0  ;;  %v4037_v22 = vor.u32 %v5332_v16, %v4034_v19  ;;  %v4162_v33 = vld [vmem:[#allocation2 + $0x210] sm:$0xf0]  ;;  %1280 = vmatpush.bf16.msra.mxu0 %v3909_v21  ;;  %v4392_v16 = vld [vmem:[#allocation2 + $0x3c8] sm:$0xf] }
  0xaf   :  { %v5956_v38 = vpack.c.bf16 %v498_v31, %v494_v30  ;;  %v5958_v42 = vpack.c.bf16 %v499_v35, %v495_v34  ;;  %1351 = vmatpush.bf16.msra.mxu3 %v4309_v18  ;;  %v5364_v31 = vld [vmem:[#allocation2 + $0x204] sm:$0xf]  ;;  %v5423_v18 = vld [vmem:[#allocation2 + $0x3d4] sm:$0xf0] }
  0xb0   :  { %v5396_v34 = vld [vmem:[#allocation2 + $0x304] sm:$0xf]  ;;  %1304 = vmatpush.bf16.msra.mxu1 %v4037_v22  ;;  %v4165_v37 = vor.u32 %v5364_v31, %v4162_v33  ;;  %v4393_v21 = vor.u32 %v5423_v18, %v4392_v16  ;;  %v4248_v31 = vld [vmem:[#allocation2 + $0x2a8] sm:$0xf]  ;;  %v5379_v5 = vld [vmem:[#allocation2 + $0x274] sm:$0xf0] }
  0xb1   :  { %1233 = vmatmul.bf16.vlgmr.msrb.gmra.mxu2 %v5956_v38  ;;  %1257 = vmatmul.bf16.vlgmr.msrb.gmra.mxu3 %v5958_v42  ;;  %v4293_v44 = vor.u32 %v5396_v34, %v4290_v39  ;;  %v5375_v18 = vld [vmem:[#allocation2 + $0x254] sm:$0xf0] }
  0xb2   :  { %v458_v51 = vpop.f32.mrf.mxu2  ;;  %v482_v56 = vpop.f32.mrf.mxu3  ;;  %1328 = vmatpush.bf16.msra.mxu2 %v4165_v37  ;;  %v5323_v37 = vld [vmem:[#allocation2 + $0xb4] sm:$0xf0] }
  0xb3   :  { %v412_v58 = vpop.f32.mrf.mxu0  ;;  %v436_v1 = vpop.f32.mrf.mxu1  ;;  %v459_v23 = vadd.f32 %v458_v51, %v5940_v57  ;;  %v483_v25 = vadd.f32 %v482_v56, %v5943_v59  ;;  %1352 = vmatpush.bf16.msra.mxu3 %v4293_v44  ;;  %v4376_v44 = vld [vmem:[#allocation2 + $0x3a8] sm:$0xf] }
  0xb4   :  { %v413_v0 = vadd.f32 %v412_v58, %v5933_v29  ;;  %v437_v9 = vadd.f32 %v436_v1, %v5935_v32  ;;  %v4281_v58 = vor.u32 %v5395_v53, %v4280_v52  ;;  %v4025_v1 = vor.u32 %v5331_v60, %v4024_v54  ;;  %1393 = vmatpush.bf16.msrb.mxu1 %v4153_v10  ;;  %v5355_v52 = vld [vmem:[#allocation2 + $0x1b4] sm:$0xf0]  ;;  %v4232_v53 = vld [vmem:[#allocation2 + $0x288] sm:$0xf] }
  0xb5   :  { %v502_v40 = vmax.f32 %v459_v23, 0.0  ;;  %v503_v45 = vmax.f32 %v483_v25, 0.0  ;;  %v5315_v10 = vld [vmem:[#allocation2 + $0x74] sm:$0xf0] }
  0xb6   :  { %v504_v14 = vmax.f32 %v413_v0, 0.0  ;;  %v505_v17 = vmax.f32 %v437_v9, 0.0  ;;  %1417 = vmatpush.bf16.msrb.mxu2 %v4281_v58  ;;  %1369 = vmatpush.bf16.msrb.mxu0 %v4025_v1  ;;  %v5319_v58 = vld [vmem:[#allocation2 + $0x94] sm:$0xf0] }
  0xb7   :  { %1441 = vmatpush.bf16.msrb.mxu3 %v4409_v2  ;;  %v5351_v2 = vld [vmem:[#allocation2 + $0x194] sm:$0xf0] }
  0xb8   :  { %v5965_v20 = vpack.c.bf16 %v504_v14, %v500_v47  ;;  %v5968_v24 = vpack.c.bf16 %v505_v17, %v501_v7  ;;  %v4265_v14 = vor.u32 %v5391_v11, %v4264_v6  ;;  %v4009_v17 = vor.u32 %v5327_v15, %v4008_v12  ;;  %v4088_v11 = vld [vmem:[#allocation2 + $0x168] sm:$0xf]  ;;  %v5347_v15 = vld [vmem:[#allocation2 + $0x174] sm:$0xf0] }
  0xba   :  { %v460_v26 = vpop.f32.mrf.mxu2  ;;  %1190 = vmatmul.bf16.gmra.mxu0 %v5965_v20  ;;  %v484_v28 = vpop.f32.mrf.mxu3  ;;  %1214 = vmatmul.bf16.gmra.mxu1 %v5968_v24 }
  0xbb   :  { %v461_v27 = vadd.f32 %v460_v26, %v5940_v57  ;;  %v415_v30 = vpop.f32.mrf.mxu0  ;;  %v485_v35 = vadd.f32 %v484_v28, %v5943_v59  ;;  %v439_v36 = vpop.f32.mrf.mxu1  ;;  %1418 = vmatpush.bf16.msrb.mxu2 %v4265_v14  ;;  %1442 = vmatpush.bf16.msrb.mxu3 %v4393_v21  ;;  %v4136_v28 = vld [vmem:[#allocation2 + $0x1c8] sm:$0xf]  ;;  %v5411_v14 = vld [vmem:[#allocation2 + $0x374] sm:$0xf0] }
  0xbc   :  { %v416_v43 = vadd.f32 %v415_v30, %v5933_v29  ;;  %v440_v50 = vadd.f32 %v439_v36, %v5935_v32  ;;  %1370 = vmatpush.bf16.msrb.mxu0 %v4009_v17  ;;  %v5359_v30 = vld [vmem:[#allocation2 + $0x1d4] sm:$0xf0]  ;;  %v3992_v36 = vld [vmem:[#allocation2 + $0xa8] sm:$0xf] }
  0xbd   :  { %v506_v41 = vmax.f32 %v461_v27, 0.0  ;;  %v507_v46 = vmax.f32 %v485_v35, 0.0  ;;  %v4137_v34 = vor.u32 %v5359_v30, %v4136_v28  ;;  %v5387_v35 = vld [vmem:[#allocation2 + $0x2b4] sm:$0xf0]  ;;  %v4200_v17 = vld [vmem:[#allocation2 + $0x248] sm:$0xf] }
  0xbe   :  { %v508_v49 = vmax.f32 %v416_v43, 0.0  ;;  %v509_v7 = vmax.f32 %v440_v50, 0.0  ;;  %v3993_v43 = vor.u32 %v5323_v37, %v3992_v36  ;;  %v3944_v21 = vld [vmem:[#allocation2 + $0x48] sm:$0xf]  ;;  %v5339_v37 = vld [vmem:[#allocation2 + $0x134] sm:$0xf0] }
  0xbf   :  { %v5976_v47 = vpack.c.bf16 %v506_v41, %v502_v40  ;;  %v5978_v48 = vpack.c.bf16 %v507_v46, %v503_v45  ;;  %v4249_v41 = vor.u32 %v5387_v35, %v4248_v31  ;;  %v5419_v45 = vld [vmem:[#allocation2 + $0x3b4] sm:$0xf0]  ;;  %1394 = vmatpush.bf16.msrb.mxu1 %v4137_v34  ;;  %v4328_v30 = vld [vmem:[#allocation2 + $0x348] sm:$0xf] }
  0xc0   :  { %1371 = vmatpush.bf16.msrb.mxu0 %v3993_v43  ;;  %v5407_v31 = vld [vmem:[#allocation2 + $0x354] sm:$0xf0]  ;;  %v4056_v36 = vld [vmem:[#allocation2 + $0x128] sm:$0xf] }
  0xc1   :  { %1238 = vmatmul.bf16.gmra.mxu2 %v5976_v47  ;;  %1262 = vmatmul.bf16.gmra.mxu3 %v5978_v48  ;;  %v4329_v34 = vor.u32 %v5407_v31, %v4328_v30  ;;  %v5307_v35 = vld [vmem:[#allocation2 + $0x34] sm:$0xf0]  ;;  %v4250_v30 = vld [vmem:[#allocation2 + $0x2b8] sm:$0xf0]  ;;  %v5321_v31 = vld [vmem:[#allocation2 + $0xac] sm:$0xf] }
  0xc2   :  { %v463_v51 = vpop.f32.mrf.mxu2  ;;  %v487_v55 = vpop.f32.mrf.mxu3  ;;  %1419 = vmatpush.bf16.msrb.mxu2 %v4249_v41  ;;  %v4184_v41 = vld [vmem:[#allocation2 + $0x228] sm:$0xf]  ;;  %v5371_v43 = vld [vmem:[#allocation2 + $0x234] sm:$0xf0] }
  0xc3   :  { %v417_v56 = vpop.f32.mrf.mxu0  ;;  %v441_v0 = vpop.f32.mrf.mxu1  ;;  %v464_v22 = vadd.f32 %v463_v51, %v5940_v57  ;;  %v488_v23 = vadd.f32 %v487_v55, %v5943_v59  ;;  %v5383_v55 = vld [vmem:[#allocation2 + $0x294] sm:$0xf0] }
  0xc4   :  { %v418_v63 = vadd.f32 %v417_v56, %v5933_v29  ;;  %v442_v9 = vadd.f32 %v441_v0, %v5935_v32  ;;  %v3976_v56 = vld [vmem:[#allocation2 + $0x88] sm:$0xf]  ;;  %v4233_v60 = vor.u32 %v5383_v55, %v4232_v53  ;;  %v5335_v53 = vld [vmem:[#allocation2 + $0x114] sm:$0xf0] }
  0xc5   :  { %v510_v39 = vmax.f32 %v464_v22, 0.0  ;;  %v3977_v61 = vor.u32 %v5319_v58, %v3976_v56  ;;  %v4104_v0 = vld [vmem:[#allocation2 + $0x188] sm:$0xf]  ;;  %v4201_v22 = vor.u32 %v5375_v18, %v4200_v17  ;;  %v5367_v58 = vld [vmem:[#allocation2 + $0x214] sm:$0xf0] }
  0xc6   :  { %v512_v13 = vmax.f32 %v418_v63, 0.0  ;;  %v513_v29 = vmax.f32 %v442_v9, 0.0  ;;  %v5415_v63 = vld [vmem:[#allocation2 + $0x394] sm:$0xf0]  ;;  %1420 = vmatpush.bf16.msrb.mxu2 %v4233_v60  ;;  %v4105_v6 = vor.u32 %v5351_v2, %v4104_v0  ;;  %v3960_v9 = vld [vmem:[#allocation2 + $0x68] sm:$0xf] }
  0xc7   :  { %v4361_v1 = vor.u32 %v5415_v63, %v4360_v62  ;;  %1372 = vmatpush.bf16.msrb.mxu0 %v3977_v61  ;;  %v3961_v12 = vor.u32 %v5315_v10, %v3960_v9  ;;  %v4168_v56 = vld [vmem:[#allocation2 + $0x208] sm:$0xf]  ;;  %v5399_v62 = vld [vmem:[#allocation2 + $0x314] sm:$0xf0]  ;;  %v5393_v0 = vld [vmem:[#allocation2 + $0x2ec] sm:$0xf] }
  0xc8   :  { %v5985_v19 = vpack.c.bf16 %v512_v13, %v508_v49  ;;  %v5988_v32 = vpack.c.bf16 %v513_v29, %v509_v7  ;;  %v4377_v49 = vor.u32 %v5419_v45, %v4376_v44  ;;  %v4217_v7 = vor.u32 %v5379_v5, %v4216_v4  ;;  %v4344_v13 = vld [vmem:[#allocation2 + $0x368] sm:$0xf]  ;;  %v5329_v2 = vld [vmem:[#allocation2 + $0xec] sm:$0xf]  ;;  %v4026_v5 = vld [vmem:[#allocation2 + $0xf8] sm:$0xf0] }
  0xc9   :  { %v4345_v16 = vor.u32 %v5411_v14, %v4344_v13  ;;  %v4089_v29 = vor.u32 %v5347_v15, %v4088_v11  ;;  %v4312_v44 = vld [vmem:[#allocation2 + $0x328] sm:$0xf]  ;;  %v4185_v45 = vor.u32 %v5371_v43, %v4184_v41  ;;  %v4169_v61 = vor.u32 %v5367_v58, %v4168_v56  ;;  %v5361_v11 = vld [vmem:[#allocation2 + $0x1ec] sm:$0xf]  ;;  %v4266_v15 = vld [vmem:[#allocation2 + $0x2d8] sm:$0xf0] }
  0xca   :  { %v465_v25 = vpop.f32.mrf.mxu2  ;;  %1195 = vmatmul.bf16.gmra.mxu0 %v5985_v19  ;;  %v489_v27 = vpop.f32.mrf.mxu3  ;;  %1219 = vmatmul.bf16.gmra.mxu1 %v5988_v32  ;;  %v4296_v60 = vld [vmem:[#allocation2 + $0x308] sm:$0xf]  ;;  %v4029_v9 = vor.u32 %v5329_v2, %v4026_v5  ;;  %v5389_v13 = vld [vmem:[#allocation2 + $0x2cc] sm:$0xf]  ;;  %v4122_v41 = vld [vmem:[#allocation2 + $0x1b8] sm:$0xf0] }
  0xcb   :  { %v466_v26 = vadd.f32 %v465_v25, %v5940_v57  ;;  %v490_v33 = vadd.f32 %v489_v27, %v5943_v59  ;;  %v511_v57 = vmax.f32 %v488_v23, 0.0  ;;  %1443 = vmatpush.bf16.msrb.mxu3 %v4377_v49  ;;  %v4120_v59 = vld [vmem:[#allocation2 + $0x1a8] sm:$0xf]  ;;  %1421 = vmatpush.bf16.msrb.mxu2 %v4217_v7  ;;  %v5311_v23 = vld [vmem:[#allocation2 + $0x54] sm:$0xf0]  ;;  %v4297_v63 = vor.u32 %v5399_v62, %v4296_v60 }
  0xcc   :  { %v4121_v54 = vor.u32 %v5355_v52, %v4120_v59  ;;  %1373 = vmatpush.bf16.msrb.mxu0 %v3961_v12  ;;  %v4072_v25 = vld [vmem:[#allocation2 + $0x148] sm:$0xf]  ;;  %v3945_v27 = vor.u32 %v5311_v23, %v3944_v21  ;;  %v5303_v49 = vld [vmem:[#allocation2 + $0x14] sm:$0xf0]  ;;  %v4410_v7 = vld [vmem:[#allocation2 + $0x3f8] sm:$0xf0]  ;;  %v4269_v17 = vor.u32 %v5389_v13, %v4266_v15 }
  0xcd   :  { %v514_v40 = vmax.f32 %v466_v26, 0.0  ;;  %v515_v46 = vmax.f32 %v490_v33, 0.0  ;;  %v5343_v26 = vld [vmem:[#allocation2 + $0x154] sm:$0xf0]  ;;  %v3928_v33 = vld [vmem:[#allocation2 + $0x28] sm:$0xf] }
  0xce   :  { %1395 = vmatpush.bf16.msrb.mxu1 %v4121_v54  ;;  %v4073_v28 = vor.u32 %v5343_v26, %v4072_v25  ;;  %v4040_v52 = vld [vmem:[#allocation2 + $0x108] sm:$0xf]  ;;  %v4154_v12 = vld [vmem:[#allocation2 + $0x1f8] sm:$0xf0]  ;;  %v5421_v18 = vld [vmem:[#allocation2 + $0x3cc] sm:$0xf] }
  0xcf   :  { %v5995_v50 = vpack.c.bf16 %v514_v40, %v510_v39  ;;  %v5997_v51 = vpack.c.bf16 %v515_v46, %v511_v57  ;;  %1444 = vmatpush.bf16.msrb.mxu3 %v4361_v1  ;;  %1422 = vmatpush.bf16.msrb.mxu2 %v4201_v22  ;;  %v3929_v39 = vor.u32 %v5307_v35, %v3928_v33  ;;  %v5403_v57 = vld [vmem:[#allocation2 + $0x334] sm:$0xf0]  ;;  %v3912_v46 = vld [vmem:[#allocation2 + $0x8] sm:$0xf]  ;;  %v4282_v1 = vld [vmem:[#allocation2 + $0x2f8] sm:$0xf0] }
  0xd0   :  { %1374 = vmatpush.bf16.msrb.mxu0 %v3945_v27  ;;  %v4057_v40 = vor.u32 %v5339_v37, %v4056_v36  ;;  %v4313_v59 = vor.u32 %v5403_v57, %v4312_v44  ;;  %v3913_v54 = vor.u32 %v5303_v49, %v3912_v46  ;;  %v4041_v55 = vor.u32 %v5335_v53, %v4040_v52  ;;  %v4394_v21 = vld [vmem:[#allocation2 + $0x3d8] sm:$0xf0]  ;;  %v5357_v25 = vld [vmem:[#allocation2 + $0x1cc] sm:$0xf] }
  0xd1   :  { %1243 = vmatmul.bf16.gmra.mxu2 %v5995_v50  ;;  %1267 = vmatmul.bf16.gmra.mxu3 %v5997_v51  ;;  %v4285_v4 = vor.u32 %v5393_v0, %v4282_v1  ;;  %v4157_v14 = vor.u32 %v5361_v11, %v4154_v12  ;;  %v4397_v23 = vor.u32 %v5421_v18, %v4394_v21  ;;  %v4138_v26 = vld [vmem:[#allocation2 + $0x1d8] sm:$0xf0]  ;;  %v5385_v27 = vld [vmem:[#allocation2 + $0x2ac] sm:$0xf] }
  0xd2   :  { %1396 = vmatpush.bf16.msrb.mxu1 %v4105_v6  ;;  %v5425_v6 = vld [vmem:[#allocation2 + $0x3ec] sm:$0xf]  ;;  %v3994_v33 = vld [vmem:[#allocation2 + $0xb8] sm:$0xf0] }
  0xd3   :  { %1445 = vmatpush.bf16.msrb.mxu3 %v4345_v16  ;;  %1423 = vmatpush.bf16.msrb.mxu2 %v4185_v45  ;;  %v4413_v10 = vor.u32 %v5425_v6, %v4410_v7  ;;  %v5325_v16 = vld [vmem:[#allocation2 + $0xcc] sm:$0xf]  ;;  %v3997_v35 = vor.u32 %v5321_v31, %v3994_v33  ;;  %v4378_v37 = vld [vmem:[#allocation2 + $0x3b8] sm:$0xf0] }
  0xd4   :  { %1375 = vmatpush.bf16.msrb.mxu0 %v3929_v39  ;;  %v5417_v36 = vld [vmem:[#allocation2 + $0x3ac] sm:$0xf]  ;;  %v4234_v45 = vld [vmem:[#allocation2 + $0x298] sm:$0xf0] }
  0xd5   :  { %v4381_v39 = vor.u32 %v5417_v36, %v4378_v37  ;;  %v5381_v43 = vld [vmem:[#allocation2 + $0x28c] sm:$0xf]  ;;  %v3978_v46 = vld [vmem:[#allocation2 + $0x98] sm:$0xf0] }
  0xd6   :  { %1397 = vmatpush.bf16.msrb.mxu1 %v4089_v29  ;;  %v4010_v29 = vld [vmem:[#allocation2 + $0xd8] sm:$0xf0]  ;;  %v5317_v57 = vld [vmem:[#allocation2 + $0x8c] sm:$0xf]  ;;  %v4237_v49 = vor.u32 %v5381_v43, %v4234_v45 }
  0xd7   :  { %1446 = vmatpush.bf16.msrb.mxu3 %v4329_v34  ;;  %1424 = vmatpush.bf16.msrb.mxu2 %v4169_v61  ;;  %v4013_v22 = vor.u32 %v5325_v16, %v4010_v29  ;;  %v4253_v34 = vor.u32 %v5385_v27, %v4250_v30  ;;  %v5413_v52 = vld [vmem:[#allocation2 + $0x38c] sm:$0xf]  ;;  %v4362_v53 = vld [vmem:[#allocation2 + $0x398] sm:$0xf0] }
  0xd8   :  { %1376 = vmatpush.bf16.msrb.mxu0 %v3913_v54  ;;  %v5349_v54 = vld [vmem:[#allocation2 + $0x18c] sm:$0xf]  ;;  %v4106_v56 = vld [vmem:[#allocation2 + $0x198] sm:$0xf0] }
  0xd9   :  { %v4109_v58 = vor.u32 %v5349_v54, %v4106_v56  ;;  %v5377_v60 = vld [vmem:[#allocation2 + $0x26c] sm:$0xf]  ;;  %v4218_v61 = vld [vmem:[#allocation2 + $0x278] sm:$0xf0] }
  0xda   :  { %1281 = vmatmul.bf16.vlgmr.msra.gmra.mxu0 %v5945_v3  ;;  %1305 = vmatmul.bf16.vlgmr.msra.gmra.mxu1 %v5948_v8  ;;  %v5313_v62 = vld [vmem:[#allocation2 + $0x6c] sm:$0xf]  ;;  %v3962_v0 = vld [vmem:[#allocation2 + $0x78] sm:$0xf0] }
  0xdb   :  { %1398 = vmatpush.bf16.msrb.mxu1 %v4073_v28  ;;  %1447 = vmatpush.bf16.msrb.mxu3 %v4313_v59  ;;  %v4141_v28 = vor.u32 %v5357_v25, %v4138_v26  ;;  %v3981_v59 = vor.u32 %v5317_v57, %v3978_v46  ;;  %v5409_v1 = vld [vmem:[#allocation2 + $0x36c] sm:$0xf]  ;;  %v4346_v2 = vld [vmem:[#allocation2 + $0x378] sm:$0xf0] }
  0xdc   :  { %1465 = vmatpush.bf16.msra.mxu0 %v4029_v9  ;;  %v4349_v5 = vor.u32 %v5409_v1, %v4346_v2  ;;  %v5345_v6 = vld [vmem:[#allocation2 + $0x16c] sm:$0xf]  ;;  %v4090_v7 = vld [vmem:[#allocation2 + $0x178] sm:$0xf0] }
  0xdd   :  { %v5373_v9 = vld [vmem:[#allocation2 + $0x24c] sm:$0xf]  ;;  %v4202_v11 = vld [vmem:[#allocation2 + $0x258] sm:$0xf0] }
  0xde   :  { %v4205_v12 = vor.u32 %v5373_v9, %v4202_v11  ;;  %v5309_v13 = vld [vmem:[#allocation2 + $0x4c] sm:$0xf]  ;;  %v4074_v29 = vld [vmem:[#allocation2 + $0x158] sm:$0xf0] }
  0xdf   :  { %1399 = vmatpush.bf16.msrb.mxu1 %v4057_v40  ;;  %1448 = vmatpush.bf16.msrb.mxu3 %v4297_v63  ;;  %v5353_v40 = vld [vmem:[#allocation2 + $0x1ac] sm:$0xf]  ;;  %v4221_v63 = vor.u32 %v5377_v60, %v4218_v61  ;;  %v4330_v21 = vld [vmem:[#allocation2 + $0x358] sm:$0xf0]  ;;  %v5434_v60 = vld [vmem:[%s6697_s6 + $0x30] sm:$0xff] }
  0xe0   :  { %1466 = vmatpush.bf16.msra.mxu0 %v4013_v22  ;;  %v4125_v44 = vor.u32 %v5353_v40, %v4122_v41  ;;  %v5341_v15 = vld [vmem:[#allocation2 + $0x14c] sm:$0xf]  ;;  %v3930_v25 = vld [vmem:[#allocation2 + $0x38] sm:$0xf0] }
  0xe1   :  { %1329 = vmatmul.bf16.vlgmr.msra.gmra.mxu2 %v5956_v38  ;;  %1353 = vmatmul.bf16.vlgmr.msra.gmra.mxu3 %v5958_v42  ;;  %v5405_v18 = vld [vmem:[#allocation2 + $0x34c] sm:$0xf]  ;;  %v4058_v27 = vld [vmem:[#allocation2 + $0x138] sm:$0xf0] }
  0xe2   :  { %1513 = vmatpush.bf16.msra.mxu2 %v4285_v4  ;;  %v3965_v4 = vor.u32 %v5313_v62, %v3962_v0  ;;  %v5305_v22 = vld [vmem:[#allocation2 + $0x2c] sm:$0xf]  ;;  %v3914_v33 = vld [vmem:[#allocation2 + $0x18] sm:$0xf0] }
  0xe3   :  { %1400 = vmatpush.bf16.msrb.mxu1 %v4041_v55  ;;  %1537 = vmatpush.bf16.msra.mxu3 %v4413_v10  ;;  %v4365_v55 = vor.u32 %v5413_v52, %v4362_v53  ;;  %v4093_v10 = vor.u32 %v5345_v6, %v4090_v7  ;;  %v5337_v26 = vld [vmem:[#allocation2 + $0x12c] sm:$0xf]  ;;  %v4186_v37 = vld [vmem:[#allocation2 + $0x238] sm:$0xf0]  ;;  %v5442_v6 = vld [vmem:[%s6697_s6 + $0x70] sm:$0xff] }
  0xe4   :  { %1467 = vmatpush.bf16.msra.mxu0 %v3997_v35  ;;  %v4061_v30 = vor.u32 %v5337_v26, %v4058_v27  ;;  %v5301_v31 = vld [vmem:[#allocation2 + $0xc] sm:$0xf]  ;;  %v4042_v35 = vld [vmem:[#allocation2 + $0x118] sm:$0xf0]  ;;  %v6109_v27 = vld [vmem:[%s6696_s5] sm:$0xf] }
  0xe5   :  { %v5369_v36 = vld [vmem:[#allocation2 + $0x22c] sm:$0xf]  ;;  %v3917_v40 = vor.u32 %v5301_v31, %v3914_v33  ;;  %v4314_v43 = vld [vmem:[#allocation2 + $0x338] sm:$0xf0] }
  0xe6   :  { %1514 = vmatpush.bf16.msra.mxu2 %v4269_v17  ;;  %v4077_v17 = vor.u32 %v5341_v15, %v4074_v29  ;;  %v4189_v41 = vor.u32 %v5369_v36, %v4186_v37  ;;  %v5365_v57 = vld [vmem:[#allocation2 + $0x20c] sm:$0xf]  ;;  %v4170_v46 = vld [vmem:[#allocation2 + $0x218] sm:$0xf0] }
  0xe7   :  { %1489 = vmatpush.bf16.msra.mxu1 %v4157_v14  ;;  %1538 = vmatpush.bf16.msra.mxu3 %v4397_v23  ;;  %v3946_v14 = vld [vmem:[#allocation2 + $0x58] sm:$0xf0]  ;;  %v4333_v23 = vor.u32 %v5405_v18, %v4330_v21  ;;  %v5433_v62 = vld [vmem:[%s6697_s6 + $0x28] sm:$0xff]  ;;  %v5438_v18 = vld [vmem:[%s6697_s6 + $0x50] sm:$0xff] }
  0xe8   :  { %1468 = vmatpush.bf16.msra.mxu0 %v3981_v59  ;;  %v3949_v16 = vor.u32 %v5309_v13, %v3946_v14  ;;  %v5397_v59 = vld [vmem:[#allocation2 + $0x30c] sm:$0xf]  ;;  %v4298_v52 = vld [vmem:[#allocation2 + $0x318] sm:$0xf0]  ;;  %v5430_v13 = vld [vmem:[%s6697_s6 + $0x10] sm:$0xff] }
  0xe9   :  { %v4301_v53 = vor.u32 %v5397_v59, %v4298_v52  ;;  %v5435_v56 = vld [vmem:[%s6697_s6 + $0x38] sm:$0xff]  ;;  %v5441_v11 = vld [vmem:[%s6697_s6 + $0x68] sm:$0xff] }
  0xea   :  { %1286 = vmatmul.bf16.gmra.mxu0 %v5965_v20  ;;  %1310 = vmatmul.bf16.gmra.mxu1 %v5968_v24  ;;  %v5443_v1 = vld [vmem:[%s6697_s6 + $0x78] sm:$0xff]  ;;  %v5429_v14 = vld [vmem:[%s6697_s6 + $0x8] sm:$0xff] }
  0xeb   :  { %1490 = vmatpush.bf16.msra.mxu1 %v4141_v28  ;;  %1515 = vmatpush.bf16.msra.mxu2 %v4253_v34  ;;  %v3933_v28 = vor.u32 %v5305_v22, %v3930_v25  ;;  %v5333_v34 = vld [vmem:[#allocation2 + $0x10c] sm:$0xf]  ;;  %v5431_v7 = vld [vmem:[%s6697_s6 + $0x18] sm:$0xff] }
  0xec   :  { %1539 = vmatpush.bf16.msra.mxu3 %v4381_v39  ;;  %1469 = vmatpush.bf16.msra.mxu0 %v3965_v4  ;;  %v5401_v39 = vld [vmem:[#allocation2 + $0x32c] sm:$0xf]  ;;  %v5432_v4 = vld [vmem:[%s6697_s6 + $0x20] sm:$0xff]  ;;  %v5451_v59 = vld [vmem:[%s6697_s6 + $0xb8] sm:$0xff] }
  0xed   :  { %v4317_v45 = vor.u32 %v5401_v39, %v4314_v43 }
  0xef   :  { %1491 = vmatpush.bf16.msra.mxu1 %v4125_v44  ;;  %1516 = vmatpush.bf16.msra.mxu2 %v4237_v49  ;;  %v4045_v44 = vor.u32 %v5333_v34, %v4042_v35  ;;  %v4173_v49 = vor.u32 %v5365_v57, %v4170_v46 }
  0xf0   :  { %1540 = vmatpush.bf16.msra.mxu3 %v4365_v55  ;;  %1470 = vmatpush.bf16.msra.mxu0 %v3949_v16 }
  0xf1   :  { %1334 = vmatmul.bf16.gmra.mxu2 %v5976_v47  ;;  %1358 = vmatmul.bf16.gmra.mxu3 %v5978_v48 }
  0xf3   :  { %1492 = vmatpush.bf16.msra.mxu1 %v4109_v58  ;;  %1517 = vmatpush.bf16.msra.mxu2 %v4221_v63 }
  0xf4   :  { %1541 = vmatpush.bf16.msra.mxu3 %v4349_v5  ;;  %1471 = vmatpush.bf16.msra.mxu0 %v3933_v28 }
  0xf7   :  { %1493 = vmatpush.bf16.msra.mxu1 %v4093_v10  ;;  %1518 = vmatpush.bf16.msra.mxu2 %v4205_v12 }
  0xf8   :  { %1542 = vmatpush.bf16.msra.mxu3 %v4333_v23  ;;  %1472 = vmatpush.bf16.msra.mxu0 %v3917_v40  ;;  %v5437_v23 = vld [vmem:[%s6697_s6 + $0x48] sm:$0xff] }
  0xfa   :  { %1291 = vmatmul.bf16.gmra.mxu0 %v5985_v19  ;;  %1315 = vmatmul.bf16.gmra.mxu1 %v5988_v32 }
  0xfb   :  { %1494 = vmatpush.bf16.msra.mxu1 %v4077_v17  ;;  %1519 = vmatpush.bf16.msra.mxu2 %v4189_v41  ;;  %v6136_v41 = vperm.slane %v6109_v27, 1 }
  0xfc   :  { %1543 = vmatpush.bf16.msra.mxu3 %v4317_v45 }
  0xff   :  { %1495 = vmatpush.bf16.msra.mxu1 %v4061_v30  ;;  %1520 = vmatpush.bf16.msra.mxu2 %v4173_v49 }
 0x100   :  { %1544 = vmatpush.bf16.msra.mxu3 %v4301_v53 }
 0x101   :  { %1339 = vmatmul.bf16.gmra.mxu2 %v5995_v50  ;;  %1363 = vmatmul.bf16.gmra.mxu3 %v5997_v51 }
 0x103   :  { %1496 = vmatpush.bf16.msra.mxu1 %v4045_v44 }
 0x10a   :  { %1377 = vmatmul.bf16.vlgmr.msrb.gmra.mxu0 %v5945_v3  ;;  %1401 = vmatmul.bf16.vlgmr.msrb.gmra.mxu1 %v5948_v8 }
 0x10b   :  { %1789 = vmatpush.bf16.msrb.mxu0 %v5435_v56  ;;  %1813 = vmatpush.bf16.msrb.mxu1 %v5443_v1 }
 0x10f   :  { %1790 = vmatpush.bf16.msrb.mxu0 %v5434_v60  ;;  %1814 = vmatpush.bf16.msrb.mxu1 %v5442_v6 }
 0x111   :  { %1425 = vmatmul.bf16.vlgmr.msrb.gmra.mxu2 %v5956_v38  ;;  %1449 = vmatmul.bf16.vlgmr.msrb.gmra.mxu3 %v5958_v42 }
 0x112   :  { %1837 = vmatpush.bf16.msrb.mxu2 %v5451_v59 }
 0x113   :  { %1791 = vmatpush.bf16.msrb.mxu0 %v5433_v62  ;;  %1815 = vmatpush.bf16.msrb.mxu1 %v5441_v11  ;;  %v4588_v11 = vld [vmem:[%s6698_s7 + $0x40] sm:$0xf] }
 0x117   :  { %1792 = vmatpush.bf16.msrb.mxu0 %v5432_v4 }
 0x11a   :  { %1382 = vmatmul.bf16.gmra.mxu0 %v5965_v20  ;;  %1406 = vmatmul.bf16.gmra.mxu1 %v5968_v24 }
 0x11b   :  { %1793 = vmatpush.bf16.msrb.mxu0 %v5431_v7 }
 0x11f   :  { %1794 = vmatpush.bf16.msrb.mxu0 %v5430_v13 }
 0x121   :  { %1430 = vmatmul.bf16.gmra.mxu2 %v5976_v47  ;;  %1454 = vmatmul.bf16.gmra.mxu3 %v5978_v48 }
 0x123   :  { %1795 = vmatpush.bf16.msrb.mxu0 %v5429_v14 }
 0x127   :  { %v6021_v54 = vpop.f32.mrf.mxu0  ;;  %v6023_v55 = vpop.f32.mrf.mxu1 }
 0x12a   :  { %1387 = vmatmul.bf16.gmra.mxu0 %v5985_v19  ;;  %1411 = vmatmul.bf16.gmra.mxu1 %v5988_v32 }
 0x12f   :  { %v1188_v58 = vpop.f32.mrf.mxu0  ;;  %v6033_v61 = vpop.f32.mrf.mxu1 }
 0x131   :  { %1435 = vmatmul.bf16.gmra.mxu2 %v5995_v50  ;;  %1459 = vmatmul.bf16.gmra.mxu3 %v5997_v51 }
 0x134   :  { %v6040_v63 = vpop.f32.mrf.mxu2  ;;  %v6042_v0 = vpop.f32.mrf.mxu3 }
 0x137   :  { %v6047_v2 = vpop.f32.mrf.mxu0  ;;  %v6052_v5 = vpop.f32.mrf.mxu1 }
 0x13a   :  { %1473 = vmatmul.bf16.vlgmr.msra.gmra.mxu0 %v5945_v3  ;;  %1497 = vmatmul.bf16.vlgmr.msra.gmra.mxu1 %v5948_v8  ;;  %v5440_v8 = vld [vmem:[%s6697_s6 + $0x60] sm:$0xff] }
 0x13b   :  { %1816 = vmatpush.bf16.msrb.mxu1 %v5440_v8 }
 0x13c   :  { %v1236_v9 = vpop.f32.mrf.mxu2  ;;  %v1260_v10 = vpop.f32.mrf.mxu3 }
 0x13f   :  { %v1193_v12 = vpop.f32.mrf.mxu0  ;;  %v6068_v3 = vpop.f32.mrf.mxu1 }
 0x141   :  { %1521 = vmatmul.bf16.vlgmr.msra.gmra.mxu2 %v5956_v38  ;;  %1545 = vmatmul.bf16.vlgmr.msra.gmra.mxu3 %v5958_v42  ;;  %v5439_v38 = vld [vmem:[%s6697_s6 + $0x58] sm:$0xff]  ;;  %v5428_v42 = vld [vmem:[%s6697_s6] sm:$0xff] }
 0x142   :  { %1817 = vmatpush.bf16.msrb.mxu1 %v5439_v38  ;;  %1796 = vmatpush.bf16.msrb.mxu0 %v5428_v42 }
 0x144   :  { %v6078_v15 = vpop.f32.mrf.mxu2  ;;  %v6080_v16 = vpop.f32.mrf.mxu3 }
 0x146   :  { %1818 = vmatpush.bf16.msrb.mxu1 %v5438_v18 }
 0x147   :  { %v6085_v29 = vpop.f32.mrf.mxu0  ;;  %v6090_v17 = vpop.f32.mrf.mxu1 }
 0x14a   :  { %1478 = vmatmul.bf16.gmra.mxu0 %v5965_v20  ;;  %1502 = vmatmul.bf16.gmra.mxu1 %v5968_v24  ;;  %v5436_v20 = vld [vmem:[%s6697_s6 + $0x40] sm:$0xff]  ;;  %v6117_v24 = vperm.slane %v6109_v27, 0 }
 0x14b   :  { %1819 = vmatpush.bf16.msrb.mxu1 %v5437_v23  ;;  %v5469_v23 = vld [vmem:[%s6698_s7 + $0x2c] sm:$0xf0] }
 0x14c   :  { %v1241_v21 = vpop.f32.mrf.mxu2  ;;  %v6097_v22 = vpop.f32.mrf.mxu3  ;;  %v1189_v31 = vadd.f32 %v1188_v58, %v6117_v24  ;;  %v1194_v53 = vadd.f32 %v1193_v12, %v6117_v24  ;;  %v5473_v12 = vld [vmem:[%s6698_s7 + $0x4c] sm:$0xf0] }
 0x14e   :  { %v1213_v35 = vadd.f32 %v6033_v61, %v1189_v31  ;;  %v5450_v61 = vld [vmem:[%s6697_s6 + $0xb0] sm:$0xff]  ;;  %v1218_v62 = vadd.f32 %v6068_v3, %v1194_v53  ;;  %v4589_v3 = vor.u32 %v5473_v12, %v4588_v11 }
 0x14f   :  { %v6102_v25 = vpop.f32.mrf.mxu0  ;;  %v6104_v26 = vpop.f32.mrf.mxu1  ;;  %1820 = vmatpush.bf16.msrb.mxu1 %v5436_v20  ;;  %1838 = vmatpush.bf16.msrb.mxu2 %v5450_v61  ;;  %v5445_v61 = vld [vmem:[%s6697_s6 + $0x88] sm:$0xff] }
 0x150   :  { %v1237_v36 = vadd.f32 %v1236_v9, %v1213_v35  ;;  %v1242_v1 = vadd.f32 %v1241_v21, %v1218_v62  ;;  %2199 = vmatpush.bf16.msra.mxu0 %v4589_v3  ;;  %v4572_v21 = vld [vmem:[%s6698_s7 + $0x20] sm:$0xf] }
 0x151   :  { %1526 = vmatmul.bf16.gmra.mxu2 %v5976_v47  ;;  %1550 = vmatmul.bf16.gmra.mxu3 %v5978_v48  ;;  %v1187_v47 = vadd.f32 %v6021_v54, %v6117_v24  ;;  %v4573_v31 = vor.u32 %v5469_v23, %v4572_v21  ;;  %v5458_v23 = vld [vmem:[%s6697_s6 + $0xf0] sm:$0xff] }
 0x152   :  { %v1261_v44 = vadd.f32 %v1260_v10, %v1237_v36  ;;  %v1266_v8 = vadd.f32 %v6097_v22, %v1242_v1  ;;  %v4556_v36 = vld [vmem:[%s6698_s7] sm:$0xf] }
 0x153   :  { %v1211_v48 = vadd.f32 %v6023_v55, %v1187_v47 }
 0x154   :  { %v6119_v28 = vpop.f32.mrf.mxu2  ;;  %v6121_v30 = vpop.f32.mrf.mxu3  ;;  %v1565_v57 = vmax.f32 %v1261_v44, 0.0  ;;  %2200 = vmatpush.bf16.msra.mxu0 %v4573_v31 }
 0x155   :  { %v1235_v40 = vadd.f32 %v6040_v63, %v1211_v48  ;;  %v1199_v48 = vadd.f32 %v6102_v25, %v6117_v24  ;;  %v5471_v25 = vld [vmem:[%s6698_s7 + $0x44] sm:$0xf] }
 0x157   :  { %v1282_v33 = vpop.f32.mrf.mxu0  ;;  %v1306_v34 = vpop.f32.mrf.mxu1 }
 0x15a   :  { %1483 = vmatmul.bf16.gmra.mxu0 %v5985_v19  ;;  %1507 = vmatmul.bf16.gmra.mxu1 %v5988_v32  ;;  %v1259_v19 = vadd.f32 %v6042_v0, %v1235_v40  ;;  %v1283_v32 = vadd.f32 %v1282_v33, %v6136_v41  ;;  %v1573_v33 = vmax.f32 %v1266_v8, 0.0  ;;  %v5465_v40 = vld [vmem:[%s6698_s7 + $0xc] sm:$0xf0] }
 0x15c   :  { %v6130_v37 = vpop.f32.mrf.mxu2  ;;  %v6132_v39 = vpop.f32.mrf.mxu3  ;;  %v1561_v52 = vmax.f32 %v1259_v19, 0.0  ;;  %v1307_v54 = vadd.f32 %v1306_v34, %v1283_v32  ;;  %v4557_v19 = vor.u32 %v5465_v40, %v4556_v36  ;;  %v1197_v32 = vadd.f32 %v6085_v29, %v6117_v24  ;;  %v5457_v36 = vld [vmem:[%s6697_s6 + $0xe8] sm:$0xff] }
 0x15e   :  { %v1585_v56 = vpack.c.bf16 %v1565_v57, %v1561_v52  ;;  %2201 = vmatpush.bf16.msra.mxu0 %v4557_v19  ;;  %v5446_v52 = vld [vmem:[%s6697_s6 + $0x90] sm:$0xff]  ;;  %v6241_v19 = vld [vmem:[%s6714_s26] sm:$0xff] }
 0x15f   :  { %v1284_v43 = vpop.f32.mrf.mxu0  ;;  %v1308_v45 = vpop.f32.mrf.mxu1 }
 0x160   :  { %v1285_v55 = vadd.f32 %v1284_v43, %v6136_v41 }
 0x161   :  { %1531 = vmatmul.bf16.gmra.mxu2 %v5995_v50  ;;  %1555 = vmatmul.bf16.gmra.mxu3 %v5997_v51  ;;  %v1192_v51 = vadd.f32 %v6047_v2, %v6117_v24  ;;  %v5449_v2 = vld [vmem:[%s6697_s6 + $0xa8] sm:$0xff]  ;;  %v1221_v24 = vadd.f32 %v6090_v17, %v1197_v32 }
 0x162   :  { %v1309_v63 = vadd.f32 %v1308_v45, %v1285_v55  ;;  %1839 = vmatpush.bf16.msrb.mxu2 %v5449_v2 }
 0x163   :  { %v1216_v0 = vadd.f32 %v6052_v5, %v1192_v51  ;;  %v5467_v51 = vld [vmem:[%s6698_s7 + $0x24] sm:$0xf]  ;;  %v1245_v17 = vadd.f32 %v6119_v28, %v1221_v24 }
 0x164   :  { %v1330_v46 = vpop.f32.mrf.mxu2  ;;  %v1354_v49 = vpop.f32.mrf.mxu3  ;;  %v5444_v28 = vld [vmem:[%s6697_s6 + $0x80] sm:$0xff] }
 0x165   :  { %v1331_v60 = vadd.f32 %v1330_v46, %v1307_v54  ;;  %v1240_v10 = vadd.f32 %v6078_v15, %v1216_v0  ;;  %v5448_v15 = vld [vmem:[%s6697_s6 + $0xa0] sm:$0xff]  ;;  %v1223_v54 = vadd.f32 %v6104_v26, %v1199_v48 }
 0x166   :  { %1840 = vmatpush.bf16.msrb.mxu2 %v5448_v15 }
 0x167   :  { %v1287_v50 = vpop.f32.mrf.mxu0  ;;  %v1311_v58 = vpop.f32.mrf.mxu1  ;;  %v1355_v6 = vadd.f32 %v1354_v49, %v1331_v60  ;;  %v1264_v18 = vadd.f32 %v6080_v16, %v1240_v10  ;;  %v5447_v16 = vld [vmem:[%s6697_s6 + $0x98] sm:$0xff]  ;;  %v4590_v49 = vld [vmem:[%s6698_s7 + $0x50] sm:$0xf0]  ;;  %v1247_v55 = vadd.f32 %v6130_v37, %v1223_v54  ;;  %v1269_v10 = vadd.f32 %v6121_v30, %v1245_v17 }
 0x168   :  { %v1288_v22 = vadd.f32 %v1287_v50, %v6136_v41  ;;  %v4593_v53 = vor.u32 %v5471_v25, %v4590_v49  ;;  %v5459_v30 = vld [vmem:[%s6697_s6 + $0xf8] sm:$0xff] }
 0x169   :  { %v1562_v38 = vmax.f32 %v1355_v6, 0.0  ;;  %v1569_v35 = vmax.f32 %v1264_v18, 0.0  ;;  %v1271_v0 = vadd.f32 %v6132_v39, %v1247_v55  ;;  %v4558_v6 = vld [vmem:[%s6698_s7 + $0x10] sm:$0xf0]  ;;  %v1577_v3 = vmax.f32 %v1269_v10, 0.0  ;;  %1861 = vmatpush.bf16.msrb.mxu3 %v5459_v30  ;;  %v5453_v10 = vld [vmem:[%s6697_s6 + $0xc8] sm:$0xff] }
 0x16a   :  { %1797 = vmatmul.bf16.vlgmr.msrb.gmra.mxu0 %v1585_v56  ;;  %v1312_v43 = vadd.f32 %v1311_v58, %v1288_v22  ;;  %1841 = vmatpush.bf16.msrb.mxu2 %v5447_v16  ;;  %v4574_v56 = vld [vmem:[%s6698_s7 + $0x30] sm:$0xf0]  ;;  %v5466_v30 = vld [vmem:[%s6698_s7 + $0x14] sm:$0xf0] }
 0x16b   :  { %v1589_v46 = vpack.c.bf16 %v1573_v33, %v1569_v35  ;;  %2223 = vmatpush.bf16.msra.mxu1 %v4593_v53  ;;  %v4577_v62 = vor.u32 %v5467_v51, %v4574_v56  ;;  %v1581_v12 = vmax.f32 %v1271_v0, 0.0 }
 0x16c   :  { %v1332_v4 = vpop.f32.mrf.mxu2  ;;  %v1356_v9 = vpop.f32.mrf.mxu3 }
 0x16d   :  { %v1333_v7 = vadd.f32 %v1332_v4, %v1309_v63  ;;  %v5463_v4 = vld [vmem:[%s6698_s7 + $0x4] sm:$0xf]  ;;  %v1593_v15 = vpack.c.bf16 %v1581_v12, %v1577_v3  ;;  %1862 = vmatpush.bf16.msrb.mxu3 %v5458_v23  ;;  %v4580_v12 = vld [vmem:[%s6698_s7 + $0x28] sm:$0xf] }
 0x16e   :  { %1842 = vmatpush.bf16.msrb.mxu2 %v5446_v52  ;;  %v4561_v2 = vor.u32 %v5463_v4, %v4558_v6 }
 0x16f   :  { %v1357_v5 = vadd.f32 %v1356_v9, %v1333_v7  ;;  %v1289_v13 = vpop.f32.mrf.mxu0  ;;  %v1313_v14 = vpop.f32.mrf.mxu1  ;;  %2224 = vmatpush.bf16.msra.mxu1 %v4577_v62  ;;  %v5454_v62 = vld [vmem:[%s6697_s6 + $0xd0] sm:$0xff] }
 0x170   :  { %v1290_v44 = vadd.f32 %v1289_v13, %v6136_v41 }
 0x171   :  { %v1566_v42 = vmax.f32 %v1357_v5, 0.0  ;;  %1863 = vmatpush.bf16.msrb.mxu3 %v5457_v36 }
 0x172   :  { %v1314_v29 = vadd.f32 %v1313_v14, %v1290_v44  ;;  %1843 = vmatpush.bf16.msrb.mxu2 %v5445_v61 }
 0x173   :  { %v1586_v20 = vpack.c.bf16 %v1566_v42, %v1562_v38  ;;  %2225 = vmatpush.bf16.msra.mxu1 %v4561_v2 }
 0x174   :  { %v1335_v47 = vpop.f32.mrf.mxu2  ;;  %v1359_v34 = vpop.f32.mrf.mxu3 }
 0x175   :  { %1821 = vmatmul.bf16.vlgmr.msrb.gmra.mxu1 %v1586_v20  ;;  %v1336_v59 = vadd.f32 %v1335_v47, %v1312_v43 }
 0x176   :  { %1844 = vmatpush.bf16.msrb.mxu2 %v5444_v28 }
 0x177   :  { %v1292_v45 = vpop.f32.mrf.mxu0  ;;  %v1316_v57 = vpop.f32.mrf.mxu1  ;;  %v1360_v58 = vadd.f32 %v1359_v34, %v1336_v59  ;;  %v5456_v59 = vld [vmem:[%s6697_s6 + $0xe0] sm:$0xff] }
 0x178   :  { %v1293_v39 = vadd.f32 %v1292_v45, %v6136_v41  ;;  %1864 = vmatpush.bf16.msrb.mxu3 %v5456_v59  ;;  %v6308_v59 = vperm.slane %v6109_v27, 3 }
 0x179   :  { %v1570_v7 = vmax.f32 %v1360_v58, 0.0 }
 0x17a   :  { %1802 = vmatmul.bf16.gmra.mxu0 %v1589_v46  ;;  %v1317_v8 = vadd.f32 %v1316_v57, %v1293_v39 }
 0x17c   :  { %v1337_v50 = vpop.f32.mrf.mxu2  ;;  %v1361_v26 = vpop.f32.mrf.mxu3 }
 0x17d   :  { %v1338_v60 = vadd.f32 %v1337_v50, %v1314_v29 }
 0x17f   :  { %v1362_v37 = vadd.f32 %v1361_v26, %v1338_v60  ;;  %v1294_v63 = vpop.f32.mrf.mxu0  ;;  %v1318_v1 = vpop.f32.mrf.mxu1  ;;  %v5455_v60 = vld [vmem:[%s6697_s6 + $0xd8] sm:$0xff] }
 0x180   :  { %v1295_v14 = vadd.f32 %v1294_v63, %v6136_v41  ;;  %v6232_v41 = vperm.slane %v6109_v27, 2  ;;  %1865 = vmatpush.bf16.msrb.mxu3 %v5455_v60  ;;  %v6261_v63 = vld [vmem:[%s6714_s26 + $0x8] sm:$0xff] }
 0x181   :  { %v1574_v9 = vmax.f32 %v1362_v37, 0.0 }
 0x182   :  { %v1319_v21 = vadd.f32 %v1318_v1, %v1295_v14 }
 0x183   :  { %v1590_v11 = vpack.c.bf16 %v1574_v9, %v1570_v7  ;;  %v4596_v7 = vld [vmem:[%s6698_s7 + $0x48] sm:$0xf]  ;;  %v5474_v9 = vld [vmem:[%s6698_s7 + $0x54] sm:$0xf0] }
 0x184   :  { %v1340_v5 = vpop.f32.mrf.mxu2  ;;  %v1364_v13 = vpop.f32.mrf.mxu3  ;;  %1866 = vmatpush.bf16.msrb.mxu3 %v5454_v62  ;;  %v4597_v2 = vor.u32 %v5474_v9, %v4596_v7  ;;  %v4582_v62 = vld [vmem:[%s6698_s7 + $0x38] sm:$0xf0] }
 0x185   :  { %1826 = vmatmul.bf16.gmra.mxu1 %v1590_v11  ;;  %v1341_v18 = vadd.f32 %v1340_v5, %v1317_v8  ;;  %v5470_v5 = vld [vmem:[%s6698_s7 + $0x34] sm:$0xf0] }
 0x186   :  { %2247 = vmatpush.bf16.msra.mxu2 %v4597_v2  ;;  %v4581_v14 = vor.u32 %v5470_v5, %v4580_v12 }
 0x187   :  { %v1378_v38 = vpop.f32.mrf.mxu0  ;;  %v1402_v42 = vpop.f32.mrf.mxu1  ;;  %v1365_v20 = vadd.f32 %v1364_v13, %v1341_v18  ;;  %v4564_v18 = vld [vmem:[%s6698_s7 + $0x8] sm:$0xf] }
 0x188   :  { %v1379_v40 = vadd.f32 %v1378_v38, %v6232_v41  ;;  %1867 = vmatpush.bf16.msrb.mxu3 %v5453_v10 }
 0x189   :  { %v1578_v35 = vmax.f32 %v1365_v20, 0.0  ;;  %v4565_v20 = vor.u32 %v5466_v30, %v4564_v18 }
 0x18a   :  { %1807 = vmatmul.bf16.gmra.mxu0 %v1593_v15  ;;  %v1403_v32 = vadd.f32 %v1402_v42, %v1379_v40  ;;  %2248 = vmatpush.bf16.msra.mxu2 %v4581_v14 }
 0x18c   :  { %v1342_v22 = vpop.f32.mrf.mxu2  ;;  %v1366_v33 = vpop.f32.mrf.mxu3 }
 0x18d   :  { %v1343_v31 = vadd.f32 %v1342_v22, %v1319_v21  ;;  %v5452_v22 = vld [vmem:[%s6697_s6 + $0xc0] sm:$0xff] }
 0x18e   :  { %1868 = vmatpush.bf16.msrb.mxu3 %v5452_v22  ;;  %2249 = vmatpush.bf16.msra.mxu2 %v4565_v20 }
 0x18f   :  { %v1367_v47 = vadd.f32 %v1366_v33, %v1343_v31  ;;  %v1380_v34 = vpop.f32.mrf.mxu0  ;;  %v1404_v16 = vpop.f32.mrf.mxu1 }
 0x190   :  { %v1381_v57 = vadd.f32 %v1380_v34, %v6232_v41 }
 0x191   :  { %v1582_v48 = vmax.f32 %v1367_v47, 0.0 }
 0x192   :  { %v1405_v52 = vadd.f32 %v1404_v16, %v1381_v57  ;;  %v6296_v16 = vld [vmem:[%s6714_s26 + $0x10] sm:$0xff] }
 0x193   :  { %v1594_v43 = vpack.c.bf16 %v1582_v48, %v1578_v35 }
 0x194   :  { %v1426_v44 = vpop.f32.mrf.mxu2  ;;  %v1450_v45 = vpop.f32.mrf.mxu3 }
 0x195   :  { %1831 = vmatmul.bf16.gmra.mxu1 %v1594_v43  ;;  %v1427_v49 = vadd.f32 %v1426_v44, %v1403_v32  ;;  %v5472_v44 = vld [vmem:[%s6698_s7 + $0x4c] sm:$0xf] }
 0x197   :  { %v1383_v46 = vpop.f32.mrf.mxu0  ;;  %v1407_v25 = vpop.f32.mrf.mxu1  ;;  %v1451_v54 = vadd.f32 %v1450_v45, %v1427_v49  ;;  %v4598_v45 = vld [vmem:[%s6698_s7 + $0x58] sm:$0xf0] }
 0x198   :  { %v1384_v26 = vadd.f32 %v1383_v46, %v6232_v41  ;;  %v4601_v32 = vor.u32 %v5472_v44, %v4598_v45  ;;  %v4728_v44 = vld [vmem:[#allocation5 + $0xe0] sm:$0xf]  ;;  %v5505_v45 = vld [vmem:[#allocation5 + $0xec] sm:$0xf0] }
 0x199   :  { %v1563_v56 = vmax.f32 %v1451_v54, 0.0 }
 0x19a   :  { %4602 = vmatmul.msk.bf16.vlgmr.msra.gmra.mxu0 %vm386_vm0, %v6241_v19  ;;  %v1408_v0 = vadd.f32 %v1407_v25, %v1384_v26  ;;  %2271 = vmatpush.bf16.msra.mxu3 %v4601_v32 }
 0x19c   :  { %v1428_v53 = vpop.f32.mrf.mxu2  ;;  %v1452_v24 = vpop.f32.mrf.mxu3 }
 0x19d   :  { %v1429_v29 = vadd.f32 %v1428_v53, %v1405_v52 }
 0x19f   :  { %v1453_v55 = vadd.f32 %v1452_v24, %v1429_v29  ;;  %v1385_v50 = vpop.f32.mrf.mxu0  ;;  %v1409_v51 = vpop.f32.mrf.mxu1 }
 0x1a0   :  { %v1386_v1 = vadd.f32 %v1385_v50, %v6232_v41 }
 0x1a1   :  { %v1567_v58 = vmax.f32 %v1453_v55, 0.0 }
 0x1a2   :  { %v1410_v39 = vadd.f32 %v1409_v51, %v1386_v1 }
 0x1a3   :  { %v1587_v61 = vpack.c.bf16 %v1567_v58, %v1563_v56 }
 0x1a4   :  { %v1431_v17 = vpop.f32.mrf.mxu2  ;;  %v1455_v37 = vpop.f32.mrf.mxu3 }
 0x1a5   :  { %1845 = vmatmul.bf16.vlgmr.msrb.gmra.mxu2 %v1587_v61  ;;  %4605 = vmatmul.msk.bf16.vlgmr.msra.gmra.mxu1 %vm386_vm0, %v6241_v19  ;;  %v1432_v28 = vadd.f32 %v1431_v17, %v1408_v0  ;;  %v5468_v61 = vld [vmem:[%s6698_s7 + $0x2c] sm:$0xf] }
 0x1a6   :  { %v4585_v17 = vor.u32 %v5468_v61, %v4582_v62  ;;  %v5537_v61 = vld [vmem:[#allocation5 + $0x1ec] sm:$0xf0] }
 0x1a7   :  { %v1388_v4 = vpop.f32.mrf.mxu0  ;;  %v1412_v6 = vpop.f32.mrf.mxu1  ;;  %v1456_v13 = vadd.f32 %v1455_v37, %v1432_v28 }
 0x1a8   :  { %v1389_v31 = vadd.f32 %v1388_v4, %v6232_v41  ;;  %2272 = vmatpush.bf16.msra.mxu3 %v4585_v17 }
 0x1a9   :  { %v1571_v21 = vmax.f32 %v1456_v13, 0.0  ;;  %v5464_v13 = vld [vmem:[%s6698_s7 + $0xc] sm:$0xf] }
 0x1aa   :  { %4603 = vmatmul.msk.bf16.gmra.mxu0 %vm386_vm0, %v6261_v63  ;;  %v1413_v35 = vadd.f32 %v1412_v6, %v1389_v31 }
 0x1ac   :  { %v1433_v11 = vpop.f32.mrf.mxu2  ;;  %v1457_v8 = vpop.f32.mrf.mxu3 }
 0x1ad   :  { %v1434_v3 = vadd.f32 %v1433_v11, %v1410_v39 }
 0x1af   :  { %v1458_v38 = vadd.f32 %v1457_v8, %v1434_v3  ;;  %v1390_v42 = vpop.f32.mrf.mxu0  ;;  %v1414_v15 = vpop.f32.mrf.mxu1  ;;  %v4566_v3 = vld [vmem:[%s6698_s7 + $0x18] sm:$0xf0] }
 0x1b0   :  { %v1391_v48 = vadd.f32 %v1390_v42, %v6232_v41  ;;  %v4569_v14 = vor.u32 %v5464_v13, %v4566_v3  ;;  %v4824_v13 = vld [vmem:[#allocation5 + $0x1a0] sm:$0xf]  ;;  %v5529_v3 = vld [vmem:[#allocation5 + $0x1ac] sm:$0xf0] }
 0x1b1   :  { %v1575_v23 = vmax.f32 %v1458_v38, 0.0 }
 0x1b2   :  { %v1415_v57 = vadd.f32 %v1414_v15, %v1391_v48  ;;  %2273 = vmatpush.bf16.msra.mxu3 %v4569_v14 }
 0x1b3   :  { %v1591_v33 = vpack.c.bf16 %v1575_v23, %v1571_v21 }
 0x1b4   :  { %v1436_v47 = vpop.f32.mrf.mxu2  ;;  %v1460_v34 = vpop.f32.mrf.mxu3 }
 0x1b5   :  { %1850 = vmatmul.bf16.gmra.mxu2 %v1591_v33  ;;  %4606 = vmatmul.msk.bf16.gmra.mxu1 %vm386_vm0, %v6261_v63  ;;  %v1437_v43 = vadd.f32 %v1436_v47, %v1413_v35 }
 0x1b7   :  { %v1474_v36 = vpop.f32.mrf.mxu0  ;;  %v1498_v40 = vpop.f32.mrf.mxu1  ;;  %v1461_v25 = vadd.f32 %v1460_v34, %v1437_v43 }
 0x1b8   :  { %v1475_v55 = vadd.f32 %v1474_v36, %v6308_v59 }
 0x1b9   :  { %v1579_v54 = vmax.f32 %v1461_v25, 0.0  ;;  %v4729_v25 = vor.u32 %v5505_v45, %v4728_v44  ;;  %v4776_v44 = vld [vmem:[#allocation5 + $0x140] sm:$0xf]  ;;  %v5517_v45 = vld [vmem:[#allocation5 + $0x14c] sm:$0xf0] }
 0x1ba   :  { %4604 = vmatmul.msk.bf16.gmra.mxu0 %vm386_vm0, %v6296_v16  ;;  %v1499_v58 = vadd.f32 %v1498_v40, %v1475_v55 }
 0x1bb   :  { %2975 = vmatpush.bf16.msrb.mxu0 %v4729_v25  ;;  %v5513_v25 = vld [vmem:[#allocation5 + $0x12c] sm:$0xf0] }
 0x1bc   :  { %v1438_v46 = vpop.f32.mrf.mxu2  ;;  %v1462_v49 = vpop.f32.mrf.mxu3 }
 0x1bd   :  { %v1439_v41 = vadd.f32 %v1438_v46, %v1415_v57 }
 0x1bf   :  { %v1463_v52 = vadd.f32 %v1462_v49, %v1439_v41  ;;  %v1476_v53 = vpop.f32.mrf.mxu0  ;;  %v1500_v24 = vpop.f32.mrf.mxu1 }
 0x1c0   :  { %v1477_v60 = vadd.f32 %v1476_v53, %v6308_v59  ;;  %v5501_v53 = vld [vmem:[#allocation5 + $0xcc] sm:$0xf0] }
 0x1c1   :  { %v1583_v29 = vmax.f32 %v1463_v52, 0.0  ;;  %v4712_v52 = vld [vmem:[#allocation5 + $0xc0] sm:$0xf] }
 0x1c2   :  { %v1501_v37 = vadd.f32 %v1500_v24, %v1477_v60 }
 0x1c3   :  { %v1595_v50 = vpack.c.bf16 %v1583_v29, %v1579_v54  ;;  %v4713_v29 = vor.u32 %v5501_v53, %v4712_v52  ;;  %v4744_v52 = vld [vmem:[#allocation5 + $0x100] sm:$0xf]  ;;  %v5509_v53 = vld [vmem:[#allocation5 + $0x10c] sm:$0xf0] }
 0x1c4   :  { %v1522_v51 = vpop.f32.mrf.mxu2  ;;  %v1546_v56 = vpop.f32.mrf.mxu3 }
 0x1c5   :  { %1855 = vmatmul.bf16.gmra.mxu2 %v1595_v50  ;;  %4607 = vmatmul.msk.bf16.gmra.mxu1 %vm386_vm0, %v6296_v16  ;;  %v1523_v27 = vadd.f32 %v1522_v51, %v1499_v58  ;;  %v5497_v58 = vld [vmem:[#allocation5 + $0xac] sm:$0xf0] }
 0x1c6   :  { %2976 = vmatpush.bf16.msrb.mxu0 %v4713_v29 }
 0x1c7   :  { %v1479_v26 = vpop.f32.mrf.mxu0  ;;  %v1503_v0 = vpop.f32.mrf.mxu1  ;;  %v1547_v4 = vadd.f32 %v1546_v56, %v1523_v27  ;;  %v4696_v56 = vld [vmem:[#allocation5 + $0xa0] sm:$0xf] }
 0x1c8   :  { %v1480_v39 = vadd.f32 %v1479_v26, %v6308_v59  ;;  %v4856_v27 = vld [vmem:[#allocation5 + $0x1e0] sm:$0xf] }
 0x1c9   :  { %v1564_v2 = vmax.f32 %v1547_v4, 0.0  ;;  %v5493_v4 = vld [vmem:[#allocation5 + $0x8c] sm:$0xf0] }
 0x1ca   :  { %v1504_v38 = vadd.f32 %v1503_v0, %v1480_v39  ;;  %v4664_v39 = vld [vmem:[#allocation5 + $0x60] sm:$0xf] }
 0x1cc   :  { %v1524_v1 = vpop.f32.mrf.mxu2  ;;  %v1548_v7 = vpop.f32.mrf.mxu3 }
 0x1cd   :  { %v1525_v6 = vadd.f32 %v1524_v1, %v1501_v37  ;;  %v4857_v37 = vor.u32 %v5537_v61, %v4856_v27  ;;  %v4680_v1 = vld [vmem:[#allocation5 + $0x80] sm:$0xf]  ;;  %v5499_v27 = vld [vmem:[#allocation5 + $0xc4] sm:$0xf]  ;;  %v4714_v61 = vld [vmem:[#allocation5 + $0xd0] sm:$0xf0] }
 0x1cf   :  { %v1549_v9 = vadd.f32 %v1548_v7, %v1525_v6  ;;  %v1481_v28 = vpop.f32.mrf.mxu0  ;;  %v1505_v8 = vpop.f32.mrf.mxu1  ;;  %2999 = vmatpush.bf16.msrb.mxu1 %v4857_v37  ;;  %v4698_v37 = vld [vmem:[#allocation5 + $0xb0] sm:$0xf0] }
 0x1d0   :  { %v1482_v42 = vadd.f32 %v1481_v28, %v6308_v59  ;;  %v4840_v28 = vld [vmem:[#allocation5 + $0x1c0] sm:$0xf] }
 0x1d1   :  { %v1568_v10 = vmax.f32 %v1549_v9, 0.0  ;;  %v4681_v9 = vor.u32 %v5493_v4, %v4680_v1 }
 0x1d2   :  { %v1506_v30 = vadd.f32 %v1505_v8, %v1482_v42  ;;  %v4825_v8 = vor.u32 %v5529_v3, %v4824_v13  ;;  %v5485_v42 = vld [vmem:[#allocation5 + $0x4c] sm:$0xf0] }
 0x1d3   :  { %v1588_v11 = vpack.c.bf16 %v1568_v10, %v1564_v2  ;;  %v5533_v2 = vld [vmem:[#allocation5 + $0x1cc] sm:$0xf0] }
 0x1d4   :  { %v1527_v12 = vpop.f32.mrf.mxu2  ;;  %v1551_v5 = vpop.f32.mrf.mxu3  ;;  %v4841_v10 = vor.u32 %v5533_v2, %v4840_v28  ;;  %v4858_v28 = vld [vmem:[#allocation5 + $0x1f0] sm:$0xf0] }
 0x1d5   :  { %1869 = vmatmul.bf16.vlgmr.msrb.gmra.mxu3 %v1588_v11  ;;  %4608 = vmatmul.msk.bf16.vlgmr.msra.gmra.mxu2 %vm386_vm0, %v6241_v19  ;;  %v1528_v18 = vadd.f32 %v1527_v12, %v1504_v38  ;;  %v5489_v11 = vld [vmem:[#allocation5 + $0x6c] sm:$0xf0]  ;;  %v4648_v38 = vld [vmem:[#allocation5 + $0x40] sm:$0xf] }
 0x1d6   :  { %3000 = vmatpush.bf16.msrb.mxu1 %v4841_v10 }
 0x1d7   :  { %v1484_v15 = vpop.f32.mrf.mxu0  ;;  %v1552_v23 = vadd.f32 %v1551_v5, %v1528_v18  ;;  %v1508_v47 = vpop.f32.mrf.mxu1  ;;  %v4665_v5 = vor.u32 %v5489_v11, %v4664_v39  ;;  %v4808_v18 = vld [vmem:[#allocation5 + $0x180] sm:$0xf]  ;;  %v5491_v11 = vld [vmem:[#allocation5 + $0x84] sm:$0xf] }
 0x1d8   :  { %v1485_v48 = vadd.f32 %v1484_v15, %v6308_v59  ;;  %v4649_v15 = vor.u32 %v5485_v42, %v4648_v38  ;;  %v4842_v38 = vld [vmem:[#allocation5 + $0x1d0] sm:$0xf0] }
 0x1d9   :  { %v1572_v34 = vmax.f32 %v1552_v23, 0.0  ;;  %v4632_v23 = vld [vmem:[#allocation5 + $0x20] sm:$0xf] }
 0x1da   :  { %v1509_v32 = vadd.f32 %v1508_v47, %v1485_v48  ;;  %3001 = vmatpush.bf16.msrb.mxu1 %v4825_v8  ;;  %v5521_v47 = vld [vmem:[#allocation5 + $0x16c] sm:$0xf0]  ;;  %v4616_v48 = vld [vmem:[#allocation5] sm:$0xf]  ;;  %v5531_v8 = vld [vmem:[#allocation5 + $0x1c4] sm:$0xf] }
 0x1db   :  { %v4845_v42 = vor.u32 %v5531_v8, %v4842_v38  ;;  %v4778_v38 = vld [vmem:[#allocation5 + $0x150] sm:$0xf0] }
 0x1dc   :  { %v1529_v21 = vpop.f32.mrf.mxu2  ;;  %v1553_v20 = vpop.f32.mrf.mxu3 }
 0x1dd   :  { %v1530_v22 = vadd.f32 %v1529_v21, %v1506_v30  ;;  %v5525_v30 = vld [vmem:[#allocation5 + $0x18c] sm:$0xf0] }
 0x1de   :  { %v4809_v21 = vor.u32 %v5525_v30, %v4808_v18  ;;  %v5569_v18 = vld [vmem:[#allocation5 + $0x2ec] sm:$0xf0]  ;;  %v5487_v30 = vld [vmem:[#allocation5 + $0x64] sm:$0xf] }
 0x1df   :  { %v1554_v31 = vadd.f32 %v1553_v20, %v1530_v22  ;;  %v1486_v33 = vpop.f32.mrf.mxu0  ;;  %v1510_v49 = vpop.f32.mrf.mxu1  ;;  %v5481_v22 = vld [vmem:[#allocation5 + $0x2c] sm:$0xf0] }
 0x1e0   :  { %v1487_v57 = vadd.f32 %v1486_v33, %v6308_v59  ;;  %v4697_v59 = vor.u32 %v5497_v58, %v4696_v56  ;;  %3002 = vmatpush.bf16.msrb.mxu1 %v4809_v21  ;;  %v4792_v33 = vld [vmem:[#allocation5 + $0x160] sm:$0xf] }
 0x1e1   :  { %v1576_v35 = vmax.f32 %v1554_v31, 0.0  ;;  %v4633_v31 = vor.u32 %v5481_v22, %v4632_v23 }
 0x1e2   :  { %v1511_v54 = vadd.f32 %v1510_v49, %v1487_v57  ;;  %2977 = vmatpush.bf16.msrb.mxu0 %v4697_v59 }
 0x1e3   :  { %v1592_v36 = vpack.c.bf16 %v1576_v35, %v1572_v34  ;;  %v4793_v34 = vor.u32 %v5521_v47, %v4792_v33 }
 0x1e4   :  { %v1532_v40 = vpop.f32.mrf.mxu2  ;;  %v1556_v43 = vpop.f32.mrf.mxu3 }
 0x1e5   :  { %1874 = vmatmul.bf16.gmra.mxu3 %v1592_v36  ;;  %4609 = vmatmul.msk.bf16.gmra.mxu2 %vm386_vm0, %v6261_v63  ;;  %v1533_v41 = vadd.f32 %v1532_v40, %v1509_v32  ;;  %v5477_v36 = vld [vmem:[#allocation5 + $0xc] sm:$0xf0]  ;;  %v4777_v32 = vor.u32 %v5517_v45, %v4776_v44 }
 0x1e6   :  { %2978 = vmatpush.bf16.msrb.mxu0 %v4681_v9  ;;  %3003 = vmatpush.bf16.msrb.mxu1 %v4793_v34  ;;  %v5535_v9 = vld [vmem:[#allocation5 + $0x1e4] sm:$0xf]  ;;  %v5565_v44 = vld [vmem:[#allocation5 + $0x2cc] sm:$0xf0] }
 0x1e7   :  { %v1798_v46 = vpop.f32.mrf.mxu0  ;;  %v1557_v55 = vadd.f32 %v1556_v43, %v1533_v41  ;;  %v4617_v43 = vor.u32 %v5477_v36, %v4616_v48  ;;  %v4861_v2 = vor.u32 %v5535_v9, %v4858_v28  ;;  %v5527_v34 = vld [vmem:[#allocation5 + $0x1a4] sm:$0xf]  ;;  %v4936_v9 = vld [vmem:[#allocation5 + $0x280] sm:$0xf]  ;;  %v5557_v28 = vld [vmem:[#allocation5 + $0x28c] sm:$0xf0] }
 0x1e9   :  { %v1580_v62 = vmax.f32 %v1557_v55, 0.0 }
 0x1ea   :  { %2979 = vmatpush.bf16.msrb.mxu0 %v4665_v5  ;;  %3004 = vmatpush.bf16.msrb.mxu1 %v4777_v32 }
 0x1ec   :  { %v1534_v24 = vpop.f32.mrf.mxu2  ;;  %v1558_v51 = vpop.f32.mrf.mxu3 }
 0x1ed   :  { %v1535_v50 = vadd.f32 %v1534_v24, %v1511_v54  ;;  %v4745_v54 = vor.u32 %v5509_v53, %v4744_v52  ;;  %v5523_v53 = vld [vmem:[#allocation5 + $0x184] sm:$0xf] }
 0x1ee   :  { %2980 = vmatpush.bf16.msrb.mxu0 %v4649_v15  ;;  %v4984_v15 = vld [vmem:[#allocation5 + $0x2e0] sm:$0xf] }
 0x1ef   :  { %v1559_v60 = vadd.f32 %v1558_v51, %v1535_v50  ;;  %v6334_v26 = vpop.f32.mrf.mxu0  ;;  %v5503_v50 = vld [vmem:[#allocation5 + $0xe4] sm:$0xf]  ;;  %v4730_v51 = vld [vmem:[#allocation5 + $0xf0] sm:$0xf0]  ;;  %v4985_v22 = vor.u32 %v5569_v18, %v4984_v15  ;;  %v4920_v18 = vld [vmem:[#allocation5 + $0x260] sm:$0xf] }
 0x1f0   :  { %v4733_v58 = vor.u32 %v5503_v50, %v4730_v51  ;;  %v4952_v50 = vld [vmem:[#allocation5 + $0x2a0] sm:$0xf]  ;;  %v5561_v51 = vld [vmem:[#allocation5 + $0x2ac] sm:$0xf0] }
 0x1f1   :  { %v1584_v17 = vmax.f32 %v1559_v60, 0.0  ;;  %3023 = vmatpush.bf16.msrb.mxu2 %v4985_v22 }
 0x1f2   :  { %v1822_v0 = vpop.f32.mrf.mxu1  ;;  %2981 = vmatpush.bf16.msrb.mxu0 %v4633_v31  ;;  %v4666_v31 = vld [vmem:[#allocation5 + $0x70] sm:$0xf0] }
 0x1f3   :  { %v6336_v6 = vadd.f32 %v1822_v0, %v1798_v46  ;;  %v1596_v7 = vpack.c.bf16 %v1584_v17, %v1580_v62  ;;  %v4760_v46 = vld [vmem:[#allocation5 + $0x120] sm:$0xf]  ;;  %v4717_v62 = vor.u32 %v5499_v27, %v4714_v61  ;;  %v5495_v17 = vld [vmem:[#allocation5 + $0xa4] sm:$0xf]  ;;  %v4669_v47 = vor.u32 %v5487_v30, %v4666_v31  ;;  %v5553_v30 = vld [vmem:[#allocation5 + $0x26c] sm:$0xf0] }
 0x1f4   :  { %v4761_v41 = vor.u32 %v5513_v25, %v4760_v46  ;;  %v4701_v1 = vor.u32 %v5495_v17, %v4698_v37  ;;  %v5483_v46 = vld [vmem:[#allocation5 + $0x44] sm:$0xf]  ;;  %v4650_v25 = vld [vmem:[#allocation5 + $0x50] sm:$0xf0]  ;;  %v4953_v61 = vor.u32 %v5561_v51, %v4952_v50  ;;  %v4921_v22 = vor.u32 %v5553_v30, %v4920_v18  ;;  %v5096_v18 = vld [vmem:[#allocation5 + $0x3c0] sm:$0xf] }
 0x1f5   :  { %1879 = vmatmul.bf16.gmra.mxu3 %v1596_v7  ;;  %4610 = vmatmul.msk.bf16.gmra.mxu2 %vm386_vm0, %v6296_v16  ;;  %v4653_v52 = vor.u32 %v5483_v46, %v4650_v25  ;;  %v4746_v46 = vld [vmem:[#allocation5 + $0x110] sm:$0xf0]  ;;  %v5597_v30 = vld [vmem:[#allocation5 + $0x3cc] sm:$0xf0] }
 0x1f6   :  { %2982 = vmatpush.bf16.msrb.mxu0 %v4617_v43  ;;  %3005 = vmatpush.bf16.msrb.mxu1 %v4761_v41  ;;  %v4968_v43 = vld [vmem:[#allocation5 + $0x2c0] sm:$0xf] }
 0x1f7   :  { %v1803_v12 = vpop.f32.mrf.mxu0 }
 0x1fa   :  { %v6340_v14 = vpop.f32.mrf.mxu1  ;;  %3006 = vmatpush.bf16.msrb.mxu1 %v4745_v54  ;;  %3071 = vmatpush.bf16.msra.mxu0 %v4733_v58  ;;  %v4810_v54 = vld [vmem:[#allocation5 + $0x190] sm:$0xf0] }
 0x1fe   :  { %3072 = vmatpush.bf16.msra.mxu0 %v4717_v62  ;;  %3095 = vmatpush.bf16.msra.mxu1 %v4861_v2  ;;  %v4634_v62 = vld [vmem:[#allocation5 + $0x30] sm:$0xf0]  ;;  %v5475_v2 = vld [vmem:[#allocation5 + $0x4] sm:$0xf] }
 0x1ff   :  { %v6342_v20 = vpop.f32.mrf.mxu0 }
 0x202   :  { %v1827_v35 = vpop.f32.mrf.mxu1  ;;  %3073 = vmatpush.bf16.msra.mxu0 %v4701_v1  ;;  %3096 = vmatpush.bf16.msra.mxu1 %v4845_v42  ;;  %v5519_v1 = vld [vmem:[#allocation5 + $0x164] sm:$0xf] }
 0x203   :  { %v6344_v40 = vadd.f32 %v1827_v35, %v1803_v12  ;;  %v4682_v12 = vld [vmem:[#allocation5 + $0x90] sm:$0xf0] }
 0x204   :  { %v4685_v13 = vor.u32 %v5491_v11, %v4682_v12  ;;  %v4826_v35 = vld [vmem:[#allocation5 + $0x1b0] sm:$0xf0]  ;;  %v4937_v11 = vor.u32 %v5557_v28, %v4936_v9  ;;  %v5112_v9 = vld [vmem:[#allocation5 + $0x3e0] sm:$0xf]  ;;  %v5601_v28 = vld [vmem:[#allocation5 + $0x3ec] sm:$0xf0] }
 0x205   :  { %4611 = vmatmul.msk.bf16.vlgmr.msra.gmra.mxu3 %vm386_vm0, %v6241_v19  ;;  %v6359_v19 = vld [vmem:[%s6699_s8] sm:$0xf]  ;;  %v4618_v12 = vld [vmem:[#allocation5 + $0x10] sm:$0xf0] }
 0x206   :  { %v6362_v60 = vperm.slane %v6359_v19, 0  ;;  %v6369_v5 = vperm.slane %v6359_v19, 1  ;;  %3074 = vmatpush.bf16.msra.mxu0 %v4685_v13  ;;  %v5515_v13 = vld [vmem:[#allocation5 + $0x144] sm:$0xf]  ;;  %v4621_v8 = vor.u32 %v5475_v2, %v4618_v12  ;;  %v4720_v12 = vld [vmem:[#allocation5 + $0xc8] sm:$0xf] }
 0x207   :  { %v1808_v57 = vpop.f32.mrf.mxu0  ;;  %v4781_v15 = vor.u32 %v5515_v13, %v4778_v38  ;;  %v5502_v13 = vld [vmem:[#allocation5 + $0xd4] sm:$0xf0] }
 0x20a   :  { %v6348_v49 = vpop.f32.mrf.mxu1  ;;  %3075 = vmatpush.bf16.msra.mxu0 %v4669_v47  ;;  %v4762_v47 = vld [vmem:[#allocation5 + $0x130] sm:$0xf0] }
 0x20e   :  { %3076 = vmatpush.bf16.msra.mxu0 %v4653_v52 }
 0x20f   :  { %v6350_v29 = vpop.f32.mrf.mxu0 }
 0x212   :  { %v1832_v24 = vpop.f32.mrf.mxu1 }
 0x213   :  { %v6352_v55 = vadd.f32 %v1832_v24, %v1808_v57  ;;  %v4969_v57 = vor.u32 %v5565_v44, %v4968_v43  ;;  %v4813_v24 = vor.u32 %v5523_v53, %v4810_v54  ;;  %v5549_v43 = vld [vmem:[#allocation5 + $0x24c] sm:$0xf0]  ;;  %v4888_v53 = vld [vmem:[#allocation5 + $0x220] sm:$0xf] }
 0x215   :  { %4612 = vmatmul.msk.bf16.gmra.mxu3 %vm386_vm0, %v6261_v63  ;;  %3024 = vmatpush.bf16.msrb.mxu2 %v4969_v57  ;;  %v5507_v57 = vld [vmem:[#allocation5 + $0x104] sm:$0xf] }
 0x217   :  { %v2203_v56 = vpop.f32.mrf.mxu0 }
 0x218   :  { %v2204_v63 = vadd.f32 %v2203_v56, %v6362_v60  ;;  %v5479_v56 = vld [vmem:[#allocation5 + $0x24] sm:$0xf] }
 0x219   :  { %3025 = vmatpush.bf16.msrb.mxu2 %v4953_v61 }
 0x21a   :  { %v6364_v59 = vpop.f32.mrf.mxu1  ;;  %v2290_v4 = vmax.f32 %v2204_v63, 0.0 }
 0x21d   :  { %3026 = vmatpush.bf16.msrb.mxu2 %v4937_v11 }
 0x21f   :  { %v2205_v0 = vpop.f32.mrf.mxu0 }
 0x220   :  { %v2206_v7 = vadd.f32 %v2205_v0, %v6362_v60  ;;  %v4637_v0 = vor.u32 %v5479_v56, %v4634_v62  ;;  %v4872_v62 = vld [vmem:[#allocation5 + $0x200] sm:$0xf] }
 0x221   :  { %3027 = vmatpush.bf16.msrb.mxu2 %v4921_v22  ;;  %v4704_v22 = vld [vmem:[#allocation5 + $0xa8] sm:$0xf] }
 0x222   :  { %v2294_v10 = vmax.f32 %v2206_v7, 0.0  ;;  %v2227_v39 = vpop.f32.mrf.mxu1  ;;  %3077 = vmatpush.bf16.msra.mxu0 %v4637_v0 }
 0x223   :  { %v2228_v21 = vadd.f32 %v2227_v39, %v6369_v5 }
 0x224   :  { %v6371_v3 = vpack.c.bf16 %v2294_v10, %v2290_v4  ;;  %v4794_v4 = vld [vmem:[#allocation5 + $0x170] sm:$0xf0] }
 0x225   :  { %4613 = vmatmul.msk.bf16.gmra.mxu3 %vm386_vm0, %v6296_v16  ;;  %v4829_v16 = vor.u32 %v5527_v34, %v4826_v35  ;;  %v2291_v45 = vmax.f32 %v2228_v21, 0.0  ;;  %v4797_v7 = vor.u32 %v5519_v1, %v4794_v4  ;;  %v4736_v1 = vld [vmem:[#allocation5 + $0xe8] sm:$0xf]  ;;  %v5506_v4 = vld [vmem:[#allocation5 + $0xf4] sm:$0xf0] }
 0x226   :  { %2983 = vmatmul.bf16.vlgmr.msrb.gmra.mxu0 %v6371_v3 }
 0x227   :  { %v2208_v23 = vpop.f32.mrf.mxu0  ;;  %3097 = vmatpush.bf16.msra.mxu1 %v4829_v16  ;;  %3078 = vmatpush.bf16.msra.mxu0 %v4621_v8 }
 0x228   :  { %v1846_v33 = vpop.f32.mrf.mxu2  ;;  %v2209_v41 = vadd.f32 %v2208_v23, %v6362_v60 }
 0x229   :  { %v6378_v48 = vadd.f32 %v1846_v33, %v6336_v6  ;;  %v5511_v33 = vld [vmem:[#allocation5 + $0x124] sm:$0xf] }
 0x22a   :  { %v2229_v36 = vpop.f32.mrf.mxu1  ;;  %v2298_v63 = vmax.f32 %v2209_v41, 0.0  ;;  %v4765_v35 = vor.u32 %v5511_v33, %v4762_v47  ;;  %v4749_v41 = vor.u32 %v5507_v57, %v4746_v46  ;;  %v5080_v57 = vld [vmem:[#allocation5 + $0x3a0] sm:$0xf]  ;;  %v5593_v46 = vld [vmem:[#allocation5 + $0x3ac] sm:$0xf0] }
 0x22b   :  { %v2230_v32 = vadd.f32 %v2229_v36, %v6369_v5  ;;  %3098 = vmatpush.bf16.msra.mxu1 %v4813_v24  ;;  %v4904_v36 = vld [vmem:[#allocation5 + $0x240] sm:$0xf] }
 0x22d   :  { %v2295_v6 = vmax.f32 %v2230_v32, 0.0  ;;  %v4905_v32 = vor.u32 %v5549_v43, %v4904_v36  ;;  %v4688_v36 = vld [vmem:[#allocation5 + $0x88] sm:$0xf]  ;;  %v5494_v43 = vld [vmem:[#allocation5 + $0x94] sm:$0xf0] }
 0x22f   :  { %v6382_v58 = vpack.c.bf16 %v2295_v6, %v2291_v45  ;;  %v2210_v27 = vpop.f32.mrf.mxu0  ;;  %3099 = vmatpush.bf16.msra.mxu1 %v4797_v7  ;;  %3028 = vmatpush.bf16.msrb.mxu2 %v4905_v32  ;;  %v5534_v32 = vld [vmem:[#allocation5 + $0x1d4] sm:$0xf0] }
 0x230   :  { %v6384_v17 = vpop.f32.mrf.mxu2  ;;  %v2211_v37 = vadd.f32 %v2210_v27, %v6362_v60 }
 0x231   :  { %3007 = vmatmul.bf16.vlgmr.msrb.gmra.mxu1 %v6382_v58 }
 0x232   :  { %v2302_v10 = vmax.f32 %v2211_v37, 0.0  ;;  %v2232_v39 = vpop.f32.mrf.mxu1 }
 0x233   :  { %v2233_v21 = vadd.f32 %v2232_v39, %v6369_v5  ;;  %3100 = vmatpush.bf16.msra.mxu1 %v4781_v15  ;;  %v4721_v15 = vor.u32 %v5502_v13, %v4720_v12  ;;  %v4816_v12 = vld [vmem:[#allocation5 + $0x188] sm:$0xf]  ;;  %v5526_v13 = vld [vmem:[#allocation5 + $0x194] sm:$0xf0] }
 0x234   :  { %v6388_v42 = vpack.c.bf16 %v2302_v10, %v2298_v63  ;;  %v5541_v63 = vld [vmem:[#allocation5 + $0x20c] sm:$0xf0]  ;;  %v5113_v10 = vor.u32 %v5601_v28, %v5112_v9  ;;  %v4656_v9 = vld [vmem:[#allocation5 + $0x48] sm:$0xf]  ;;  %v5064_v28 = vld [vmem:[#allocation5 + $0x380] sm:$0xf] }
 0x235   :  { %v2299_v44 = vmax.f32 %v2233_v21, 0.0  ;;  %v4873_v37 = vor.u32 %v5541_v63, %v4872_v62  ;;  %v5097_v21 = vor.u32 %v5597_v30, %v5096_v18  ;;  %v5530_v62 = vld [vmem:[#allocation5 + $0x1b4] sm:$0xf0]  ;;  %v5585_v18 = vld [vmem:[#allocation5 + $0x36c] sm:$0xf0] }
 0x236   :  { %2988 = vmatmul.bf16.gmra.mxu0 %v6388_v42  ;;  %3047 = vmatpush.bf16.msrb.mxu3 %v5113_v10 }
 0x237   :  { %v2213_v23 = vpop.f32.mrf.mxu0  ;;  %3101 = vmatpush.bf16.msra.mxu1 %v4765_v35  ;;  %v4864_v35 = vld [vmem:[#allocation5 + $0x1e8] sm:$0xf] }
 0x238   :  { %v1851_v31 = vpop.f32.mrf.mxu2  ;;  %v2214_v25 = vadd.f32 %v2213_v23, %v6362_v60 }
 0x239   :  { %v6393_v34 = vadd.f32 %v1851_v31, %v6344_v40  ;;  %v5545_v40 = vld [vmem:[#allocation5 + $0x22c] sm:$0xf0]  ;;  %v5498_v31 = vld [vmem:[#allocation5 + $0xb4] sm:$0xf0] }
 0x23a   :  { %v2234_v16 = vpop.f32.mrf.mxu1  ;;  %v4889_v24 = vor.u32 %v5545_v40, %v4888_v53  ;;  %v2306_v50 = vmax.f32 %v2214_v25, 0.0  ;;  %3048 = vmatpush.bf16.msrb.mxu3 %v5097_v21  ;;  %v4986_v53 = vld [vmem:[#allocation5 + $0x2f0] sm:$0xf0]  ;;  %v4672_v40 = vld [vmem:[#allocation5 + $0x68] sm:$0xf] }
 0x23b   :  { %v2235_v45 = vadd.f32 %v2234_v16, %v6369_v5  ;;  %3102 = vmatpush.bf16.msra.mxu1 %v4749_v41  ;;  %v5538_v16 = vld [vmem:[#allocation5 + $0x1f4] sm:$0xf0]  ;;  %v5081_v41 = vor.u32 %v5593_v46, %v5080_v57  ;;  %v5559_v21 = vld [vmem:[#allocation5 + $0x2a4] sm:$0xf]  ;;  %v4938_v46 = vld [vmem:[#allocation5 + $0x290] sm:$0xf0] }
 0x23c   :  { %3029 = vmatpush.bf16.msrb.mxu2 %v4889_v24  ;;  %v5490_v24 = vld [vmem:[#allocation5 + $0x74] sm:$0xf0]  ;;  %v5555_v57 = vld [vmem:[#allocation5 + $0x284] sm:$0xf] }
 0x23d   :  { %v2303_v52 = vmax.f32 %v2235_v45, 0.0  ;;  %v4848_v45 = vld [vmem:[#allocation5 + $0x1c8] sm:$0xf] }
 0x23e   :  { %v4849_v25 = vor.u32 %v5534_v32, %v4848_v45  ;;  %3049 = vmatpush.bf16.msrb.mxu3 %v5081_v41 }
 0x23f   :  { %v6397_v54 = vpack.c.bf16 %v2303_v52, %v2299_v44  ;;  %v2215_v6 = vpop.f32.mrf.mxu0  ;;  %v4689_v44 = vor.u32 %v5494_v43, %v4688_v36  ;;  %v5567_v52 = vld [vmem:[#allocation5 + $0x2e4] sm:$0xf]  ;;  %v4800_v36 = vld [vmem:[#allocation5 + $0x168] sm:$0xf]  ;;  %v5522_v43 = vld [vmem:[#allocation5 + $0x174] sm:$0xf0] }
 0x240   :  { %v6399_v51 = vpop.f32.mrf.mxu2  ;;  %v2216_v56 = vadd.f32 %v2215_v6, %v6362_v60  ;;  %3030 = vmatpush.bf16.msrb.mxu2 %v4873_v37  ;;  %v4737_v60 = vor.u32 %v5506_v4, %v4736_v1  ;;  %v4989_v6 = vor.u32 %v5567_v52, %v4986_v53  ;;  %v6421_v37 = vperm.slane %v6359_v19, 2  ;;  %v5563_v4 = vld [vmem:[#allocation5 + $0x2c4] sm:$0xf]  ;;  %v5478_v53 = vld [vmem:[#allocation5 + $0x14] sm:$0xf0] }
 0x241   :  { %3012 = vmatmul.bf16.gmra.mxu1 %v6397_v54  ;;  %v4801_v32 = vor.u32 %v5522_v43, %v4800_v36  ;;  %v4941_v52 = vor.u32 %v5555_v57, %v4938_v46  ;;  %v5000_v43 = vld [vmem:[#allocation5 + $0x300] sm:$0xf]  ;;  %v4874_v46 = vld [vmem:[#allocation5 + $0x210] sm:$0xf0] }
 0x242   :  { %v2310_v27 = vmax.f32 %v2216_v56, 0.0  ;;  %v2237_v61 = vpop.f32.mrf.mxu1  ;;  %3167 = vmatpush.bf16.msrb.mxu0 %v4737_v60  ;;  %v5589_v60 = vld [vmem:[#allocation5 + $0x38c] sm:$0xf0] }
 0x243   :  { %v2238_v7 = vadd.f32 %v2237_v61, %v6369_v5  ;;  %v4832_v61 = vld [vmem:[#allocation5 + $0x1a8] sm:$0xf]  ;;  %v5065_v10 = vor.u32 %v5589_v60, %v5064_v28 }
 0x244   :  { %v6403_v0 = vpack.c.bf16 %v2310_v27, %v2306_v50  ;;  %v4673_v27 = vor.u32 %v5490_v24, %v4672_v40  ;;  %3119 = vmatpush.bf16.msra.mxu2 %v4989_v6  ;;  %v4833_v1 = vor.u32 %v5530_v62, %v4832_v61  ;;  %v4784_v6 = vld [vmem:[#allocation5 + $0x148] sm:$0xf]  ;;  %v5518_v24 = vld [vmem:[#allocation5 + $0x154] sm:$0xf0] }
 0x245   :  { %v2307_v8 = vmax.f32 %v2238_v7, 0.0  ;;  %v4970_v7 = vld [vmem:[#allocation5 + $0x2d0] sm:$0xf0]  ;;  %3050 = vmatpush.bf16.msrb.mxu3 %v5065_v10  ;;  %v4785_v61 = vor.u32 %v5518_v24, %v4784_v6  ;;  %v4768_v60 = vld [vmem:[#allocation5 + $0x128] sm:$0xf] }
 0x246   :  { %2993 = vmatmul.bf16.gmra.mxu0 %v6403_v0  ;;  %v5114_v6 = vld [vmem:[#allocation5 + $0x3f0] sm:$0xf0] }
 0x247   :  { %3168 = vmatpush.bf16.msrb.mxu0 %v4721_v15  ;;  %v5048_v15 = vld [vmem:[#allocation5 + $0x360] sm:$0xf] }
 0x248   :  { %v1856_v2 = vpop.f32.mrf.mxu2  ;;  %v5049_v30 = vor.u32 %v5585_v18, %v5048_v15 }
 0x249   :  { %v6408_v39 = vadd.f32 %v1856_v2, %v6352_v55  ;;  %v4705_v55 = vor.u32 %v5498_v31, %v4704_v22  ;;  %v4973_v2 = vor.u32 %v5563_v4, %v4970_v7  ;;  %v4640_v22 = vld [vmem:[#allocation5 + $0x28] sm:$0xf]  ;;  %v4922_v4 = vld [vmem:[#allocation5 + $0x270] sm:$0xf0] }
 0x24a   :  { %v2239_v11 = vpop.f32.mrf.mxu1  ;;  %3051 = vmatpush.bf16.msrb.mxu3 %v5049_v30  ;;  %v4752_v30 = vld [vmem:[#allocation5 + $0x108] sm:$0xf] }
 0x24b   :  { %v2240_v38 = vadd.f32 %v2239_v11, %v6369_v5  ;;  %3169 = vmatpush.bf16.msrb.mxu0 %v4705_v55  ;;  %v4865_v5 = vor.u32 %v5538_v16, %v4864_v35  ;;  %v5486_v11 = vld [vmem:[#allocation5 + $0x54] sm:$0xf0]  ;;  %3120 = vmatpush.bf16.msra.mxu2 %v4973_v2 }
 0x24c   :  { %v5482_v55 = vld [vmem:[#allocation5 + $0x34] sm:$0xf0] }
 0x24d   :  { %v2311_v23 = vmax.f32 %v2240_v38, 0.0  ;;  %3191 = vmatpush.bf16.msrb.mxu1 %v4865_v5  ;;  %v4817_v38 = vor.u32 %v5526_v13, %v4816_v12  ;;  %v4641_v5 = vor.u32 %v5482_v55, %v4640_v22  ;;  %v5514_v2 = vld [vmem:[#allocation5 + $0x134] sm:$0xf0]  ;;  %v5547_v12 = vld [vmem:[#allocation5 + $0x244] sm:$0xf] }
 0x24e   :  { %v4906_v13 = vld [vmem:[#allocation5 + $0x250] sm:$0xf0] }
 0x24f   :  { %v6411_v33 = vpack.c.bf16 %v2311_v23, %v2307_v8  ;;  %3170 = vmatpush.bf16.msrb.mxu0 %v4689_v44  ;;  %v4657_v8 = vor.u32 %v5486_v11, %v4656_v9  ;;  %v4954_v23 = vld [vmem:[#allocation5 + $0x2b0] sm:$0xf0]  ;;  %v4769_v11 = vor.u32 %v5514_v2, %v4768_v60  ;;  %v4909_v15 = vor.u32 %v5547_v12, %v4906_v13  ;;  %v4706_v12 = vld [vmem:[#allocation5 + $0xb8] sm:$0xf0] }
 0x250   :  { %v6413_v47 = vpop.f32.mrf.mxu2  ;;  %v4957_v31 = vor.u32 %v5559_v21, %v4954_v23  ;;  %v5510_v21 = vld [vmem:[#allocation5 + $0x114] sm:$0xf0]  ;;  %v5098_v60 = vld [vmem:[#allocation5 + $0x3d0] sm:$0xf0] }
 0x251   :  { %3017 = vmatmul.bf16.gmra.mxu1 %v6411_v33  ;;  %v4753_v22 = vor.u32 %v5510_v21, %v4752_v30  ;;  %v5492_v21 = vld [vmem:[#allocation5 + $0x8c] sm:$0xf] }
 0x252   :  { %3192 = vmatpush.bf16.msrb.mxu1 %v4849_v25  ;;  %3121 = vmatpush.bf16.msra.mxu2 %v4957_v31  ;;  %v4624_v25 = vld [vmem:[#allocation5 + $0x8] sm:$0xf]  ;;  %v5543_v31 = vld [vmem:[#allocation5 + $0x224] sm:$0xf] }
 0x253   :  { %3171 = vmatpush.bf16.msrb.mxu0 %v4673_v27  ;;  %v4625_v40 = vor.u32 %v5478_v53, %v4624_v25  ;;  %v5581_v27 = vld [vmem:[#allocation5 + $0x34c] sm:$0xf0]  ;;  %v4738_v53 = vld [vmem:[#allocation5 + $0xf8] sm:$0xf0] }
 0x256   :  { %3079 = vmatmul.bf16.vlgmr.msra.gmra.mxu0 %v6371_v3  ;;  %3193 = vmatpush.bf16.msrb.mxu1 %v4833_v1  ;;  %v5551_v1 = vld [vmem:[#allocation5 + $0x264] sm:$0xf] }
 0x257   :  { %3172 = vmatpush.bf16.msrb.mxu0 %v4657_v8  ;;  %3122 = vmatpush.bf16.msra.mxu2 %v4941_v52  ;;  %v4925_v7 = vor.u32 %v5551_v1, %v4922_v4  ;;  %v5016_v8 = vld [vmem:[#allocation5 + $0x320] sm:$0xf]  ;;  %v5504_v52 = vld [vmem:[#allocation5 + $0xec] sm:$0xf]  ;;  %v4722_v4 = vld [vmem:[#allocation5 + $0xd8] sm:$0xf0] }
 0x258   :  { %v1870_v50 = vpop.f32.mrf.mxu3  ;;  %v2251_v56 = vpop.f32.mrf.mxu2  ;;  %v4741_v24 = vor.u32 %v5504_v52, %v4738_v53  ;;  %v5500_v1 = vld [vmem:[#allocation5 + $0xcc] sm:$0xf] }
 0x259   :  { %v6418_v63 = vadd.f32 %v1870_v50, %v6378_v48  ;;  %v2252_v48 = vadd.f32 %v2251_v56, %v6421_v37  ;;  %v5032_v56 = vld [vmem:[#allocation5 + $0x340] sm:$0xf]  ;;  %v5528_v53 = vld [vmem:[#allocation5 + $0x1ac] sm:$0xf] }
 0x25a   :  { %3194 = vmatpush.bf16.msrb.mxu1 %v4817_v38  ;;  %v5033_v62 = vor.u32 %v5581_v27, %v5032_v56  ;;  %v5577_v38 = vld [vmem:[#allocation5 + $0x32c] sm:$0xf0] }
 0x25b   :  { %v2292_v44 = vmax.f32 %v2252_v48, 0.0  ;;  %3173 = vmatpush.bf16.msrb.mxu0 %v4641_v5  ;;  %3123 = vmatpush.bf16.msra.mxu2 %v4925_v7  ;;  %v5017_v18 = vor.u32 %v5577_v38, %v5016_v8  ;;  %v5536_v38 = vld [vmem:[#allocation5 + $0x1ec] sm:$0xf] }
 0x25c   :  { %3052 = vmatpush.bf16.msrb.mxu3 %v5033_v62 }
 0x25e   :  { %3195 = vmatpush.bf16.msrb.mxu1 %v4801_v32 }
 0x25f   :  { %3174 = vmatpush.bf16.msrb.mxu0 %v4625_v40  ;;  %3124 = vmatpush.bf16.msra.mxu2 %v4909_v15  ;;  %v5599_v40 = vld [vmem:[#allocation5 + $0x3e4] sm:$0xf]  ;;  %v4866_v15 = vld [vmem:[#allocation5 + $0x1f8] sm:$0xf0] }
 0x260   :  { %v6424_v35 = vpop.f32.mrf.mxu3  ;;  %v2253_v16 = vpop.f32.mrf.mxu2  ;;  %3053 = vmatpush.bf16.msrb.mxu3 %v5017_v18  ;;  %v4869_v30 = vor.u32 %v5536_v38, %v4866_v15  ;;  %v5050_v15 = vld [vmem:[#allocation5 + $0x370] sm:$0xf0] }
 0x261   :  { %v2254_v45 = vadd.f32 %v2253_v16, %v6421_v37  ;;  %3103 = vmatmul.bf16.vlgmr.msra.gmra.mxu1 %v6382_v58 }
 0x262   :  { %3196 = vmatpush.bf16.msrb.mxu1 %v4785_v61  ;;  %v5117_v61 = vor.u32 %v5599_v40, %v5114_v6  ;;  %v4834_v40 = vld [vmem:[#allocation5 + $0x1b8] sm:$0xf0] }
 0x263   :  { %v2296_v41 = vmax.f32 %v2254_v45, 0.0  ;;  %v5539_v45 = vld [vmem:[#allocation5 + $0x204] sm:$0xf]  ;;  %3263 = vmatpush.bf16.msra.mxu0 %v4741_v24  ;;  %v4837_v6 = vor.u32 %v5528_v53, %v4834_v40  ;;  %v4976_v24 = vld [vmem:[#allocation5 + $0x2c8] sm:$0xf] }
 0x264   :  { %v4877_v25 = vor.u32 %v5539_v45, %v4874_v46  ;;  %v5570_v45 = vld [vmem:[#allocation5 + $0x2f4] sm:$0xf0]  ;;  %v4674_v46 = vld [vmem:[#allocation5 + $0x78] sm:$0xf0]  ;;  %v5579_v53 = vld [vmem:[#allocation5 + $0x344] sm:$0xf] }
 0x265   :  { %v6428_v50 = vpack.c.bf16 %v2296_v41, %v2292_v44  ;;  %v5573_v44 = vld [vmem:[#allocation5 + $0x30c] sm:$0xf0]  ;;  %v5034_v40 = vld [vmem:[#allocation5 + $0x350] sm:$0xf0] }
 0x266   :  { %3084 = vmatmul.bf16.gmra.mxu0 %v6388_v42  ;;  %3197 = vmatpush.bf16.msrb.mxu1 %v4769_v11  ;;  %v5001_v57 = vor.u32 %v5573_v44, %v5000_v43  ;;  %v5496_v11 = vld [vmem:[#allocation5 + $0xac] sm:$0xf]  ;;  %v4992_v44 = vld [vmem:[#allocation5 + $0x2e8] sm:$0xf] }
 0x267   :  { %3031 = vmatmul.bf16.vlgmr.msrb.gmra.mxu2 %v6428_v50  ;;  %v4709_v13 = vor.u32 %v5496_v11, %v4706_v12  ;;  %v4960_v12 = vld [vmem:[#allocation5 + $0x2a8] sm:$0xf] }
 0x268   :  { %v1875_v9 = vpop.f32.mrf.mxu3  ;;  %v2256_v28 = vpop.f32.mrf.mxu2  ;;  %3054 = vmatpush.bf16.msrb.mxu3 %v5001_v57  ;;  %v5488_v57 = vld [vmem:[#allocation5 + $0x6c] sm:$0xf] }
 0x269   :  { %v1876_v10 = vadd.f32 %v1875_v9, %v6393_v34  ;;  %v2257_v23 = vadd.f32 %v2256_v28, %v6421_v37  ;;  %v4890_v34 = vld [vmem:[#allocation5 + $0x230] sm:$0xf0]  ;;  %v4725_v9 = vor.u32 %v5500_v1, %v4722_v4  ;;  %v5595_v28 = vld [vmem:[#allocation5 + $0x3c4] sm:$0xf]  ;;  %v4677_v52 = vor.u32 %v5488_v57, %v4674_v46  ;;  %v5516_v46 = vld [vmem:[#allocation5 + $0x14c] sm:$0xf] }
 0x26a   :  { %v4893_v55 = vor.u32 %v5543_v31, %v4890_v34  ;;  %3198 = vmatpush.bf16.msrb.mxu1 %v4753_v22  ;;  %v5101_v2 = vor.u32 %v5595_v28, %v5098_v60  ;;  %v5532_v34 = vld [vmem:[#allocation5 + $0x1cc] sm:$0xf]  ;;  %v5066_v1 = vld [vmem:[#allocation5 + $0x390] sm:$0xf0]  ;;  %v4658_v28 = vld [vmem:[#allocation5 + $0x58] sm:$0xf0] }
 0x26b   :  { %v1885_v48 = vadd.f32 %v1876_v10, %v6418_v63  ;;  %v2300_v63 = vmax.f32 %v2257_v23, 0.0  ;;  %3264 = vmatpush.bf16.msra.mxu0 %v4725_v9  ;;  %v4690_v23 = vld [vmem:[#allocation5 + $0x98] sm:$0xf0]  ;;  %v5524_v60 = vld [vmem:[#allocation5 + $0x18c] sm:$0xf] }
 0x26c   :  { %3125 = vmatpush.bf16.msra.mxu2 %v4893_v55  ;;  %3143 = vmatpush.bf16.msra.mxu3 %v5117_v61  ;;  %v4693_v31 = vor.u32 %v5492_v21, %v4690_v23  ;;  %v4850_v55 = vld [vmem:[#allocation5 + $0x1d8] sm:$0xf0]  ;;  %v6456_v61 = vperm.slane %v6359_v19, 3  ;;  %v5583_v19 = vld [vmem:[#allocation5 + $0x364] sm:$0xf] }
 0x26d   :  { %v4853_v43 = vor.u32 %v5532_v34, %v4850_v55  ;;  %v5053_v21 = vor.u32 %v5583_v19, %v5050_v15  ;;  %v4896_v15 = vld [vmem:[#allocation5 + $0x228] sm:$0xf] }
 0x26e   :  { %3287 = vmatpush.bf16.msra.mxu1 %v4869_v30 }
 0x26f   :  { %3265 = vmatpush.bf16.msra.mxu0 %v4709_v13  ;;  %v5562_v13 = vld [vmem:[#allocation5 + $0x2b4] sm:$0xf0] }
 0x270   :  { %v6435_v16 = vpop.f32.mrf.mxu3  ;;  %v2258_v5 = vpop.f32.mrf.mxu2  ;;  %3126 = vmatpush.bf16.msra.mxu2 %v4877_v25  ;;  %3144 = vmatpush.bf16.msra.mxu3 %v5101_v2  ;;  %v4818_v2 = vld [vmem:[#allocation5 + $0x198] sm:$0xf0] }
 0x271   :  { %v2259_v36 = vadd.f32 %v2258_v5, %v6421_v37  ;;  %3108 = vmatmul.bf16.gmra.mxu1 %v6397_v54  ;;  %v4821_v11 = vor.u32 %v5524_v60, %v4818_v2  ;;  %v5018_v60 = vld [vmem:[#allocation5 + $0x330] sm:$0xf0] }
 0x272   :  { %3288 = vmatpush.bf16.msra.mxu1 %v4853_v43  ;;  %v5476_v43 = vld [vmem:[#allocation5 + $0xc] sm:$0xf] }
 0x273   :  { %v2304_v32 = vmax.f32 %v2259_v36, 0.0  ;;  %v5082_v36 = vld [vmem:[#allocation5 + $0x3b0] sm:$0xf0]  ;;  %3266 = vmatpush.bf16.msra.mxu0 %v4693_v31  ;;  %v4802_v31 = vld [vmem:[#allocation5 + $0x178] sm:$0xf0] }
 0x275   :  { %v6439_v41 = vpack.c.bf16 %v2304_v32, %v2300_v63  ;;  %v5591_v63 = vld [vmem:[#allocation5 + $0x3a4] sm:$0xf]  ;;  %v4993_v32 = vor.u32 %v5570_v45, %v4992_v44 }
 0x276   :  { %3089 = vmatmul.bf16.gmra.mxu0 %v6403_v0  ;;  %3289 = vmatpush.bf16.msra.mxu1 %v4837_v6 }
 0x277   :  { %3036 = vmatmul.bf16.gmra.mxu2 %v6439_v41  ;;  %3267 = vmatpush.bf16.msra.mxu0 %v4677_v52 }
 0x278   :  { %v1880_v56 = vpop.f32.mrf.mxu3  ;;  %v2261_v27 = vpop.f32.mrf.mxu2  ;;  %3215 = vmatpush.bf16.msrb.mxu2 %v4993_v32  ;;  %v4626_v32 = vld [vmem:[#allocation5 + $0x18] sm:$0xf0] }
 0x279   :  { %v1881_v62 = vadd.f32 %v1880_v56, %v6408_v39  ;;  %v2262_v10 = vadd.f32 %v2261_v27, %v6421_v37  ;;  %v5566_v56 = vld [vmem:[#allocation5 + $0x2d4] sm:$0xf0]  ;;  %v5484_v27 = vld [vmem:[#allocation5 + $0x4c] sm:$0xf]  ;;  %v4629_v57 = vor.u32 %v5476_v43, %v4626_v32 }
 0x27a   :  { %v4977_v4 = vor.u32 %v5566_v56, %v4976_v24  ;;  %3290 = vmatpush.bf16.msra.mxu1 %v4821_v11  ;;  %v5037_v24 = vor.u32 %v5579_v53, %v5034_v40  ;;  %v4928_v56 = vld [vmem:[#allocation5 + $0x268] sm:$0xf]  ;;  %v5602_v32 = vld [vmem:[#allocation5 + $0x3f4] sm:$0xf0] }
 0x27b   :  { %v6444_v7 = vadd.f32 %v1885_v48, %v1881_v62  ;;  %v2308_v18 = vmax.f32 %v2262_v10, 0.0  ;;  %v5587_v62 = vld [vmem:[#allocation5 + $0x384] sm:$0xf]  ;;  %v4661_v10 = vor.u32 %v5484_v27, %v4658_v28  ;;  %v5554_v27 = vld [vmem:[#allocation5 + $0x274] sm:$0xf0] }
 0x27c   :  { %v5069_v9 = vor.u32 %v5587_v62, %v5066_v1  ;;  %3216 = vmatpush.bf16.msrb.mxu2 %v4977_v4  ;;  %v4929_v62 = vor.u32 %v5554_v27, %v4928_v56  ;;  %v5512_v1 = vld [vmem:[#allocation5 + $0x12c] sm:$0xf]  ;;  %v4770_v4 = vld [vmem:[#allocation5 + $0x138] sm:$0xf0]  ;;  %v4912_v11 = vld [vmem:[#allocation5 + $0x248] sm:$0xf] }
 0x27d   :  { %3268 = vmatpush.bf16.msra.mxu0 %v4661_v10  ;;  %v4773_v2 = vor.u32 %v5512_v1, %v4770_v4  ;;  %v5598_v53 = vld [vmem:[#allocation5 + $0x3d4] sm:$0xf0]  ;;  %v5088_v27 = vld [vmem:[#allocation5 + $0x3a8] sm:$0xf] }
 0x280   :  { %v6447_v8 = vpop.f32.mrf.mxu3  ;;  %v2263_v39 = vpop.f32.mrf.mxu2 }
 0x281   :  { %v2264_v48 = vadd.f32 %v2263_v39, %v6421_v37  ;;  %3113 = vmatmul.bf16.gmra.mxu1 %v6411_v33  ;;  %v5085_v37 = vor.u32 %v5591_v63, %v5082_v36  ;;  %v5480_v39 = vld [vmem:[#allocation5 + $0x2c] sm:$0xf]  ;;  %v4944_v63 = vld [vmem:[#allocation5 + $0x288] sm:$0xf]  ;;  %v5558_v36 = vld [vmem:[#allocation5 + $0x294] sm:$0xf0] }
 0x282   :  { %v4945_v45 = vor.u32 %v5558_v36, %v4944_v63  ;;  %v5542_v63 = vld [vmem:[#allocation5 + $0x214] sm:$0xf0] }
 0x283   :  { %v2312_v22 = vmax.f32 %v2264_v48, 0.0  ;;  %3145 = vmatpush.bf16.msra.mxu3 %v5085_v37  ;;  %v4642_v48 = vld [vmem:[#allocation5 + $0x38] sm:$0xf0] }
 0x284   :  { %v4645_v23 = vor.u32 %v5480_v39, %v4642_v48  ;;  %v5508_v39 = vld [vmem:[#allocation5 + $0x10c] sm:$0xf] }
 0x285   :  { %v6451_v5 = vpack.c.bf16 %v2312_v22, %v2308_v18  ;;  %v4961_v18 = vor.u32 %v5562_v13, %v4960_v12  ;;  %v5520_v22 = vld [vmem:[#allocation5 + $0x16c] sm:$0xf]  ;;  %v5550_v12 = vld [vmem:[#allocation5 + $0x254] sm:$0xf0] }
 0x286   :  { %3175 = vmatmul.bf16.vlgmr.msrb.gmra.mxu0 %v6371_v3  ;;  %v4805_v55 = vor.u32 %v5520_v22, %v4802_v31  ;;  %v4913_v13 = vor.u32 %v5550_v12, %v4912_v11  ;;  %v5590_v11 = vld [vmem:[#allocation5 + $0x394] sm:$0xf0] }
 0x287   :  { %3041 = vmatmul.bf16.gmra.mxu2 %v6451_v5  ;;  %3146 = vmatpush.bf16.msra.mxu3 %v5069_v9  ;;  %v5575_v9 = vld [vmem:[#allocation5 + $0x324] sm:$0xf] }
 0x288   :  { %v2275_v25 = vpop.f32.mrf.mxu3  ;;  %3217 = vmatpush.bf16.msrb.mxu2 %v4961_v18  ;;  %3269 = vmatpush.bf16.msra.mxu0 %v4645_v23  ;;  %v5021_v10 = vor.u32 %v5575_v9, %v5018_v60  ;;  %v5546_v18 = vld [vmem:[#allocation5 + $0x234] sm:$0xf0]  ;;  %v5002_v23 = vld [vmem:[#allocation5 + $0x310] sm:$0xf0]  ;;  %v5568_v60 = vld [vmem:[#allocation5 + $0x2ec] sm:$0xf] }
 0x289   :  { %v2276_v38 = vadd.f32 %v2275_v25, %v6456_v61  ;;  %3291 = vmatpush.bf16.msra.mxu1 %v4805_v55  ;;  %v4786_v25 = vld [vmem:[#allocation5 + $0x158] sm:$0xf0]  ;;  %v4880_v55 = vld [vmem:[#allocation5 + $0x208] sm:$0xf] }
 0x28a   :  { %v4789_v6 = vor.u32 %v5516_v46, %v4786_v25  ;;  %v5104_v25 = vld [vmem:[#allocation5 + $0x3c8] sm:$0xf] }
 0x28b   :  { %3147 = vmatpush.bf16.msra.mxu3 %v5053_v21  ;;  %v2293_v37 = vmax.f32 %v2276_v38, 0.0  ;;  %v4754_v38 = vld [vmem:[#allocation5 + $0x118] sm:$0xf0]  ;;  %v5571_v21 = vld [vmem:[#allocation5 + $0x304] sm:$0xf]  ;;  %v5105_v40 = vor.u32 %v5598_v53, %v5104_v25 }
 0x28c   :  { %3218 = vmatpush.bf16.msrb.mxu2 %v4945_v45  ;;  %3270 = vmatpush.bf16.msra.mxu0 %v4629_v57  ;;  %v4757_v19 = vor.u32 %v5508_v39, %v4754_v38  ;;  %v5005_v31 = vor.u32 %v5571_v21, %v5002_v23  ;;  %v5120_v45 = vld [vmem:[#allocation5 + $0x3e8] sm:$0xf]  ;;  %v4978_v39 = vld [vmem:[#allocation5 + $0x2d8] sm:$0xf0]  ;;  %v5556_v21 = vld [vmem:[#allocation5 + $0x28c] sm:$0xf] }
 0x28d   :  { %3292 = vmatpush.bf16.msra.mxu1 %v4789_v6  ;;  %v5121_v46 = vor.u32 %v5602_v32, %v5120_v45  ;;  %v4946_v23 = vld [vmem:[#allocation5 + $0x298] sm:$0xf0]  ;;  %v5024_v45 = vld [vmem:[#allocation5 + $0x328] sm:$0xf]  ;;  %v5578_v32 = vld [vmem:[#allocation5 + $0x334] sm:$0xf0] }
 0x28e   :  { %v5544_v25 = vld [vmem:[#allocation5 + $0x22c] sm:$0xf]  ;;  %v4898_v53 = vld [vmem:[#allocation5 + $0x238] sm:$0xf0] }
 0x28f   :  { %3148 = vmatpush.bf16.msra.mxu3 %v5037_v24 }
 0x290   :  { %v2277_v30 = vpop.f32.mrf.mxu3  ;;  %3219 = vmatpush.bf16.msrb.mxu2 %v4929_v62  ;;  %v5594_v62 = vld [vmem:[#allocation5 + $0x3b4] sm:$0xf0] }
 0x291   :  { %v2278_v34 = vadd.f32 %v2277_v30, %v6456_v61  ;;  %3199 = vmatmul.bf16.vlgmr.msrb.gmra.mxu1 %v6382_v58  ;;  %v4897_v30 = vor.u32 %v5546_v18, %v4896_v15  ;;  %v5089_v1 = vor.u32 %v5594_v62, %v5088_v27  ;;  %v4962_v15 = vld [vmem:[#allocation5 + $0x2b8] sm:$0xf0]  ;;  %v5056_v18 = vld [vmem:[#allocation5 + $0x368] sm:$0xf] }
 0x292   :  { %3293 = vmatpush.bf16.msra.mxu1 %v4773_v2  ;;  %v4994_v2 = vld [vmem:[#allocation5 + $0x2f8] sm:$0xf0] }
 0x293   :  { %v2297_v44 = vmax.f32 %v2278_v34, 0.0  ;;  %3149 = vmatpush.bf16.msra.mxu3 %v5021_v10  ;;  %v4997_v10 = vor.u32 %v5568_v60, %v4994_v2  ;;  %v4882_v27 = vld [vmem:[#allocation5 + $0x218] sm:$0xf0]  ;;  %v5596_v60 = vld [vmem:[#allocation5 + $0x3cc] sm:$0xf] }
 0x294   :  { %3220 = vmatpush.bf16.msrb.mxu2 %v4913_v13  ;;  %v5564_v13 = vld [vmem:[#allocation5 + $0x2cc] sm:$0xf]  ;;  %v5106_v2 = vld [vmem:[#allocation5 + $0x3d8] sm:$0xf0] }
 0x295   :  { %v6461_v52 = vpack.c.bf16 %v2297_v44, %v2293_v37  ;;  %v4881_v37 = vor.u32 %v5542_v63, %v4880_v55  ;;  %v4981_v38 = vor.u32 %v5564_v13, %v4978_v39  ;;  %v5552_v63 = vld [vmem:[#allocation5 + $0x26c] sm:$0xf]  ;;  %v5074_v39 = vld [vmem:[#allocation5 + $0x398] sm:$0xf0] }
 0x296   :  { %3180 = vmatmul.bf16.gmra.mxu0 %v6388_v42  ;;  %3294 = vmatpush.bf16.msra.mxu1 %v4757_v19  ;;  %v5560_v19 = vld [vmem:[#allocation5 + $0x2ac] sm:$0xf] }
 0x297   :  { %3055 = vmatmul.bf16.vlgmr.msrb.gmra.mxu3 %v6461_v52  ;;  %3127 = vmatmul.bf16.vlgmr.msra.gmra.mxu2 %v6428_v50 }
 0x298   :  { %v2280_v28 = vpop.f32.mrf.mxu3  ;;  %3221 = vmatpush.bf16.msrb.mxu2 %v4897_v30  ;;  %3150 = vmatpush.bf16.msra.mxu3 %v5005_v31  ;;  %v5040_v31 = vld [vmem:[#allocation5 + $0x348] sm:$0xf] }
 0x299   :  { %v2281_v48 = vadd.f32 %v2280_v28, %v6456_v61 }
 0x29b   :  { %v2301_v36 = vmax.f32 %v2281_v48, 0.0  ;;  %v4965_v48 = vor.u32 %v5560_v19, %v4962_v15  ;;  %v5610_v19 = vld [vmem:[%s6702_s11 + $0x38] sm:$0xff] }
 0x29c   :  { %3222 = vmatpush.bf16.msrb.mxu2 %v4881_v37  ;;  %3239 = vmatpush.bf16.msrb.mxu3 %v5121_v46  ;;  %v4914_v37 = vld [vmem:[#allocation5 + $0x258] sm:$0xf0]  ;;  %v5025_v46 = vor.u32 %v5578_v32, %v5024_v45  ;;  %v5576_v45 = vld [vmem:[#allocation5 + $0x32c] sm:$0xf] }
 0x29d   :  { %3587 = vmatpush.bf16.msrb.mxu0 %v5610_v19  ;;  %v5026_v32 = vld [vmem:[#allocation5 + $0x338] sm:$0xf0] }
 0x2a0   :  { %v2282_v22 = vpop.f32.mrf.mxu3  ;;  %3240 = vmatpush.bf16.msrb.mxu3 %v5105_v40  ;;  %3311 = vmatpush.bf16.msra.mxu2 %v4997_v10  ;;  %v5008_v40 = vld [vmem:[#allocation5 + $0x308] sm:$0xf]  ;;  %v5109_v10 = vor.u32 %v5596_v60, %v5106_v2 }
 0x2a1   :  { %v2283_v34 = vadd.f32 %v2282_v22, %v6456_v61  ;;  %3204 = vmatmul.bf16.gmra.mxu1 %v6397_v54  ;;  %v4949_v22 = vor.u32 %v5556_v21, %v4946_v23  ;;  %v5608_v23 = vld [vmem:[%s6702_s11 + $0x28] sm:$0xff] }
 0x2a3   :  { %v2305_v43 = vmax.f32 %v2283_v34, 0.0  ;;  %v5582_v34 = vld [vmem:[#allocation5 + $0x354] sm:$0xf0] }
 0x2a4   :  { %3241 = vmatpush.bf16.msrb.mxu3 %v5089_v1  ;;  %3312 = vmatpush.bf16.msra.mxu2 %v4981_v38  ;;  %v5041_v55 = vor.u32 %v5582_v34, %v5040_v31  ;;  %v5600_v1 = vld [vmem:[#allocation5 + $0x3ec] sm:$0xf]  ;;  %v5042_v34 = vld [vmem:[#allocation5 + $0x358] sm:$0xf0] }
 0x2a5   :  { %v6469_v44 = vpack.c.bf16 %v2305_v43, %v2301_v36  ;;  %v4930_v36 = vld [vmem:[#allocation5 + $0x278] sm:$0xf0]  ;;  %v5580_v31 = vld [vmem:[#allocation5 + $0x34c] sm:$0xf] }
 0x2a6   :  { %3185 = vmatmul.bf16.gmra.mxu0 %v6403_v0  ;;  %v4933_v43 = vor.u32 %v5552_v63, %v4930_v36  ;;  %v5607_v63 = vld [vmem:[%s6702_s11 + $0x20] sm:$0xff] }
 0x2a7   :  { %3060 = vmatmul.bf16.gmra.mxu3 %v6469_v44  ;;  %3132 = vmatmul.bf16.gmra.mxu2 %v6439_v41 }
 0x2a8   :  { %v2285_v57 = vpop.f32.mrf.mxu3  ;;  %3313 = vmatpush.bf16.msra.mxu2 %v4965_v48  ;;  %v5058_v48 = vld [vmem:[#allocation5 + $0x378] sm:$0xf0] }
 0x2a9   :  { %v2286_v6 = vadd.f32 %v2285_v57, %v6456_v61 }
 0x2ab   :  { %v2309_v4 = vmax.f32 %v2286_v6, 0.0  ;;  %v5574_v6 = vld [vmem:[#allocation5 + $0x314] sm:$0xf0] }
 0x2ac   :  { %3314 = vmatpush.bf16.msra.mxu2 %v4949_v22 }
 0x2ae   :  { %v6491_v13 = vpop.f32.mrf.mxu1 }
 0x2b0   :  { %v2287_v24 = vpop.f32.mrf.mxu3  ;;  %3315 = vmatpush.bf16.msra.mxu2 %v4933_v43  ;;  %v5606_v43 = vld [vmem:[%s6702_s11 + $0x18] sm:$0xff] }
 0x2b1   :  { %v2288_v56 = vadd.f32 %v2287_v24, %v6456_v61  ;;  %3209 = vmatmul.bf16.gmra.mxu1 %v6411_v33  ;;  %v5072_v61 = vld [vmem:[#allocation5 + $0x388] sm:$0xf]  ;;  %v5009_v24 = vor.u32 %v5574_v6, %v5008_v40 }
 0x2b2   :  { %v5073_v12 = vor.u32 %v5590_v11, %v5072_v61  ;;  %v5090_v61 = vld [vmem:[#allocation5 + $0x3b8] sm:$0xf0]  ;;  %v2984_v11 = vpop.f32.mrf.mxu0 }
 0x2b3   :  { %v2313_v9 = vmax.f32 %v2288_v56, 0.0  ;;  %v5540_v56 = vld [vmem:[#allocation5 + $0x20c] sm:$0xf] }
 0x2b4   :  { %3242 = vmatpush.bf16.msrb.mxu3 %v5073_v12  ;;  %v4885_v62 = vor.u32 %v5540_v56, %v4882_v27 }
 0x2b5   :  { %v6477_v28 = vpack.c.bf16 %v2313_v9, %v2309_v4  ;;  %v5122_v4 = vld [vmem:[#allocation5 + $0x3f8] sm:$0xf0] }
 0x2b6   :  { %3271 = vmatmul.bf16.vlgmr.msra.gmra.mxu0 %v6371_v3  ;;  %v5586_v3 = vld [vmem:[#allocation5 + $0x374] sm:$0xf0]  ;;  %v5125_v9 = vor.u32 %v5600_v1, %v5122_v4  ;;  %v6534_v1 = vld [vmem:[%s6701_s10] sm:$0xf] }
 0x2b7   :  { %3065 = vmatmul.bf16.gmra.mxu3 %v6477_v28  ;;  %3137 = vmatmul.bf16.gmra.mxu2 %v6451_v5  ;;  %v5057_v30 = vor.u32 %v5586_v3, %v5056_v18  ;;  %v5584_v3 = vld [vmem:[#allocation5 + $0x36c] sm:$0xf] }
 0x2b8   :  { %v5061_v21 = vor.u32 %v5584_v3, %v5058_v48 }
 0x2b9   :  { %3243 = vmatpush.bf16.msrb.mxu3 %v5057_v30  ;;  %v3010_v30 = vpop.f32.mrf.mxu1 }
 0x2ba   :  { %v2986_v18 = vpop.f32.mrf.mxu0 }
 0x2bd   :  { %3244 = vmatpush.bf16.msrb.mxu3 %v5041_v55  ;;  %v5045_v55 = vor.u32 %v5580_v31, %v5042_v34 }
 0x2c1   :  { %3295 = vmatmul.bf16.vlgmr.msra.gmra.mxu1 %v6382_v58  ;;  %v5548_v58 = vld [vmem:[#allocation5 + $0x24c] sm:$0xf]  ;;  %3245 = vmatpush.bf16.msrb.mxu3 %v5025_v46  ;;  %v5029_v46 = vor.u32 %v5576_v45, %v5026_v32 }
 0x2c2   :  { %v4917_v57 = vor.u32 %v5548_v58, %v4914_v37  ;;  %v2989_v36 = vpop.f32.mrf.mxu0  ;;  %v6514_v58 = vpop.f32.mrf.mxu1 }
 0x2c4   :  { %3316 = vmatpush.bf16.msra.mxu2 %v4917_v57  ;;  %v5605_v57 = vld [vmem:[%s6702_s11 + $0x10] sm:$0xff] }
 0x2c5   :  { %3246 = vmatpush.bf16.msrb.mxu3 %v5009_v24  ;;  %v5603_v24 = vld [vmem:[%s6702_s11] sm:$0xff] }
 0x2c6   :  { %3276 = vmatmul.bf16.gmra.mxu0 %v6388_v42  ;;  %v4901_v42 = vor.u32 %v5544_v25, %v4898_v53  ;;  %v5010_v25 = vld [vmem:[#allocation5 + $0x318] sm:$0xf0] }
 0x2c7   :  { %3151 = vmatmul.bf16.vlgmr.msra.gmra.mxu3 %v6461_v52  ;;  %3223 = vmatmul.bf16.vlgmr.msrb.gmra.mxu2 %v6428_v50 }
 0x2c8   :  { %3317 = vmatpush.bf16.msra.mxu2 %v4901_v42  ;;  %v5604_v42 = vld [vmem:[%s6702_s11 + $0x8] sm:$0xff] }
 0x2c9   :  { %3335 = vmatpush.bf16.msra.mxu3 %v5125_v9  ;;  %v2327_v9 = vperm.slane %v6534_v1, 0 }
 0x2ca   :  { %v2991_v40 = vpop.f32.mrf.mxu0  ;;  %v3015_v6 = vpop.f32.mrf.mxu1 }
 0x2cb   :  { %v2985_v2 = vadd.f32 %v2984_v11, %v2327_v9  ;;  %v5617_v11 = vld [vmem:[%s6702_s11 + $0x70] sm:$0xff]  ;;  %v2990_v31 = vadd.f32 %v2989_v36, %v2327_v9  ;;  %v2992_v34 = vadd.f32 %v2991_v40, %v2327_v9 }
 0x2cc   :  { %3318 = vmatpush.bf16.msra.mxu2 %v4885_v62  ;;  %v5613_v36 = vld [vmem:[%s6702_s11 + $0x50] sm:$0xff] }
 0x2cd   :  { %3336 = vmatpush.bf16.msra.mxu3 %v5109_v10  ;;  %v2987_v10 = vadd.f32 %v2986_v18, %v2327_v9  ;;  %v5616_v18 = vld [vmem:[%s6702_s11 + $0x68] sm:$0xff]  ;;  %v3014_v45 = vadd.f32 %v6514_v58, %v2990_v31 }
 0x2d1   :  { %3300 = vmatmul.bf16.gmra.mxu1 %v6397_v54  ;;  %v5592_v54 = vld [vmem:[#allocation5 + $0x3ac] sm:$0xf] }
 0x2d2   :  { %v5093_v12 = vor.u32 %v5592_v54, %v5090_v61  ;;  %v2994_v27 = vpop.f32.mrf.mxu0  ;;  %v6529_v62 = vpop.f32.mrf.mxu1  ;;  %v5618_v54 = vld [vmem:[%s6702_s11 + $0x78] sm:$0xff] }
 0x2d3   :  { %3611 = vmatpush.bf16.msrb.mxu1 %v5618_v54  ;;  %v2995_v54 = vadd.f32 %v2994_v27, %v2327_v9 }
 0x2d4   :  { %3337 = vmatpush.bf16.msra.mxu3 %v5093_v12 }
 0x2d6   :  { %3281 = vmatmul.bf16.gmra.mxu0 %v6403_v0  ;;  %v5588_v0 = vld [vmem:[#allocation5 + $0x38c] sm:$0xf] }
 0x2d7   :  { %3156 = vmatmul.bf16.gmra.mxu3 %v6469_v44  ;;  %3228 = vmatmul.bf16.gmra.mxu2 %v6439_v41  ;;  %v5077_v38 = vor.u32 %v5588_v0, %v5074_v39  ;;  %v3009_v0 = vadd.f32 %v6491_v13, %v2985_v2  ;;  %v3011_v39 = vadd.f32 %v3010_v30, %v2987_v10  ;;  %v5611_v2 = vld [vmem:[%s6702_s11 + $0x40] sm:$0xff] }
 0x2d8   :  { %3612 = vmatpush.bf16.msrb.mxu1 %v5617_v11 }
 0x2d9   :  { %3338 = vmatpush.bf16.msra.mxu3 %v5077_v38 }
 0x2da   :  { %v2996_v60 = vpop.f32.mrf.mxu0 }
 0x2dc   :  { %3613 = vmatpush.bf16.msrb.mxu1 %v5616_v18 }
 0x2dd   :  { %3339 = vmatpush.bf16.msra.mxu3 %v5061_v21 }
 0x2e1   :  { %3305 = vmatmul.bf16.gmra.mxu1 %v6411_v33  ;;  %v5609_v33 = vld [vmem:[%s6702_s11 + $0x30] sm:$0xff]  ;;  %3340 = vmatpush.bf16.msra.mxu3 %v5045_v55  ;;  %v5614_v55 = vld [vmem:[%s6702_s11 + $0x58] sm:$0xff] }
 0x2e2   :  { %3588 = vmatpush.bf16.msrb.mxu0 %v5609_v33 }
 0x2e5   :  { %3341 = vmatpush.bf16.msra.mxu3 %v5029_v46 }
 0x2e6   :  { %3589 = vmatpush.bf16.msrb.mxu0 %v5608_v23 }
 0x2e7   :  { %3161 = vmatmul.bf16.gmra.mxu3 %v6477_v28  ;;  %3233 = vmatmul.bf16.gmra.mxu2 %v6451_v5 }
 0x2ea   :  { %v6498_v15 = vpop.f32.mrf.mxu2  ;;  %3590 = vmatpush.bf16.msrb.mxu0 %v5607_v63 }
 0x2eb   :  { %v3033_v38 = vadd.f32 %v6498_v15, %v3009_v0  ;;  %v5615_v15 = vld [vmem:[%s6702_s11 + $0x60] sm:$0xff] }
 0x2ec   :  { %3614 = vmatpush.bf16.msrb.mxu1 %v5615_v15 }
 0x2ee   :  { %3591 = vmatpush.bf16.msrb.mxu0 %v5606_v43 }
 0x2f0   :  { %3615 = vmatpush.bf16.msrb.mxu1 %v5614_v55 }
 0x2f2   :  { %v3034_v22 = vpop.f32.mrf.mxu2  ;;  %3592 = vmatpush.bf16.msrb.mxu0 %v5605_v57  ;;  %v3016_v57 = vadd.f32 %v3015_v6, %v2992_v34 }
 0x2f3   :  { %v3035_v19 = vadd.f32 %v3034_v22, %v3011_v39  ;;  %v3019_v39 = vadd.f32 %v6529_v62, %v2995_v54  ;;  %v5621_v54 = vld [vmem:[%s6702_s11 + $0x90] sm:$0xff] }
 0x2f4   :  { %3616 = vmatpush.bf16.msrb.mxu1 %v5613_v36 }
 0x2f6   :  { %3593 = vmatpush.bf16.msrb.mxu0 %v5604_v42 }
 0x2f7   :  { %3247 = vmatmul.bf16.vlgmr.msrb.gmra.mxu3 %v6461_v52  ;;  %3319 = vmatmul.bf16.vlgmr.msra.gmra.mxu2 %v6428_v50  ;;  %v5572_v50 = vld [vmem:[#allocation5 + $0x30c] sm:$0xf] }
 0x2f8   :  { %v5013_v53 = vor.u32 %v5572_v50, %v5010_v25 }
 0x2fa   :  { %v6516_v37 = vpop.f32.mrf.mxu2  ;;  %3342 = vmatpush.bf16.msra.mxu3 %v5013_v53  ;;  %3594 = vmatpush.bf16.msrb.mxu0 %v5603_v24  ;;  %v5612_v53 = vld [vmem:[%s6702_s11 + $0x48] sm:$0xff] }
 0x2fb   :  { %3617 = vmatpush.bf16.msrb.mxu1 %v5612_v53 }
 0x2ff   :  { %3618 = vmatpush.bf16.msrb.mxu1 %v5611_v2 }
 0x302   :  { %v3039_v56 = vpop.f32.mrf.mxu2 }
 0x303   :  { %v3040_v50 = vadd.f32 %v3039_v56, %v3016_v57  ;;  %v5624_v57 = vld [vmem:[%s6702_s11 + $0xa8] sm:$0xff] }
 0x307   :  { %3252 = vmatmul.bf16.gmra.mxu3 %v6469_v44  ;;  %3324 = vmatmul.bf16.gmra.mxu2 %v6439_v41  ;;  %v3020_v41 = vpop.f32.mrf.mxu1 }
 0x30a   :  { %v6536_v4 = vpop.f32.mrf.mxu2 }
 0x30f   :  { %v6554_v3 = vpop.f32.mrf.mxu1 }
 0x312   :  { %v3044_v61 = vpop.f32.mrf.mxu2 }
 0x317   :  { %3257 = vmatmul.bf16.gmra.mxu3 %v6477_v28  ;;  %3329 = vmatmul.bf16.gmra.mxu2 %v6451_v5  ;;  %v6549_v5 = vpop.f32.mrf.mxu0  ;;  %v3106_v32 = vpop.f32.mrf.mxu1 }
 0x31a   :  { %v3056_v12 = vpop.f32.mrf.mxu3  ;;  %v6556_v30 = vpop.f32.mrf.mxu2 }
 0x31b   :  { %v3057_v33 = vadd.f32 %v3056_v12, %v3033_v38  ;;  %v2997_v12 = vadd.f32 %v2996_v60, %v2327_v9 }
 0x31d   :  { %v3359_v21 = vmax.f32 %v3057_v33, 0.0  ;;  %v3021_v11 = vadd.f32 %v3020_v41, %v2997_v12 }
 0x31f   :  { %v3082_v63 = vpop.f32.mrf.mxu0  ;;  %v3109_v10 = vpop.f32.mrf.mxu1  ;;  %v3045_v18 = vadd.f32 %v3044_v61, %v3021_v11 }
 0x322   :  { %v3058_v13 = vpop.f32.mrf.mxu3  ;;  %v3130_v46 = vpop.f32.mrf.mxu2 }
 0x323   :  { %v3059_v48 = vadd.f32 %v3058_v13, %v3035_v19  ;;  %v3043_v19 = vadd.f32 %v6536_v4, %v3019_v39  ;;  %v5626_v4 = vld [vmem:[%s6702_s11 + $0xb8] sm:$0xff] }
 0x324   :  { %3635 = vmatpush.bf16.msrb.mxu2 %v5626_v4 }
 0x325   :  { %v3363_v23 = vmax.f32 %v3059_v48, 0.0 }
 0x327   :  { %v3383_v22 = vpack.c.bf16 %v3363_v23, %v3359_v21  ;;  %3343 = vmatmul.bf16.vlgmr.msra.gmra.mxu3 %v6461_v52  ;;  %v3038_v52 = vadd.f32 %v6516_v37, %v3014_v45  ;;  %v3085_v58 = vpop.f32.mrf.mxu0  ;;  %v3111_v33 = vpop.f32.mrf.mxu1 }
 0x329   :  { %3595 = vmatmul.bf16.vlgmr.msrb.gmra.mxu0 %v3383_v22 }
 0x32a   :  { %v3061_v43 = vpop.f32.mrf.mxu3  ;;  %v3133_v56 = vpop.f32.mrf.mxu2 }
 0x32b   :  { %v3062_v25 = vadd.f32 %v3061_v43, %v3038_v52 }
 0x32d   :  { %v3367_v24 = vmax.f32 %v3062_v25, 0.0 }
 0x32f   :  { %v3087_v38 = vpop.f32.mrf.mxu0  ;;  %v3114_v41 = vpop.f32.mrf.mxu1 }
 0x332   :  { %v3063_v42 = vpop.f32.mrf.mxu3  ;;  %v3135_v48 = vpop.f32.mrf.mxu2 }
 0x333   :  { %v3064_v40 = vadd.f32 %v3063_v42, %v3040_v50  ;;  %v5622_v42 = vld [vmem:[%s6702_s11 + $0x98] sm:$0xff] }
 0x335   :  { %v3371_v6 = vmax.f32 %v3064_v40, 0.0 }
 0x337   :  { %3348 = vmatmul.bf16.gmra.mxu3 %v6469_v44  ;;  %v3387_v37 = vpack.c.bf16 %v3371_v6, %v3367_v24  ;;  %v6580_v44 = vperm.slane %v6534_v1, 1  ;;  %v3090_v60 = vpop.f32.mrf.mxu0  ;;  %v3116_v50 = vpop.f32.mrf.mxu1 }
 0x339   :  { %3600 = vmatmul.bf16.gmra.mxu0 %v3387_v37  ;;  %v3081_v62 = vadd.f32 %v6549_v5, %v6580_v44  ;;  %v3083_v31 = vadd.f32 %v3082_v63, %v6580_v44  ;;  %v3088_v24 = vadd.f32 %v3087_v38, %v6580_v44 }
 0x33a   :  { %v3066_v0 = vpop.f32.mrf.mxu3  ;;  %v3138_v22 = vpop.f32.mrf.mxu2 }
 0x33b   :  { %v3067_v13 = vadd.f32 %v3066_v0, %v3043_v19  ;;  %v3105_v34 = vadd.f32 %v6554_v3, %v3081_v62  ;;  %v3107_v55 = vadd.f32 %v3106_v32, %v3083_v31  ;;  %v5623_v32 = vld [vmem:[%s6702_s11 + $0xa0] sm:$0xff]  ;;  %v3112_v12 = vadd.f32 %v3111_v33, %v3088_v24  ;;  %v5620_v19 = vld [vmem:[%s6702_s11 + $0x88] sm:$0xff]  ;;  %v5630_v24 = vld [vmem:[%s6702_s11 + $0xd8] sm:$0xff] }
 0x33d   :  { %v3375_v23 = vmax.f32 %v3067_v13, 0.0  ;;  %v3129_v5 = vadd.f32 %v6556_v30, %v3105_v34  ;;  %v3131_v43 = vadd.f32 %v3130_v46, %v3107_v55  ;;  %v3086_v46 = vadd.f32 %v3085_v58, %v6580_v44 }
 0x33e   :  { %v3136_v39 = vadd.f32 %v3135_v48, %v3112_v12  ;;  %v3091_v48 = vadd.f32 %v3090_v60, %v6580_v44 }
 0x33f   :  { %v3092_v36 = vpop.f32.mrf.mxu0  ;;  %v3110_v2 = vadd.f32 %v3109_v10, %v3086_v46  ;;  %v3200_v37 = vpop.f32.mrf.mxu1 }
 0x340   :  { %v3093_v62 = vadd.f32 %v3092_v36, %v6580_v44  ;;  %v3115_v4 = vadd.f32 %v3114_v41, %v3091_v48  ;;  %v5632_v41 = vld [vmem:[%s6702_s11 + $0xe8] sm:$0xff] }
 0x341   :  { %v3134_v0 = vadd.f32 %v3133_v56, %v3110_v2 }
 0x342   :  { %v3068_v21 = vpop.f32.mrf.mxu3  ;;  %v3140_v53 = vpop.f32.mrf.mxu2  ;;  %v3117_v31 = vadd.f32 %v3116_v50, %v3093_v62  ;;  %v3139_v34 = vadd.f32 %v3138_v22, %v3115_v4 }
 0x343   :  { %v3069_v27 = vadd.f32 %v3068_v21, %v3045_v18  ;;  %v5619_v21 = vld [vmem:[%s6702_s11 + $0x80] sm:$0xff] }
 0x344   :  { %v3141_v60 = vadd.f32 %v3140_v53, %v3117_v31 }
 0x345   :  { %v3379_v15 = vmax.f32 %v3069_v27, 0.0 }
 0x347   :  { %3353 = vmatmul.bf16.gmra.mxu3 %v6477_v28  ;;  %v3391_v9 = vpack.c.bf16 %v3379_v15, %v3375_v23  ;;  %v5625_v28 = vld [vmem:[%s6702_s11 + $0xb0] sm:$0xff]  ;;  %v3176_v6 = vpop.f32.mrf.mxu0  ;;  %v3202_v56 = vpop.f32.mrf.mxu1  ;;  %v5634_v23 = vld [vmem:[%s6702_s11 + $0xf8] sm:$0xff] }
 0x348   :  { %3636 = vmatpush.bf16.msrb.mxu2 %v5625_v28  ;;  %3659 = vmatpush.bf16.msrb.mxu3 %v5634_v23 }
 0x349   :  { %3605 = vmatmul.bf16.gmra.mxu0 %v3391_v9 }
 0x34a   :  { %v3152_v61 = vpop.f32.mrf.mxu3  ;;  %v3224_v58 = vpop.f32.mrf.mxu2 }
 0x34b   :  { %v3153_v45 = vadd.f32 %v3152_v61, %v3129_v5  ;;  %v5633_v61 = vld [vmem:[%s6702_s11 + $0xf0] sm:$0xff] }
 0x34c   :  { %3637 = vmatpush.bf16.msrb.mxu2 %v5624_v57  ;;  %3660 = vmatpush.bf16.msrb.mxu3 %v5633_v61 }
 0x34d   :  { %v3360_v3 = vmax.f32 %v3153_v45, 0.0 }
 0x34f   :  { %v3178_v27 = vpop.f32.mrf.mxu0  ;;  %v3205_v5 = vpop.f32.mrf.mxu1 }
 0x350   :  { %3638 = vmatpush.bf16.msrb.mxu2 %v5623_v32  ;;  %3661 = vmatpush.bf16.msrb.mxu3 %v5632_v41 }
 0x352   :  { %v3154_v63 = vpop.f32.mrf.mxu3  ;;  %v3226_v15 = vpop.f32.mrf.mxu2 }
 0x353   :  { %v3155_v52 = vadd.f32 %v3154_v63, %v3131_v43  ;;  %v2329_v63 = vperm.slane %v6534_v1, 2 }
 0x354   :  { %3639 = vmatpush.bf16.msrb.mxu2 %v5622_v42 }
 0x355   :  { %v3364_v25 = vmax.f32 %v3155_v52, 0.0  ;;  %v3179_v32 = vadd.f32 %v3178_v27, %v2329_v63  ;;  %v5628_v27 = vld [vmem:[%s6702_s11 + $0xc8] sm:$0xff] }
 0x357   :  { %v3384_v30 = vpack.c.bf16 %v3364_v25, %v3360_v3  ;;  %v3181_v28 = vpop.f32.mrf.mxu0  ;;  %v3177_v3 = vadd.f32 %v3176_v6, %v2329_v63  ;;  %v3207_v25 = vpop.f32.mrf.mxu1  ;;  %v3203_v42 = vadd.f32 %v3202_v56, %v3179_v32 }
 0x358   :  { %3640 = vmatpush.bf16.msrb.mxu2 %v5621_v54 }
 0x359   :  { %3619 = vmatmul.bf16.vlgmr.msrb.gmra.mxu1 %v3384_v30  ;;  %v3201_v53 = vadd.f32 %v3200_v37, %v3177_v3  ;;  %v5631_v30 = vld [vmem:[%s6702_s11 + $0xe0] sm:$0xff]  ;;  %v3227_v6 = vadd.f32 %v3226_v15, %v3203_v42 }
 0x35a   :  { %v3157_v40 = vpop.f32.mrf.mxu3  ;;  %v3229_v57 = vpop.f32.mrf.mxu2  ;;  %3662 = vmatpush.bf16.msrb.mxu3 %v5631_v30 }
 0x35b   :  { %v3158_v11 = vadd.f32 %v3157_v40, %v3134_v0  ;;  %v3225_v40 = vadd.f32 %v3224_v58, %v3201_v53 }
 0x35c   :  { %3641 = vmatpush.bf16.msrb.mxu2 %v5620_v19 }
 0x35d   :  { %v3368_v13 = vmax.f32 %v3158_v11, 0.0 }
 0x35e   :  { %3663 = vmatpush.bf16.msrb.mxu3 %v5630_v24 }
 0x35f   :  { %v3183_v22 = vpop.f32.mrf.mxu0  ;;  %v3210_v11 = vpop.f32.mrf.mxu1 }
 0x360   :  { %3642 = vmatpush.bf16.msrb.mxu2 %v5619_v21 }
 0x362   :  { %v3159_v18 = vpop.f32.mrf.mxu3  ;;  %v3231_v46 = vpop.f32.mrf.mxu2 }
 0x363   :  { %v3160_v38 = vadd.f32 %v3159_v18, %v3136_v39  ;;  %v5629_v18 = vld [vmem:[%s6702_s11 + $0xd0] sm:$0xff] }
 0x364   :  { %3664 = vmatpush.bf16.msrb.mxu3 %v5629_v18 }
 0x365   :  { %v3372_v10 = vmax.f32 %v3160_v38, 0.0  ;;  %v3182_v38 = vadd.f32 %v3181_v28, %v2329_v63  ;;  %v5627_v28 = vld [vmem:[%s6702_s11 + $0xc0] sm:$0xff] }
 0x367   :  { %v3388_v33 = vpack.c.bf16 %v3372_v10, %v3368_v13  ;;  %v3186_v0 = vpop.f32.mrf.mxu0  ;;  %v3184_v10 = vadd.f32 %v3183_v22, %v2329_v63  ;;  %v3206_v21 = vadd.f32 %v3205_v5, %v3182_v38  ;;  %v3212_v23 = vpop.f32.mrf.mxu1 }
 0x368   :  { %3665 = vmatpush.bf16.msrb.mxu3 %v5628_v27  ;;  %v3187_v5 = vadd.f32 %v3186_v0, %v2329_v63 }
 0x369   :  { %3624 = vmatmul.bf16.gmra.mxu1 %v3388_v33  ;;  %v3208_v56 = vadd.f32 %v3207_v25, %v3184_v10  ;;  %v3230_v48 = vadd.f32 %v3229_v57, %v3206_v21 }
 0x36a   :  { %v3162_v9 = vpop.f32.mrf.mxu3  ;;  %v3234_v58 = vpop.f32.mrf.mxu2 }
 0x36b   :  { %v3163_v55 = vadd.f32 %v3162_v9, %v3139_v34  ;;  %v3232_v15 = vadd.f32 %v3231_v46, %v3208_v56 }
 0x36c   :  { %3666 = vmatpush.bf16.msrb.mxu3 %v5627_v28 }
 0x36d   :  { %v3376_v52 = vmax.f32 %v3163_v55, 0.0 }
 0x36f   :  { %v3188_v33 = vpop.f32.mrf.mxu0 }
 0x372   :  { %v3164_v43 = vpop.f32.mrf.mxu3  ;;  %v3236_v62 = vpop.f32.mrf.mxu2 }
 0x373   :  { %v3165_v45 = vadd.f32 %v3164_v43, %v3141_v60  ;;  %v3296_v43 = vpop.f32.mrf.mxu1 }
 0x375   :  { %v3380_v44 = vmax.f32 %v3165_v45, 0.0 }
 0x377   :  { %v3392_v36 = vpack.c.bf16 %v3380_v44, %v3376_v52  ;;  %v3272_v55 = vpop.f32.mrf.mxu0  ;;  %v3189_v52 = vadd.f32 %v3188_v33, %v2329_v63  ;;  %v3211_v44 = vadd.f32 %v3210_v11, %v3187_v5 }
 0x379   :  { %3629 = vmatmul.bf16.gmra.mxu1 %v3392_v36  ;;  %v3213_v36 = vadd.f32 %v3212_v23, %v3189_v52  ;;  %v3235_v41 = vadd.f32 %v3234_v58, %v3211_v44 }
 0x37a   :  { %v3248_v50 = vpop.f32.mrf.mxu3  ;;  %v3320_v57 = vpop.f32.mrf.mxu2 }
 0x37b   :  { %v3249_v2 = vadd.f32 %v3248_v50, %v3225_v40  ;;  %v3237_v3 = vadd.f32 %v3236_v62, %v3213_v36  ;;  %v3298_v53 = vpop.f32.mrf.mxu1  ;;  %v2330_v40 = vperm.slane %v6534_v1, 3 }
 0x37d   :  { %v3361_v39 = vmax.f32 %v3249_v2, 0.0  ;;  %v3273_v2 = vadd.f32 %v3272_v55, %v2330_v40 }
 0x37f   :  { %v3274_v50 = vpop.f32.mrf.mxu0 }
 0x380   :  { %v3275_v63 = vadd.f32 %v3274_v50, %v2330_v40 }
 0x382   :  { %v3250_v54 = vpop.f32.mrf.mxu3  ;;  %v3322_v42 = vpop.f32.mrf.mxu2 }
 0x383   :  { %v3251_v12 = vadd.f32 %v3250_v54, %v3227_v6  ;;  %v3301_v0 = vpop.f32.mrf.mxu1 }
 0x385   :  { %v3365_v37 = vmax.f32 %v3251_v12, 0.0  ;;  %v3297_v12 = vadd.f32 %v3296_v43, %v3273_v2  ;;  %v5641_v2 = vld [vmem:[%s6704_s13 + $0x18] sm:$0xff] }
 0x386   :  { %3742 = vmatpush.bf16.msra.mxu0 %v5641_v2 }
 0x387   :  { %v3385_v19 = vpack.c.bf16 %v3365_v37, %v3361_v39  ;;  %v3277_v54 = vpop.f32.mrf.mxu0  ;;  %v3299_v39 = vadd.f32 %v3298_v53, %v3275_v63  ;;  %v3321_v37 = vadd.f32 %v3320_v57, %v3297_v12  ;;  %v5640_v12 = vld [vmem:[%s6704_s13 + $0x10] sm:$0xff] }
 0x389   :  { %3643 = vmatmul.bf16.vlgmr.msrb.gmra.mxu2 %v3385_v19  ;;  %v3323_v19 = vadd.f32 %v3322_v42, %v3299_v39 }
 0x38a   :  { %v3253_v13 = vpop.f32.mrf.mxu3  ;;  %v3325_v11 = vpop.f32.mrf.mxu2  ;;  %3743 = vmatpush.bf16.msra.mxu0 %v5640_v12 }
 0x38b   :  { %v3254_v9 = vadd.f32 %v3253_v13, %v3230_v48  ;;  %v3303_v1 = vpop.f32.mrf.mxu1  ;;  %v3278_v48 = vadd.f32 %v3277_v54, %v2330_v40 }
 0x38d   :  { %v3369_v31 = vmax.f32 %v3254_v9, 0.0 }
 0x38f   :  { %v3279_v21 = vpop.f32.mrf.mxu0 }
 0x390   :  { %v3280_v23 = vadd.f32 %v3279_v21, %v2330_v40 }
 0x392   :  { %v3255_v4 = vpop.f32.mrf.mxu3  ;;  %v3327_v33 = vpop.f32.mrf.mxu2  ;;  %v3304_v9 = vadd.f32 %v3303_v1, %v3280_v23 }
 0x393   :  { %v3256_v61 = vadd.f32 %v3255_v4, %v3232_v15  ;;  %v3302_v15 = vadd.f32 %v3301_v0, %v3278_v48  ;;  %v5644_v48 = vld [vmem:[%s6706_s15 + $0x10] sm:$0xff] }
 0x395   :  { %v3373_v34 = vmax.f32 %v3256_v61, 0.0  ;;  %v3326_v62 = vadd.f32 %v3325_v11, %v3302_v15  ;;  %v3328_v61 = vadd.f32 %v3327_v33, %v3304_v9  ;;  %v5638_v33 = vld [vmem:[%s6704_s13] sm:$0xff] }
 0x397   :  { %v3389_v60 = vpack.c.bf16 %v3373_v34, %v3369_v31  ;;  %v3282_v4 = vpop.f32.mrf.mxu0  ;;  %v3306_v34 = vpop.f32.mrf.mxu1 }
 0x398   :  { %v3283_v44 = vadd.f32 %v3282_v4, %v2330_v40 }
 0x399   :  { %3648 = vmatmul.bf16.gmra.mxu2 %v3389_v60 }
 0x39a   :  { %v3258_v45 = vpop.f32.mrf.mxu3  ;;  %v3330_v55 = vpop.f32.mrf.mxu2 }
 0x39b   :  { %v3259_v22 = vadd.f32 %v3258_v45, %v3235_v41 }
 0x39d   :  { %v3377_v30 = vmax.f32 %v3259_v22, 0.0 }
 0x39f   :  { %v3284_v57 = vpop.f32.mrf.mxu0  ;;  %v3308_v36 = vpop.f32.mrf.mxu1 }
 0x3a0   :  { %v3285_v41 = vadd.f32 %v3284_v57, %v2330_v40 }
 0x3a2   :  { %v3260_v25 = vpop.f32.mrf.mxu3  ;;  %v3332_v22 = vpop.f32.mrf.mxu2  ;;  %v3309_v50 = vadd.f32 %v3308_v36, %v3285_v41  ;;  %v1825_v36 = vadd.f32 %v6340_v14, %v6334_v26  ;;  %v1835_v41 = vadd.f32 %v6364_v59, %v6350_v29 }
 0x3a3   :  { %v3261_v32 = vadd.f32 %v3260_v25, %v3237_v3  ;;  %v3307_v3 = vadd.f32 %v3306_v34, %v3283_v44 }
 0x3a5   :  { %v3381_v46 = vmax.f32 %v3261_v32, 0.0  ;;  %v3331_v25 = vadd.f32 %v3330_v55, %v3307_v3  ;;  %v3333_v32 = vadd.f32 %v3332_v22, %v3309_v50 }
 0x3a7   :  { %v3393_v24 = vpack.c.bf16 %v3381_v46, %v3377_v30  ;;  %v3596_v63 = vpop.f32.mrf.mxu0 }
 0x3a9   :  { %3653 = vmatmul.bf16.gmra.mxu2 %v3393_v24 }
 0x3aa   :  { %v3344_v6 = vpop.f32.mrf.mxu3 }
 0x3ab   :  { %v3345_v18 = vadd.f32 %v3344_v6, %v3321_v37  ;;  %v5639_v37 = vld [vmem:[%s6704_s13 + $0x8] sm:$0xff] }
 0x3ac   :  { %3744 = vmatpush.bf16.msra.mxu0 %v5639_v37 }
 0x3ad   :  { %v3362_v13 = vmax.f32 %v3345_v18, 0.0 }
 0x3af   :  { %v3598_v39 = vpop.f32.mrf.mxu0 }
 0x3b0   :  { %3745 = vmatpush.bf16.msra.mxu0 %v5638_v33 }
 0x3b2   :  { %v3346_v58 = vpop.f32.mrf.mxu3 }
 0x3b3   :  { %v3347_v38 = vadd.f32 %v3346_v58, %v3323_v19 }
 0x3b5   :  { %v3366_v10 = vmax.f32 %v3347_v38, 0.0 }
 0x3b7   :  { %v3386_v27 = vpack.c.bf16 %v3366_v10, %v3362_v13  ;;  %v3601_v58 = vpop.f32.mrf.mxu0 }
 0x3b9   :  { %3667 = vmatmul.bf16.vlgmr.msrb.gmra.mxu3 %v3386_v27 }
 0x3ba   :  { %v3349_v56 = vpop.f32.mrf.mxu3 }
 0x3bb   :  { %v3350_v31 = vadd.f32 %v3349_v56, %v3326_v62  ;;  %v5645_v56 = vld [vmem:[%s6706_s15 + $0x18] sm:$0xff] }
 0x3bc   :  { %3798 = vmatpush.bf16.msra.mxu1 %v5645_v56 }
 0x3bd   :  { %v3370_v5 = vmax.f32 %v3350_v31, 0.0 }
 0x3bf   :  { %v3603_v21 = vpop.f32.mrf.mxu0 }
 0x3c0   :  { %3799 = vmatpush.bf16.msra.mxu1 %v5644_v48 }
 0x3c2   :  { %v3351_v28 = vpop.f32.mrf.mxu3 }
 0x3c3   :  { %v3352_v60 = vadd.f32 %v3351_v28, %v3328_v61  ;;  %v5643_v61 = vld [vmem:[%s6706_s15 + $0x8] sm:$0xff] }
 0x3c4   :  { %3800 = vmatpush.bf16.msra.mxu1 %v5643_v61 }
 0x3c5   :  { %v3374_v43 = vmax.f32 %v3352_v60, 0.0 }
 0x3c7   :  { %v3390_v45 = vpack.c.bf16 %v3374_v43, %v3370_v5  ;;  %v3606_v9 = vpop.f32.mrf.mxu0  ;;  %v1830_v43 = vadd.f32 %v6348_v49, %v6342_v20  ;;  %v1859_v20 = vadd.f32 %v6413_v47, %v1835_v41  ;;  %v5653_v47 = vld [vmem:[%s6703_s12] ss:$0 sm:$0xff] }
 0x3c9   :  { %3672 = vmatmul.bf16.gmra.mxu3 %v3390_v45  ;;  %v1854_v3 = vadd.f32 %v6399_v51, %v1830_v43  ;;  %v1883_v59 = vadd.f32 %v6447_v8, %v1859_v20 }
 0x3ca   :  { %v3354_v52 = vpop.f32.mrf.mxu3 }
 0x3cb   :  { %v3355_v53 = vadd.f32 %v3354_v52, %v3331_v25  ;;  %v1878_v49 = vadd.f32 %v6435_v16, %v1854_v3 }
 0x3cd   :  { %v3378_v42 = vmax.f32 %v3355_v53, 0.0  ;;  %v1849_v53 = vadd.f32 %v6384_v17, %v1825_v36 }
 0x3cf   :  { %v1873_v29 = vadd.f32 %v6424_v35, %v1849_v53 }
 0x3d2   :  { %v3356_v30 = vpop.f32.mrf.mxu3 }
 0x3d3   :  { %v3357_v46 = vadd.f32 %v3356_v30, %v3333_v32  ;;  %v3608_v30 = vpop.f32.mrf.mxu0 }
 0x3d5   :  { %v3382_v24 = vmax.f32 %v3357_v46, 0.0 }
 0x3d6   :  { %v3620_v54 = vpop.f32.mrf.mxu1 }
 0x3d7   :  { %v3394_v6 = vpack.c.bf16 %v3382_v24, %v3378_v42  ;;  %v3621_v31 = vadd.f32 %v3620_v54, %v3596_v63  ;;  %v1886_v54 = vadd.f32 %v1878_v49, %v1873_v29 }
 0x3d9   :  { %3677 = vmatmul.bf16.gmra.mxu3 %v3394_v6 }
 0x3de   :  { %v3622_v0 = vpop.f32.mrf.mxu1 }
 0x3df   :  { %v3623_v50 = vadd.f32 %v3622_v0, %v3598_v39 }
 0x3e6   :  { %v3625_v18 = vpop.f32.mrf.mxu1 }
 0x3e7   :  { %v3626_v4 = vadd.f32 %v3625_v18, %v3601_v58  ;;  %v5654_v18 = vld [vmem:[%s6705_s14] ss:$0 sm:$0xff]  ;;  %s3816_s14 = sshll.u32 %s6708_s17, 4  ;;  %s3817_s14 = int_to_ptr.hbm [resolvable:$true] %s3816_s14 }
 0x3ee   :  { %v3627_v10 = vpop.f32.mrf.mxu1 }
 0x3ef   :  { %v3628_v57 = vadd.f32 %v3627_v10, %v3603_v21 }
 0x3f6   :  { %v3630_v23 = vpop.f32.mrf.mxu1 }
 0x3f7   :  { %v3631_v34 = vadd.f32 %v3630_v23, %v3606_v9 }
 0x3fe   :  { %v3632_v22 = vpop.f32.mrf.mxu1 }
 0x3ff   :  { %v3633_v42 = vadd.f32 %v3632_v22, %v3608_v30 }
 0x40c   :  { %v3644_v40 = vpop.f32.mrf.mxu2 }
 0x40d   :  { %v3645_v60 = vadd.f32 %v3644_v40, %v3621_v31  ;;  %v1888_v40 = vadd.f32 %v1886_v54, %v1883_v59 }
 0x414   :  { %v3646_v11 = vpop.f32.mrf.mxu2 }
 0x415   :  { %v3647_v24 = vadd.f32 %v3646_v11, %v3623_v50 }
 0x41c   :  { %v3649_v38 = vpop.f32.mrf.mxu2 }
 0x41d   :  { %v3650_v28 = vadd.f32 %v3649_v38, %v3626_v4 }
 0x424   :  { %v3651_v27 = vpop.f32.mrf.mxu2 }
 0x425   :  { %v3652_v25 = vadd.f32 %v3651_v27, %v3628_v57 }
 0x42c   :  { %v3654_v62 = vpop.f32.mrf.mxu2 }
 0x42d   :  { %v3655_v55 = vadd.f32 %v3654_v62, %v3631_v34 }
 0x434   :  { %v3656_v46 = vpop.f32.mrf.mxu2 }
 0x435   :  { %v3657_v51 = vadd.f32 %v3656_v46, %v3633_v42 }
 0x43c   :  { %v3668_v19 = vpop.f32.mrf.mxu3 }
 0x43d   :  { %v3669_v52 = vadd.f32 %v3668_v19, %v3645_v60  ;;  %v5642_v19 = vld [vmem:[%s6706_s15] sm:$0xff]  ;;  %s5738_s15 = smov [#allocation7]  }
 0x43e   :  { %3801 = vmatpush.bf16.msra.mxu1 %v5642_v19  ;;  %s3814_s26 = sshll.u32 %s5738_s15, 4  ;;  %s3815_s26 = int_to_ptr.vmem [resolvable:$true] %s3814_s26 }
 0x444   :  { %v3670_v13 = vpop.f32.mrf.mxu3 }
 0x445   :  { %v3671_v6 = vadd.f32 %v3670_v13, %v3647_v24 }
 0x44c   :  { %v3673_v1 = vpop.f32.mrf.mxu3 }
 0x44d   :  { %v3674_v5 = vadd.f32 %v3673_v1, %v3650_v28  ;;  %v5655_v1 = vld [vmem:[%s6707_s16] ss:$0 sm:$0xff] }
 0x44f   :  { %v3683_v32 = vadd.f32 %v3674_v5, %v3669_v52 }
 0x454   :  { %v3675_v15 = vpop.f32.mrf.mxu3 }
 0x455   :  { %v3676_v26 = vadd.f32 %v3675_v15, %v3652_v25 }
 0x457   :  { %v3684_v63 = vadd.f32 %v3676_v26, %v3671_v6 }
 0x45c   :  { %v3678_v45 = vpop.f32.mrf.mxu3 }
 0x45d   :  { %v3679_v44 = vadd.f32 %v3678_v45, %v3655_v55 }
 0x45f   :  { %v3685_v14 = vadd.f32 %v3683_v32, %v3679_v44 }
 0x461   :  { %v3687_v17 = vadd.f32 %v3685_v14, %v6444_v7 }
 0x463   :  { %v3693_v0 = vadd.f32 %v5653_v47, %v3687_v17 }
 0x464   :  { %v3680_v2 = vpop.f32.mrf.mxu3 }
 0x465   :  { %v3681_v16 = vadd.f32 %v3680_v2, %v3657_v51  ;;  %v3695_v35 = vmax.f32 %v3693_v0, 0.0 }
 0x467   :  { %v3686_v12 = vadd.f32 %v3684_v63, %v3681_v16 }
 0x469   :  { %v3688_v39 = vadd.f32 %v3686_v12, %v1888_v40 }
 0x46b   :  { %v3694_v37 = vadd.f32 %v5653_v47, %v3688_v39 }
 0x46d   :  { %v3696_v11 = vmax.f32 %v3694_v37, 0.0 }
 0x46f   :  { %v3697_v8 = vpack.c.bf16 %v3696_v11, %v3695_v35 }
 0x471   :  { %5270 = vmatmul.msk.bf16.vlgmr.msra.gmra.mxu0 %vm3734_vm1, %v3697_v8 }
 0x4ee   :  { %v3747_v7 = vpop.f32.mrf.mxu0 }
 0x4ef   :  { %v3748_v58 = vadd.f32 %v5654_v18, %v3747_v7 }
 0x4f1   :  { %v3752_v10 = vmax.f32 %v3748_v58, 0.0 }
 0x4f6   :  { %v3749_v38 = vpop.f32.mrf.mxu0 }
 0x4f7   :  { %v3750_v13 = vadd.f32 %v5654_v18, %v3749_v38 }
 0x4f9   :  { %v3753_v21 = vmax.f32 %v3750_v13, 0.0 }
 0x4fb   :  { %v3754_v27 = vpack.c.bf16 %v3753_v21, %v3752_v10 }
 0x4fd   :  { %5287 = vmatmul.msk.bf16.vlgmr.msra.gmra.mxu1 %vm3734_vm1, %v3754_v27 }
 0x57a   :  { %v3803_v33 = vpop.f32.mrf.mxu1 }
 0x57b   :  { %v3804_v56 = vadd.f32 %v5655_v1, %v3803_v33 }
 0x57d   :  { %3808 = vst [vmem:[#allocation7] sm:$0xff] %v3804_v56 }
 0x582   :  { %v3805_v48 = vpop.f32.mrf.mxu1 }
 0x583   :  { %v3806_v23 = vadd.f32 %v5655_v1, %v3805_v48 }
 0x585   :  { %3809 = vst [vmem:[#allocation7 + $0x8] sm:$0xff] %v3806_v23 }
 0x586   :  { %3822 = dma.vmem_to_hbm [thread:$0]  %s3815_s26, 256, %s3817_s14, [#allocation4], %s5739_s21, %s5739_s21, %s5740_s22  }
 0x587   :  { %5732 = dma.done.wait [#allocation4], 256  }
 0x588   :  { %5733 = vsyncadd [#allocation4], 4294967040 }
 0x589   :  { %3827 = vsyncpa [#allocation3], 1 }
 0x58a   :  { %3828 = vsyncpa [#allocation6], 1 }
 0x58b   :  { %3829 = vsyncpa [#allocation4], 1 }

</bundles_post_ra>
